<compile_context>
chip_gen: v5e
topology: v5e:2x2
jax: 0.10.0
libtpu: 0.0.40
codegen_flags: <defaults>
</compile_context>

<pallas_src>
import math
import jax
import jax.numpy as jnp
from jax.experimental import pallas as pl
from jax.experimental.pallas import tpu as pltpu


# -----------------------------------------------------------------------------
# Config (small but MXU/vreg-aligned shapes consistent with the module)
# -----------------------------------------------------------------------------
B = 2             # batch
S = 128           # sequence length
D_MODEL = 128     # d_model
N_HEADS = 4       # num_heads
D_KV = 32         # d_kv (per-head dim)
INNER = N_HEADS * D_KV          # inner_dim = 128
NUM_BUCKETS = 32                # relative_attention_num_buckets
MAX_DISTANCE = 128              # relative_attention_max_distance
IS_DECODER = False
DROPOUT = 0.0                   # module's dropout_rate; eval-mode / p=0
MATMUL_DTYPE = jnp.bfloat16     # MXU operand dtype (f32 accumulation everywhere)


# -----------------------------------------------------------------------------
# Pallas kernel body: fused QKV proj + head-batched attention + output proj
# -----------------------------------------------------------------------------
def _t5_attention_body(h_ref, wqkv_ref, wo_ref, bias_ref, mask_ref, o_ref):
    h = h_ref[0]                                     # (S, d_model)   bf16
    wqkv = wqkv_ref[...]                             # (d_model, 3*inner)  bf16
    wo = wo_ref[...]                                 # (inner, d_model)    bf16
    bias = bias_ref[0].astype(jnp.float32)           # (H, S, S)  bf16 -> f32

    # Fused QKV projection: one MXU matmul (bf16 operands, f32 accumulate),
    # then a single elementwise cast of the result back to bf16.
    qkv = jnp.dot(h, wqkv, preferred_element_type=jnp.float32)       # (S, 3*inner)
    qkv = qkv.astype(MATMUL_DTYPE)

    def heads(base):
        # (S, inner) slab -> (H, S, D_KV) head-major stack (lane slices + stack).
        return jnp.stack(
            [qkv[:, base + hh * D_KV: base + (hh + 1) * D_KV]
             for hh in range(N_HEADS)], axis=0)

    q3 = heads(0)                 # (H, S, D_KV)
    k3 = heads(INNER)
    v3 = heads(2 * INNER)

    # scale = 1.0 (module builds MemoryEfficientAttentionOp(..., scale=1.0)).
    scores = jnp.einsum("hqd,hkd->hqk", q3, k3,
                        preferred_element_type=jnp.float32)          # (H,S,S) f32
    scores = scores + bias
    if mask_ref is not None:
        # (1, S) additive key mask, broadcast over heads and query positions.
        scores = scores + mask_ref[0]

    # Single stable softmax over all heads, kept in f32 (v5e VPU/EUP-friendly).
    scores = scores - jnp.max(scores, axis=-1, keepdims=True)
    p = jnp.exp(scores)
    p = p * pl.reciprocal(jnp.sum(p, axis=-1, keepdims=True), approx=True)
    # TODO(synk): attention-prob dropout (p=self.dropout) omitted — p=0.0 / eval.

    ctx = jnp.einsum("hqk,hkd->hqd", p.astype(MATMUL_DTYPE), v3,
                     preferred_element_type=jnp.float32)             # (H,S,D_KV)

    # Relayout to (S, H*D_KV) via one lane-axis concat, then a single K=128
    # output-projection matmul (replaces 4x K=32 matmuls + head-sum).
    ctx2d = jnp.concatenate([ctx[hh] for hh in range(N_HEADS)], axis=1)   # (S,inner)
    out = jnp.dot(ctx2d.astype(MATMUL_DTYPE), wo,
                  preferred_element_type=jnp.float32)                    # (S,d_model)

    o_ref[0] = out   # last dim = d_model = 128 -> lane-dense store


def t5_attention_kernel_nomask(h_ref, wqkv_ref, wo_ref, bias_ref, o_ref):
    _t5_attention_body(h_ref, wqkv_ref, wo_ref, bias_ref, None, o_ref)


def t5_attention_kernel_mask(h_ref, wqkv_ref, wo_ref, bias_ref, mask_ref, o_ref):
    _t5_attention_body(h_ref, wqkv_ref, wo_ref, bias_ref, mask_ref, o_ref)


def t5_attention_pallas(hidden_bf16, wqkv, wo, bias_bf16, mask=None):
    """hidden_bf16: (B,S,d_model) bf16; wqkv: (d_model,3*inner) bf16;
    wo: (inner,d_model) bf16; bias_bf16: (1,H,S,S) bf16; mask: (B,1,S) f32 or None."""
    bsz = hidden_bf16.shape[0]
    has_mask = mask is not None

    in_specs = [
        pl.BlockSpec((1, S, D_MODEL), lambda b: (b, 0, 0)),
        # Weight / bias blocks: constant index -> fetched once across the grid.
        pl.BlockSpec((D_MODEL, 3 * INNER), lambda b: (0, 0)),
        pl.BlockSpec((INNER, D_MODEL), lambda b: (0, 0)),
        pl.BlockSpec((1, N_HEADS, S, S), lambda b: (0, 0, 0, 0)),
    ]
    args = [hidden_bf16, wqkv, wo, bias_bf16]
    if has_mask:
        in_specs.append(pl.BlockSpec((1, 1, S), lambda b: (b, 0, 0)))
        args.append(mask)
        kernel = t5_attention_kernel_mask
    else:
        kernel = t5_attention_kernel_nomask

    return pl.pallas_call(
        kernel,
        out_shape=jax.ShapeDtypeStruct((bsz, S, D_MODEL), jnp.float32),
        grid_spec=pltpu.PrefetchScalarGridSpec(
            num_scalar_prefetch=0,
            # grid=(B,) parallel: B=2 -> both v7x TensorCores; one extra ~0.35us
            # step on single-TC v5e/v6e (batch-fold would trade that for v7x idle).
            grid=(bsz,),
            in_specs=in_specs,
            out_specs=pl.BlockSpec((1, S, D_MODEL), lambda b: (b, 0, 0)),
        ),
        compiler_params=pltpu.CompilerParams(
            dimension_semantics=("parallel",)),
    )(*args)


# -----------------------------------------------------------------------------
# Plain-JAX glue: T5 relative position bias (RelativeBias module)
# -----------------------------------------------------------------------------
def relative_position_bucket(relative_position, bidirectional, num_buckets,
                             max_distance):
    relative_buckets = jnp.zeros_like(relative_position)
    if bidirectional:
        num_buckets //= 2
        relative_buckets = relative_buckets + (
            (relative_position > 0).astype(jnp.int32) * num_buckets)
        relative_position = jnp.abs(relative_position)
    else:
        relative_position = -jnp.minimum(relative_position,
                                         jnp.zeros_like(relative_position))
    max_exact = num_buckets // 2
    is_small = relative_position < max_exact
    # Guard log(0): guarded values only used where is_small is False.
    rp_f = jnp.maximum(relative_position.astype(jnp.float32), 1.0)
    rp_if_large = max_exact + (
        jnp.log(rp_f / max_exact) / math.log(max_distance / max_exact)
        * (num_buckets - max_exact)).astype(jnp.int32)
    rp_if_large = jnp.minimum(rp_if_large,
                              jnp.full_like(rp_if_large, num_buckets - 1))
    relative_buckets = relative_buckets + jnp.where(
        is_small, relative_position, rp_if_large)
    return relative_buckets


def relative_bias(query_length, key_length, rel_emb, is_decoder):
    context_position = jnp.arange(query_length, dtype=jnp.int32)[:, None]
    memory_position = jnp.arange(key_length, dtype=jnp.int32)[None, :]
    relative_position = memory_position - context_position
    buckets = relative_position_bucket(
        relative_position, bidirectional=not is_decoder,
        num_buckets=NUM_BUCKETS, max_distance=MAX_DISTANCE)
    values = rel_emb[buckets]                        # (S, S, H) embedding gather
    values = jnp.transpose(values, (2, 0, 1))[None]  # (1, H, S, S)
    return values


# -----------------------------------------------------------------------------
# Full forward (parameters + bias in JAX glue, hot path in Pallas)
# -----------------------------------------------------------------------------
def t5_attention_forward(hidden, params, mask=None):
    bsz = hidden.shape[0]
    pos_bias = relative_bias(S, S, params["rel_emb"], IS_DECODER)   # (1,H,S,S) f32

    # Fused QKV weight + output weight, stored/streamed in bf16 for the MXU.
    wqkv = jnp.concatenate(
        [params["wq"], params["wk"], params["wv"]], axis=1).astype(MATMUL_DTYPE)
    wo = params["wo"].astype(MATMUL_DTYPE)

    hidden_bf16 = hidden.astype(MATMUL_DTYPE)   # halves the hidden DMA
    bias_bf16 = pos_bias.astype(MATMUL_DTYPE)   # halves the (largest) bias DMA

    if mask is not None:
        # Kernel gets the shared (1,H,S,S) bias + the small (B,1,S) key mask;
        # the dense (B,H,S,S) sum is never materialized for the kernel.
        mask_k = jnp.broadcast_to(mask, (bsz, 1, 1, S)).reshape(bsz, 1, S)
        mask_k = mask_k.astype(jnp.float32)
        attn_out = t5_attention_pallas(hidden_bf16, wqkv, wo, bias_bf16, mask_k)
        position_bias = pos_bias + mask       # module returns pos_bias + mask
    else:
        attn_out = t5_attention_pallas(hidden_bf16, wqkv, wo, bias_bf16)
        position_bias = pos_bias              # shared across batch: no tile/repeat

    present_key_value = None   # is_decoder=False / use_cache=False
    return attn_out, present_key_value, position_bias


# -----------------------------------------------------------------------------
# Pure-JAX reference (mirrors attention_native with scale=1.0).
# `matmul_dtype` lets us match the kernel's bf16-operand / f32-accumulate precision.
# -----------------------------------------------------------------------------
def t5_attention_reference(hidden, params, bias, matmul_dtype, mask=None):
    def mm(eq, a, b):
        return jnp.einsum(eq, a.astype(matmul_dtype), b.astype(matmul_dtype),
                          preferred_element_type=jnp.float32)
    q = mm("bsm,mi->bsi", hidden, params["wq"]).reshape(B, S, N_HEADS, D_KV)
    k = mm("bsm,mi->bsi", hidden, params["wk"]).reshape(B, S, N_HEADS, D_KV)
    v = mm("bsm,mi->bsi", hidden, params["wv"]).reshape(B, S, N_HEADS, D_KV)
    scores = mm("bqhd,bkhd->bhqk", q, k) + bias.astype(jnp.float32)
    if mask is not None:
        scores = scores + mask
    probs = jax.nn.softmax(scores, axis=-1)
    ctx = mm("bhqk,bkhd->bqhd", probs, v).reshape(B, S, INNER)
    return mm("bsi,im->bsm", ctx, params["wo"])


# -----------------------------------------------------------------------------
# Main
# -----------------------------------------------------------------------------
if __name__ == "__main__":
    key = jax.random.PRNGKey(0)
    k_h, k_q, k_k, k_v, k_o, k_e = jax.random.split(key, 6)

    hidden = jax.random.normal(k_h, (B, S, D_MODEL), dtype=jnp.float32)

    # nn.Linear(bias=False) -> (in, out) matrices; nn.Embedding(buckets, heads).
    params = {
        "wq": jax.random.normal(k_q, (D_MODEL, INNER), jnp.float32) * 0.05,
        "wk": jax.random.normal(k_k, (D_MODEL, INNER), jnp.float32) * 0.05,
        "wv": jax.random.normal(k_v, (D_MODEL, INNER), jnp.float32) * 0.05,
        "wo": jax.random.normal(k_o, (INNER, D_MODEL), jnp.float32) * 0.05,
        "rel_emb": jax.random.normal(k_e, (NUM_BUCKETS, N_HEADS), jnp.float32) * 0.1,
    }

    # ---- mask=None path -----------------------------------------------------
    attn_out, _, pos_bias = t5_attention_forward(hidden, params, mask=None)
    attn_out = jax.block_until_ready(attn_out)
    assert attn_out.shape == (B, S, D_MODEL)

    bias_bf16 = pos_bias.astype(MATMUL_DTYPE)

    # Correctness vs. a precision-matched reference (bf16 operands/bias, f32 acc).
    ref_matched = t5_attention_reference(hidden, params, bias_bf16, MATMUL_DTYPE)
    err_matched = float(jnp.max(jnp.abs(attn_out - ref_matched)))
    assert jnp.allclose(attn_out, ref_matched, atol=5e-3, rtol=5e-3), err_matched

    # Fidelity vs. a pure-f32 reference (looser: kernel uses bf16 MXU operands/bias).
    ref_f32 = t5_attention_reference(hidden, params, pos_bias, jnp.float32)
    err_f32 = float(jnp.max(jnp.abs(attn_out - ref_f32)))
    assert jnp.allclose(attn_out, ref_f32, atol=5e-2, rtol=5e-2), err_f32

    # ---- masked path (mask streamed separately, no dense (B,H,S,S) kernel input) --
    key_valid = jnp.array([S, S // 2], dtype=jnp.int32)
    key_pos = jnp.arange(S, dtype=jnp.int32)[None, :]
    mask = jnp.where(key_pos < key_valid[:, None], 0.0, -1e9).astype(jnp.float32)
    mask = mask.reshape(B, 1, 1, S)

    attn_out_m, _, pos_bias_m = t5_attention_forward(hidden, params, mask=mask)
    attn_out_m = jax.block_until_ready(attn_out_m)
    assert pos_bias_m.shape == (B, N_HEADS, S, S)

    ref_m = t5_attention_reference(hidden, params, bias_bf16, MATMUL_DTYPE, mask=mask)
    err_m = float(jnp.max(jnp.abs(attn_out_m - ref_m)))
    assert jnp.allclose(attn_out_m, ref_m, atol=5e-3, rtol=5e-3), err_m

    print("KERNEL_OK")
</pallas_src>

<mosaic_0001>
module attributes {stable_mosaic.version = 11 : i64} {
  func.func @t5_attention_kernel_nomask(%arg0: i32, %arg1: memref<1x128x128xbf16, #tpu.memory_space<vmem>>, %arg2: memref<128x384xbf16, #tpu.memory_space<vmem>>, %arg3: memref<128x128xbf16, #tpu.memory_space<vmem>>, %arg4: memref<1x4x128x128xbf16, #tpu.memory_space<vmem>>, %arg5: memref<1x128x128xf32, #tpu.memory_space<vmem>>) attributes {dimension_semantics = [#tpu.dimension_semantics<parallel>], iteration_bounds = array<i64: 2>, scalar_prefetch = 0 : i64, scratch_operands = 0 : i64, tpu.core_type = #tpu.core_type<tc>, window_params = [{transform_indices = @transform_0, window_bounds = array<i64: 1, 128, 128>}, {pipeline_mode = #tpu.pipeline_mode<synchronous>, transform_indices = @transform_1, window_bounds = array<i64: 128, 384>}, {pipeline_mode = #tpu.pipeline_mode<synchronous>, transform_indices = @transform_2, window_bounds = array<i64: 128, 128>}, {pipeline_mode = #tpu.pipeline_mode<synchronous>, transform_indices = @transform_3, window_bounds = array<i64: 1, 4, 128, 128>}, {transform_indices = @transform_4, window_bounds = array<i64: 1, 128, 128>}]} {
    %c0 = arith.constant 0 : index
    %c0_0 = arith.constant 0 : index
    %c0_1 = arith.constant 0 : index
    %0 = vector.load %arg1[%c0, %c0_0, %c0_1] : memref<1x128x128xbf16, #tpu.memory_space<vmem>>, vector<1x128x128xbf16>
    %1 = vector.shape_cast %0 : vector<1x128x128xbf16> to vector<128x128xbf16>
    %c0_2 = arith.constant 0 : index
    %c0_3 = arith.constant 0 : index
    %2 = vector.load %arg2[%c0_2, %c0_3] : memref<128x384xbf16, #tpu.memory_space<vmem>>, vector<128x384xbf16>
    %c0_4 = arith.constant 0 : index
    %c0_5 = arith.constant 0 : index
    %3 = vector.load %arg3[%c0_4, %c0_5] : memref<128x128xbf16, #tpu.memory_space<vmem>>, vector<128x128xbf16>
    %c0_6 = arith.constant 0 : index
    %c0_7 = arith.constant 0 : index
    %c0_8 = arith.constant 0 : index
    %c0_9 = arith.constant 0 : index
    %4 = vector.load %arg4[%c0_6, %c0_7, %c0_8, %c0_9] : memref<1x4x128x128xbf16, #tpu.memory_space<vmem>>, vector<1x4x128x128xbf16>
    %5 = vector.shape_cast %4 : vector<1x4x128x128xbf16> to vector<4x128x128xbf16>
    %6 = arith.extf %5 : vector<4x128x128xbf16> to vector<4x128x128xf32>
    %cst = arith.constant dense<0.000000e+00> : vector<128x384xf32>
    %7 = tpu.matmul %1, %2, %cst {dimension_numbers = #tpu.dot_dimension_numbers<[1], [0], [0], [1], [0, 0, 1, 1], [], []>} : vector<128x128xbf16>, vector<128x384xbf16>, vector<128x384xf32> -> vector<128x384xf32>
    %8 = arith.truncf %7 : vector<128x384xf32> to vector<128x384xbf16>
    %9 = vector.extract_strided_slice %8 {offsets = [0, 0], sizes = [128, 32], strides = [1, 1]} : vector<128x384xbf16> to vector<128x32xbf16>
    %10 = vector.extract_strided_slice %8 {offsets = [0, 32], sizes = [128, 32], strides = [1, 1]} : vector<128x384xbf16> to vector<128x32xbf16>
    %11 = vector.extract_strided_slice %8 {offsets = [0, 64], sizes = [128, 32], strides = [1, 1]} : vector<128x384xbf16> to vector<128x32xbf16>
    %12 = vector.extract_strided_slice %8 {offsets = [0, 96], sizes = [128, 32], strides = [1, 1]} : vector<128x384xbf16> to vector<128x32xbf16>
    %13 = vector.shape_cast %9 : vector<128x32xbf16> to vector<1x128x32xbf16>
    %14 = vector.shape_cast %10 : vector<128x32xbf16> to vector<1x128x32xbf16>
    %15 = vector.shape_cast %11 : vector<128x32xbf16> to vector<1x128x32xbf16>
    %16 = vector.shape_cast %12 : vector<128x32xbf16> to vector<1x128x32xbf16>
    %17 = tpu.concatenate %13, %14, %15, %16 in 0 : vector<1x128x32xbf16>, vector<1x128x32xbf16>, vector<1x128x32xbf16>, vector<1x128x32xbf16> -> vector<4x128x32xbf16>
    %18 = vector.extract_strided_slice %8 {offsets = [0, 128], sizes = [128, 32], strides = [1, 1]} : vector<128x384xbf16> to vector<128x32xbf16>
    %19 = vector.extract_strided_slice %8 {offsets = [0, 160], sizes = [128, 32], strides = [1, 1]} : vector<128x384xbf16> to vector<128x32xbf16>
    %20 = vector.extract_strided_slice %8 {offsets = [0, 192], sizes = [128, 32], strides = [1, 1]} : vector<128x384xbf16> to vector<128x32xbf16>
    %21 = vector.extract_strided_slice %8 {offsets = [0, 224], sizes = [128, 32], strides = [1, 1]} : vector<128x384xbf16> to vector<128x32xbf16>
    %22 = vector.shape_cast %18 : vector<128x32xbf16> to vector<1x128x32xbf16>
    %23 = vector.shape_cast %19 : vector<128x32xbf16> to vector<1x128x32xbf16>
    %24 = vector.shape_cast %20 : vector<128x32xbf16> to vector<1x128x32xbf16>
    %25 = vector.shape_cast %21 : vector<128x32xbf16> to vector<1x128x32xbf16>
    %26 = tpu.concatenate %22, %23, %24, %25 in 0 : vector<1x128x32xbf16>, vector<1x128x32xbf16>, vector<1x128x32xbf16>, vector<1x128x32xbf16> -> vector<4x128x32xbf16>
    %27 = vector.extract_strided_slice %8 {offsets = [0, 256], sizes = [128, 32], strides = [1, 1]} : vector<128x384xbf16> to vector<128x32xbf16>
    %28 = vector.extract_strided_slice %8 {offsets = [0, 288], sizes = [128, 32], strides = [1, 1]} : vector<128x384xbf16> to vector<128x32xbf16>
    %29 = vector.extract_strided_slice %8 {offsets = [0, 320], sizes = [128, 32], strides = [1, 1]} : vector<128x384xbf16> to vector<128x32xbf16>
    %30 = vector.extract_strided_slice %8 {offsets = [0, 352], sizes = [128, 32], strides = [1, 1]} : vector<128x384xbf16> to vector<128x32xbf16>
    %31 = vector.shape_cast %27 : vector<128x32xbf16> to vector<1x128x32xbf16>
    %32 = vector.shape_cast %28 : vector<128x32xbf16> to vector<1x128x32xbf16>
    %33 = vector.shape_cast %29 : vector<128x32xbf16> to vector<1x128x32xbf16>
    %34 = vector.shape_cast %30 : vector<128x32xbf16> to vector<1x128x32xbf16>
    %35 = tpu.concatenate %31, %32, %33, %34 in 0 : vector<1x128x32xbf16>, vector<1x128x32xbf16>, vector<1x128x32xbf16>, vector<1x128x32xbf16> -> vector<4x128x32xbf16>
    "tpu.trace_start"() <{level = 10 : i32, message = "hqd,hkd->hqk"}> : () -> ()
    %cst_10 = arith.constant dense<0.000000e+00> : vector<4x128x128xf32>
    %36 = tpu.matmul %17, %26, %cst_10 {dimension_numbers = #tpu.dot_dimension_numbers<[2], [2], [1], [1], [0, 0, 0, 1, 1, 1], [0], [0]>} : vector<4x128x32xbf16>, vector<4x128x32xbf16>, vector<4x128x128xf32> -> vector<4x128x128xf32>
    "tpu.trace_stop"() : () -> ()
    %37 = arith.addf %36, %6 : vector<4x128x128xf32>
    %cst_11 = arith.constant dense<0xFF800000> : vector<4x128xf32>
    %38 = vector.multi_reduction <maximumf>, %37, %cst_11 [2] : vector<4x128x128xf32> to vector<4x128xf32>
    %39 = vector.shape_cast %38 : vector<4x128xf32> to vector<4x128x1xf32>
    %40 = vector.broadcast %39 : vector<4x128x1xf32> to vector<4x128x128xf32>
    %41 = arith.subf %37, %40 : vector<4x128x128xf32>
    %42 = math.exp %41 : vector<4x128x128xf32>
    %cst_12 = arith.constant dense<0.000000e+00> : vector<4x128xf32>
    %43 = vector.multi_reduction <add>, %42, %cst_12 [2] : vector<4x128x128xf32> to vector<4x128xf32>
    %44 = vector.shape_cast %43 : vector<4x128xf32> to vector<4x128x1xf32>
    %45 = tpu.reciprocal %44 {approx = true} : vector<4x128x1xf32> -> vector<4x128x1xf32>
    %46 = vector.broadcast %45 : vector<4x128x1xf32> to vector<4x128x128xf32>
    %47 = arith.mulf %42, %46 : vector<4x128x128xf32>
    %48 = arith.truncf %47 : vector<4x128x128xf32> to vector<4x128x128xbf16>
    "tpu.trace_start"() <{level = 10 : i32, message = "hqk,hkd->hqd"}> : () -> ()
    %cst_13 = arith.constant dense<0.000000e+00> : vector<4x128x32xf32>
    %49 = tpu.matmul %48, %35, %cst_13 {dimension_numbers = #tpu.dot_dimension_numbers<[2], [1], [1], [2], [0, 0, 0, 1, 1, 2], [0], [0]>} : vector<4x128x128xbf16>, vector<4x128x32xbf16>, vector<4x128x32xf32> -> vector<4x128x32xf32>
    "tpu.trace_stop"() : () -> ()
    %50 = vector.extract_strided_slice %49 {offsets = [0, 0, 0], sizes = [1, 128, 32], strides = [1, 1, 1]} : vector<4x128x32xf32> to vector<1x128x32xf32>
    %51 = vector.shape_cast %50 : vector<1x128x32xf32> to vector<128x32xf32>
    %52 = vector.extract_strided_slice %49 {offsets = [1, 0, 0], sizes = [1, 128, 32], strides = [1, 1, 1]} : vector<4x128x32xf32> to vector<1x128x32xf32>
    %53 = vector.shape_cast %52 : vector<1x128x32xf32> to vector<128x32xf32>
    %54 = vector.extract_strided_slice %49 {offsets = [2, 0, 0], sizes = [1, 128, 32], strides = [1, 1, 1]} : vector<4x128x32xf32> to vector<1x128x32xf32>
    %55 = vector.shape_cast %54 : vector<1x128x32xf32> to vector<128x32xf32>
    %56 = vector.extract_strided_slice %49 {offsets = [3, 0, 0], sizes = [1, 128, 32], strides = [1, 1, 1]} : vector<4x128x32xf32> to vector<1x128x32xf32>
    %57 = vector.shape_cast %56 : vector<1x128x32xf32> to vector<128x32xf32>
    %58 = tpu.concatenate %51, %53, %55, %57 in 1 : vector<128x32xf32>, vector<128x32xf32>, vector<128x32xf32>, vector<128x32xf32> -> vector<128x128xf32>
    %59 = arith.truncf %58 : vector<128x128xf32> to vector<128x128xbf16>
    %cst_14 = arith.constant dense<0.000000e+00> : vector<128x128xf32>
    %60 = tpu.matmul %59, %3, %cst_14 {dimension_numbers = #tpu.dot_dimension_numbers<[1], [0], [0], [1], [0, 0, 1, 1], [], []>} : vector<128x128xbf16>, vector<128x128xbf16>, vector<128x128xf32> -> vector<128x128xf32>
    %c0_15 = arith.constant 0 : index
    %c0_16 = arith.constant 0 : index
    %c0_17 = arith.constant 0 : index
    %61 = vector.load %arg5[%c0_15, %c0_16, %c0_17] : memref<1x128x128xf32, #tpu.memory_space<vmem>>, vector<1x128x128xf32>
    %62 = vector.shape_cast %61 : vector<1x128x128xf32> to vector<128x128xf32>
    %63 = vector.shape_cast %60 : vector<128x128xf32> to vector<1x128x128xf32>
    tpu.vector_store %arg5[%c0_15, %c0_16, %c0_17], %63 {strides = array<i32>} : memref<1x128x128xf32, #tpu.memory_space<vmem>>, vector<1x128x128xf32>,
    return
  }
  func.func @transform_0(%arg0: i32) -> (i32, i32, i32) {
    %c0_i32 = arith.constant 0 : i32
    %c0_i32_0 = arith.constant 0 : i32
    %c0_i32_1 = arith.constant 0 : i32
    return %arg0, %c0_i32, %c0_i32_0 : i32, i32, i32
  }
  func.func @transform_1(%arg0: i32) -> (i32, i32) {
    %c0_i32 = arith.constant 0 : i32
    %c0_i32_0 = arith.constant 0 : i32
    %c0_i32_1 = arith.constant 0 : i32
    return %c0_i32, %c0_i32_0 : i32, i32
  }
  func.func @transform_2(%arg0: i32) -> (i32, i32) {
    %c0_i32 = arith.constant 0 : i32
    %c0_i32_0 = arith.constant 0 : i32
    %c0_i32_1 = arith.constant 0 : i32
    return %c0_i32, %c0_i32_0 : i32, i32
  }
  func.func @transform_3(%arg0: i32) -> (i32, i32, i32, i32) {
    %c0_i32 = arith.constant 0 : i32
    %c0_i32_0 = arith.constant 0 : i32
    %c0_i32_1 = arith.constant 0 : i32
    %c0_i32_2 = arith.constant 0 : i32
    %c0_i32_3 = arith.constant 0 : i32
    return %c0_i32, %c0_i32_0, %c0_i32_1, %c0_i32_2 : i32, i32, i32, i32
  }
  func.func @transform_4(%arg0: i32) -> (i32, i32, i32) {
    %c0_i32 = arith.constant 0 : i32
    %c0_i32_0 = arith.constant 0 : i32
    %c0_i32_1 = arith.constant 0 : i32
    return %arg0, %c0_i32, %c0_i32_0 : i32, i32, i32
  }
}

</mosaic_0001>

<bundles_post_ra>
// kernel: tpu_custom_call.1
= control target key start
LH: loop header
LB: loop body
LE: loop exit
PB: predicated region body
PF: predicated region fallthrough
CT: control target
= control target key end

     0   :  { %9 = vsyncpa [#allocation3], 0  ;;  %s6075_s0 = inlined_call_operand.hbm [shape: bf16[2,128,128], index: 0, kind: input, shape index: {}]   ;;  %s6076_s1 = inlined_call_operand.hbm [shape: bf16[128,384], index: 1, kind: input, shape index: {}]   ;;  %s6077_s2 = inlined_call_operand.hbm [shape: bf16[128,128], index: 2, kind: input, shape index: {}]   ;;  %s6078_s3 = inlined_call_operand.hbm [shape: bf16[1,4,128,128], index: 3, kind: input, shape index: {}]   ;;  %s6079_s4 = inlined_call_operand.hbm [shape: f32[2,128,128], index: 4, kind: output, shape index: {}]  }
   0x1   :  { %11 = vsyncpa [#allocation3 + $0x1], 0 }
   0x2   :  { %12 = vsyncpa [#allocation6], 0 }
   0x3   :  { %13 = vsyncpa [#allocation9], 0 }
   0x4   :  { %14 = vsyncpa [#allocation4], 0 }
   0x5   :  { %16 = vsyncpa [#allocation4 + $0x1], 0  ;;  %s4437_s15 = smov 0   ;;  %s4439_s16 = smov 0  }
   0x6   :  { %s4441_s17 = smov 0   ;;  %s4443_s18 = smov 0  }
   0x7 LB: > { %s4458_s19 = sadd.s32 4294967295, %s4398_s18   ;;  %s3321_s20 = sadd.s32 4294967294, %s4398_s18   ;;  %s4398_s18 = sphi %s4443_s18, %s6305_s18   ;;  %s4394_s17 = sphi %s4441_s17, %s6304_s17   ;;  %s4390_s16 = sphi %s4439_s16, %s6303_s16   ;;  %s4386_s15 = sphi %s4437_s15, %s6302_s15  }
   0x8   : > { %p42_p0 = scmp.ne.s32.totalorder %s4390_s16, %s4386_s15  ;;  %p43_p1 = scmp.eq.s32.totalorder %s4458_s19, 0 }
   0x9   : > { %p129_p2 = scmp.eq.s32.totalorder %s4458_s19, 1  ;;  %p135_p3 = scmp.eq.s32.totalorder %s3321_s20, 1 }
   0xa   : > { %p4467_p4 = por %p43_p1, %p42_p0  ;;  %p3322_p5 = scmp.ge.s32.totalorder %s4398_s18, 1 }
   0xb   : > { %p4472_p6 = por %p135_p3, %p42_p0  ;;  %p142_p7 = scmp.lt.s32.totalorder %s4398_s18, 3 }
   0xc   : > { %s153_s25 = sshll.u32 %s6076_s1, 4  ;;  %s4400_s27 = smov [#allocation5]   ;;  %s154_s25 = int_to_ptr.hbm [resolvable:$true] %s153_s25 }
   0xd   : > { %p4480_p8 = pnand %p3322_p5, %p142_p7  ;;  %s155_s28 = sshll.u32 %s4400_s27, 4  ;;  %s156_s28 = int_to_ptr.vmem [resolvable:$true] %s155_s28 }
   0xe   : > { %s167_s6 = sshll.u32 %s6077_s2, 4  ;;  %s4401_s7 = smov 192   ;;  %s168_s6 = int_to_ptr.hbm [resolvable:$true] %s167_s6 }
   0xf   : > { %p3758_p9 = pneg %p4480_p8  ;;  %s4402_s8 = smov 12  }
  0x10   : > { %s4403_s9 = smov [#allocation7]   ;;  %s4404_s11 = smov 64  }
  0x11   : > { %p4488_p10 = pnand %p3758_p9, %p43_p1  ;;  %s169_s10 = sshll.u32 %s4403_s9, 4  ;;  %s170_s10 = int_to_ptr.vmem [resolvable:$true] %s169_s10 }
  0x12   : > { %s4405_s12 = smov 4   ;;  %s181_s20 = sshll.u32 %s6078_s3, 4  ;;  %s182_s20 = int_to_ptr.hbm [resolvable:$true] %s181_s20 }
  0x13   : > { %3761 = dma.hbm_to_vmem [thread:$0]  (!%p4488_p10), %s154_s25, 3072, %s156_s28, [#allocation6], %s4401_s7, %s4401_s7, %s4402_s8  }
  0x14   : > { %3764 = dma.hbm_to_vmem [thread:$0]  (!%p4488_p10), %s168_s6, 1024, %s170_s10, [#allocation6], %s4404_s11, %s4404_s11, %s4405_s12  }
  0x15   : > { %s4406_s23 = smov [#allocation8]   ;;  %s4512_s25 = sadd.s32 1, %s4398_s18  }
  0x16   : > { %s183_s24 = sshll.u32 %s4406_s23, 4  ;;  %s26_s27 = ssub.s32 %s4398_s18, %s4512_s25  ;;  %s184_s24 = int_to_ptr.vmem [resolvable:$true] %s183_s24 }
  0x17   : > { %3767 = dma.hbm_to_vmem [thread:$0]  (!%p4488_p10), %s182_s20, 4096, %s184_s24, [#allocation9], %s4404_s11, %s4404_s11, %s4405_s12  }
  0x18   : > { %s29_s28 = sadd.s32 1, %s4394_s17  ;;  %p27_p12 = scmp.eq.s32.totalorder %s26_s27, 0 }
  0x19   : > { %p36_p13 = scmp.ne.s32.totalorder %s4394_s17, %s4390_s16  ;;  %p37_p0 = scmp.eq.s32.totalorder %s4398_s18, 0 }
  0x1a   : > { %s4521_s30 = scalar_select %p27_p12, %s4394_s17, %s29_s28  }
  0x1b   : > { %p4525_p3 = por %p129_p2, %p36_p13  ;;  %p3779_p5 = scmp.lt.s32.totalorder %s4398_s18, 2 }
  0x1c   : > { %s197_s29 = sand.u32 1, %s4394_s17   ;;  %s3533_s6 = sshll.u32 %s4398_s18, 6 }
  0x1d   : > { %p38_p7 = por %p37_p0, %p36_p13  ;;  %s3327_s7 = sshll.u32 %s197_s29, 6 }
  0x1e   : > { %s206_s10 = scalar_lea.hbm %s6075_s0, %s3533_s6  ;;  %s201_s14 = scalar_lea.vmem [#allocation2], %s3327_s7 }
  0x1f   : > { %s207_s13 = sshll.u32 %s206_s10, 4  ;;  %s209_s20 = sshll.u32 %s201_s14, 4  ;;  %s208_s13 = int_to_ptr.hbm [resolvable:$true] %s207_s13  ;;  %s210_s20 = int_to_ptr.vmem [resolvable:$true] %s209_s20 }
  0x20   : > { %p4535_p9 = pnand %p3779_p5, %p38_p7  ;;  %s198_s24 = scalar_lea.sflag [#allocation3], %s197_s29 }
  0x21   : > { %s4294_s27 = sshra.s32 %s208_s13, 4  ;;  %s4301_s7 = scalar_lea.hbm %s6075_s0, 128  ;;  %s4295_s27 = int_to_ptr.hbm [resolvable:$true] %s4294_s27 }
  0x22   : > { %s4296_s28 = scalar_lea.hbm %s4295_s27, 64  ;;  %p4298_p10 = pneg %p4535_p9 }
  0x23   : > { %p4297_p2 = scmp.ne.s32.totalorder %s4295_s27, %s4296_s28  ;;  %p4302_p0 = scmp.lt.s32.totalorder %s4295_s27, %s6075_s0 }
  0x24   : > { %p4303_p5 = scmp.lt.s32.totalorder %s4301_s7, %s4296_s28 }
  0x25   : > { %p4299_p12 = pnand %p4298_p10, %p4297_p2 }
  0x26   : > { %p4304_p7 = por %p4303_p5, %p4302_p0 }
  0x27   : > { %p4300_p13 = pneg %p4299_p12 }
  0x29   : > { %p4305_p11 = pnand %p4304_p7, %p4300_p13 }
  0x2b   : > { %4308 = shalt.err (!%p4305_p11)
}
  0x2c   : > { %3771 = dma.hbm_to_vmem [thread:$0]  (!%p4535_p9), %s208_s13, 1024, %s210_s20, %s198_s24, %s4404_s11, %s4404_s11, %s4405_s12  }
  0x2d   : > { %221 = sbr.rel (%p4480_p8) target bundleno = 1551 (0x60f), region = 36 }
  0x32   : > { %s4555_s29 = sand.u32 1, %s4390_s16  }
  0x33   : > { %s3331_s14 = sshll.u32 %s4555_s29, 6  ;;  %s224_s27 = scalar_lea.sflag [#allocation3], %s4555_s29 }
  0x34   : > { %s4559_s28 = scalar_lea.vmem [#allocation2], %s3331_s14 }
  0x35   : > { %4369 = dma.done.wait (%p4467_p4), %s224_s27, 1024  }
  0x36   : > { %4371 = vsyncadd (%p4467_p4), %s224_s27, 4294966272 }
  0x37   : > { %4373 = dma.done.wait (%p43_p1), [#allocation6], 4096  }
  0x38   : > { %4375 = vsyncadd (%p43_p1), [#allocation6], 4294963200 }
  0x39   : > { %4377 = dma.done.wait (%p43_p1), [#allocation9], 4096  }
  0x3a   : > { %4379 = vsyncadd (%p43_p1), [#allocation9], 4294963200  ;;  %v3454_v0 = vld [vmem:[#allocation5 + $0xa8] sm:$0xf]  ;;  %v3564_v1 = vld [vmem:[#allocation5 + $0xb0] sm:$0xf0] }
  0x3b   : > { %v3563_v2 = vld [vmem:[#allocation5 + $0xac] sm:$0xf]  ;;  %v3455_v3 = vor.u32 %v3564_v1, %v3454_v0  ;;  %v3456_v4 = vld [vmem:[#allocation5 + $0xb4] sm:$0xf0]  ;;  %v3462_v5 = vld [vmem:[#allocation5 + $0xb0] sm:$0xf] }
  0x3c   : > { %v3565_v6 = vld [vmem:[#allocation5 + $0xb8] sm:$0xf0]  ;;  %v3459_v7 = vor.u32 %v3563_v2, %v3456_v4  ;;  %v3442_v9 = vld [vmem:[#allocation5 + $0x90] sm:$0xf]  ;;  %v3560_v11 = vld [vmem:[#allocation5 + $0x94] sm:$0xf] }
  0x3d   : > { %v3463_v8 = vor.u32 %v3565_v6, %v3462_v5  ;;  %v3561_v10 = vld [vmem:[#allocation5 + $0x98] sm:$0xf0]  ;;  %636 = vmatpush.bf16.msra.mxu0 %v3455_v3  ;;  %v3444_v13 = vld [vmem:[#allocation5 + $0x9c] sm:$0xf0]  ;;  %v3450_v14 = vld [vmem:[#allocation5 + $0x98] sm:$0xf] }
  0x3e   : > { %v3443_v12 = vor.u32 %v3561_v10, %v3442_v9  ;;  %v3562_v15 = vld [vmem:[#allocation5 + $0xa0] sm:$0xf0]  ;;  %685 = vmatpush.bf16.msra.mxu1 %v3459_v7  ;;  %v3447_v16 = vor.u32 %v3560_v11, %v3444_v13  ;;  %v3430_v18 = vld [vmem:[#allocation5 + $0x78] sm:$0xf]  ;;  %v3557_v20 = vld [vmem:[#allocation5 + $0x7c] sm:$0xf] }
  0x3f   : > { %734 = vmatpush.bf16.msra.mxu2 %v3463_v8  ;;  %v3451_v17 = vor.u32 %v3562_v15, %v3450_v14  ;;  %v3558_v19 = vld [vmem:[#allocation5 + $0x80] sm:$0xf0]  ;;  %v3432_v21 = vld [vmem:[#allocation5 + $0x84] sm:$0xf0]  ;;  %v3438_v22 = vld [vmem:[#allocation5 + $0x80] sm:$0xf] }
  0x40   : > { %v3559_v23 = vld [vmem:[#allocation5 + $0x88] sm:$0xf0]  ;;  %v3431_v24 = vor.u32 %v3558_v19, %v3430_v18  ;;  %v3435_v25 = vor.u32 %v3557_v20, %v3432_v21  ;;  %v3418_v27 = vld [vmem:[#allocation5 + $0x60] sm:$0xf]  ;;  %v3554_v29 = vld [vmem:[#allocation5 + $0x64] sm:$0xf] }
  0x41   : > { %637 = vmatpush.bf16.msra.mxu0 %v3443_v12  ;;  %v3439_v26 = vor.u32 %v3559_v23, %v3438_v22  ;;  %v3555_v28 = vld [vmem:[#allocation5 + $0x68] sm:$0xf0]  ;;  %v3420_v30 = vld [vmem:[#allocation5 + $0x6c] sm:$0xf0]  ;;  %v3426_v31 = vld [vmem:[#allocation5 + $0x68] sm:$0xf] }
  0x42   : > { %686 = vmatpush.bf16.msra.mxu1 %v3447_v16  ;;  %v3556_v32 = vld [vmem:[#allocation5 + $0x70] sm:$0xf0]  ;;  %v3419_v33 = vor.u32 %v3555_v28, %v3418_v27  ;;  %v3423_v34 = vor.u32 %v3554_v29, %v3420_v30  ;;  %v3406_v36 = vld [vmem:[#allocation5 + $0x48] sm:$0xf]  ;;  %v3551_v38 = vld [vmem:[#allocation5 + $0x4c] sm:$0xf] }
  0x43   : > { %735 = vmatpush.bf16.msra.mxu2 %v3451_v17  ;;  %v3427_v35 = vor.u32 %v3556_v32, %v3426_v31  ;;  %v3552_v37 = vld [vmem:[#allocation5 + $0x50] sm:$0xf0]  ;;  %v3408_v39 = vld [vmem:[#allocation5 + $0x54] sm:$0xf0]  ;;  %v3414_v40 = vld [vmem:[#allocation5 + $0x50] sm:$0xf] }
  0x44   : > { %v3553_v41 = vld [vmem:[#allocation5 + $0x58] sm:$0xf0]  ;;  %v3407_v42 = vor.u32 %v3552_v37, %v3406_v36  ;;  %v3411_v43 = vor.u32 %v3551_v38, %v3408_v39  ;;  %v3394_v45 = vld [vmem:[#allocation5 + $0x30] sm:$0xf]  ;;  %v3548_v47 = vld [vmem:[#allocation5 + $0x34] sm:$0xf] }
  0x45   : > { %638 = vmatpush.bf16.msra.mxu0 %v3431_v24  ;;  %v3415_v44 = vor.u32 %v3553_v41, %v3414_v40  ;;  %v3549_v46 = vld [vmem:[#allocation5 + $0x38] sm:$0xf0]  ;;  %v3396_v48 = vld [vmem:[#allocation5 + $0x3c] sm:$0xf0]  ;;  %v3402_v49 = vld [vmem:[#allocation5 + $0x38] sm:$0xf] }
  0x46   : > { %687 = vmatpush.bf16.msra.mxu1 %v3435_v25  ;;  %v3550_v50 = vld [vmem:[#allocation5 + $0x40] sm:$0xf0]  ;;  %v3395_v51 = vor.u32 %v3549_v46, %v3394_v45  ;;  %v3399_v52 = vor.u32 %v3548_v47, %v3396_v48  ;;  %v3382_v54 = vld [vmem:[#allocation5 + $0x18] sm:$0xf]  ;;  %v3545_v56 = vld [vmem:[#allocation5 + $0x1c] sm:$0xf] }
  0x47   : > { %736 = vmatpush.bf16.msra.mxu2 %v3439_v26  ;;  %v3403_v53 = vor.u32 %v3550_v50, %v3402_v49  ;;  %v3546_v55 = vld [vmem:[#allocation5 + $0x20] sm:$0xf0]  ;;  %v3384_v57 = vld [vmem:[#allocation5 + $0x24] sm:$0xf0]  ;;  %v3390_v58 = vld [vmem:[#allocation5 + $0x20] sm:$0xf] }
  0x48   : > { %v3547_v59 = vld [vmem:[#allocation5 + $0x28] sm:$0xf0]  ;;  %v3383_v60 = vor.u32 %v3546_v55, %v3382_v54  ;;  %v3387_v61 = vor.u32 %v3545_v56, %v3384_v57  ;;  %v3370_v63 = vld [vmem:[#allocation5] sm:$0xf]  ;;  %v3542_v1 = vld [vmem:[#allocation5 + $0x4] sm:$0xf] }
  0x49   : > { %639 = vmatpush.bf16.msra.mxu0 %v3419_v33  ;;  %v3391_v62 = vor.u32 %v3547_v59, %v3390_v58  ;;  %v3543_v0 = vld [vmem:[#allocation5 + $0x8] sm:$0xf0]  ;;  %v3372_v2 = vld [vmem:[#allocation5 + $0xc] sm:$0xf0]  ;;  %v3378_v3 = vld [vmem:[#allocation5 + $0x8] sm:$0xf] }
  0x4a   : > { %688 = vmatpush.bf16.msra.mxu1 %v3423_v34  ;;  %v3544_v4 = vld [vmem:[#allocation5 + $0x10] sm:$0xf0]  ;;  %v3371_v5 = vor.u32 %v3543_v0, %v3370_v63  ;;  %v3375_v6 = vor.u32 %v3542_v1, %v3372_v2  ;;  %v3534_v8 = vld [vmem:[%s4559_s28] sm:$0xff]  ;;  %v3535_v9 = vld [vmem:[%s4559_s28 + $0x8] sm:$0xff]  ;;  %s4407_s21 = smov 64   ;;  %s4408_s26 = smov 96  }
  0x4b   : > { %737 = vmatpush.bf16.msra.mxu2 %v3427_v35  ;;  %v3379_v7 = vor.u32 %v3544_v4, %v3378_v3  ;;  %v3536_v10 = vld [vmem:[%s4559_s28 + $0x10] sm:$0xff]  ;;  %v3537_v11 = vld [vmem:[%s4559_s28 + $0x18] sm:$0xff]  ;;  %v3538_v12 = vld [vmem:[%s4559_s28 + $0x20] sm:$0xff]  ;;  %s4409_s11 = smov 32   ;;  %vm1151_vm0 = vcmask 261120   ;;  %vm3048_vm1 = vcmask 523264  }
  0x4c   : > { %v3539_v13 = vld [vmem:[%s4559_s28 + $0x28] sm:$0xff]  ;;  %v3540_v14 = vld [vmem:[%s4559_s28 + $0x30] sm:$0xff]  ;;  %v3541_v15 = vld [vmem:[%s4559_s28 + $0x38] sm:$0xff]  ;;  %vm3065_vm2 = vcmask 785408   ;;  %s3335_s12 = sshll.u32 %s4555_s29, 7  ;;  %s3574_s20 = sshll.u32 %s4458_s19, 7 }
  0x4d   : > { %640 = vmatpush.bf16.msra.mxu0 %v3407_v42  ;;  %s6023_s13 = scalar_lea.vmem [#allocation10], %s3335_s12  ;;  %s3215_s6 = scalar_lea.hbm %s6079_s4, %s3574_s20 }
  0x4e   : > { %689 = vmatpush.bf16.msra.mxu1 %v3411_v43  ;;  %s3216_s8 = sshll.u32 %s6023_s13, 4  ;;  %s3218_s7 = sshll.u32 %s3215_s6, 4  ;;  %s3217_s8 = int_to_ptr.vmem [resolvable:$true] %s3216_s8  ;;  %s3219_s7 = int_to_ptr.hbm [resolvable:$true] %s3218_s7 }
  0x4f   : > { %738 = vmatpush.bf16.msra.mxu2 %v3415_v44  ;;  %s3204_s9 = scalar_lea.sflag [#allocation4], %s4555_s29  ;;  %s4338_s10 = sshra.s32 %s3219_s7, 4  ;;  %s4339_s10 = int_to_ptr.hbm [resolvable:$true] %s4338_s10 }
  0x50   : > { %s4340_s19 = scalar_lea.hbm %s4339_s10, 128  ;;  %s4344_s28 = scalar_lea.hbm %s6079_s4, 256 }
  0x51   : > { %641 = vmatpush.bf16.msra.mxu0 %v3395_v51  ;;  %p4341_p1 = scmp.ne.s32.totalorder %s4339_s10, %s4340_s19  ;;  %p4345_p11 = scmp.lt.s32.totalorder %s4339_s10, %s6079_s4 }
  0x52   : > { %690 = vmatpush.bf16.msra.mxu1 %v3399_v52  ;;  %p4346_p9 = scmp.lt.s32.totalorder %s4344_s28, %s4340_s19 }
  0x53   : > { %739 = vmatpush.bf16.msra.mxu2 %v3403_v53  ;;  %p4342_p4 = pnand %p4341_p1, %p4525_p3 }
  0x54   : > { %p4347_p2 = por %p4346_p9, %p4345_p11 }
  0x55   : > { %642 = vmatpush.bf16.msra.mxu0 %v3383_v60  ;;  %p4343_p8 = pneg %p4342_p4 }
  0x56   : > { %691 = vmatpush.bf16.msra.mxu1 %v3387_v61 }
  0x57   : > { %740 = vmatpush.bf16.msra.mxu2 %v3391_v62  ;;  %p4348_p10 = pnand %p4347_p2, %p4343_p8 }
  0x59   : > { %643 = vmatpush.bf16.msra.mxu0 %v3371_v5 }
  0x5a   : > { %692 = vmatpush.bf16.msra.mxu1 %v3375_v6 }
  0x5b   : > { %741 = vmatpush.bf16.msra.mxu2 %v3379_v7 }
  0x5c   : > { %644 = vmatmul.bf16.vlgmr.msra.gmra.mxu0 %v3534_v8 }
  0x5d   : > { %693 = vmatmul.bf16.vlgmr.msra.gmra.mxu1 %v3534_v8 }
  0x5e   : > { %742 = vmatmul.bf16.vlgmr.msra.gmra.mxu2 %v3534_v8 }
  0x6c   : > { %649 = vmatmul.bf16.gmra.mxu0 %v3535_v9 }
  0x6d   : > { %698 = vmatmul.bf16.gmra.mxu1 %v3535_v9 }
  0x6e   : > { %747 = vmatmul.bf16.gmra.mxu2 %v3535_v9 }
  0x7c   : > { %654 = vmatmul.bf16.gmra.mxu0 %v3536_v10 }
  0x7d   : > { %703 = vmatmul.bf16.gmra.mxu1 %v3536_v10 }
  0x7e   : > { %752 = vmatmul.bf16.gmra.mxu2 %v3536_v10 }
  0x8c   : > { %659 = vmatmul.bf16.gmra.mxu0 %v3537_v11 }
  0x8d   : > { %708 = vmatmul.bf16.gmra.mxu1 %v3537_v11 }
  0x8e   : > { %757 = vmatmul.bf16.gmra.mxu2 %v3537_v11 }
  0x9c   : > { %664 = vmatmul.bf16.gmra.mxu0 %v3538_v12 }
  0x9d   : > { %713 = vmatmul.bf16.gmra.mxu1 %v3538_v12 }
  0x9e   : > { %762 = vmatmul.bf16.gmra.mxu2 %v3538_v12 }
  0xac   : > { %669 = vmatmul.bf16.gmra.mxu0 %v3539_v13 }
  0xad   : > { %718 = vmatmul.bf16.gmra.mxu1 %v3539_v13 }
  0xae   : > { %767 = vmatmul.bf16.gmra.mxu2 %v3539_v13 }
  0xbc   : > { %674 = vmatmul.bf16.gmra.mxu0 %v3540_v14 }
  0xbd   : > { %723 = vmatmul.bf16.gmra.mxu1 %v3540_v14 }
  0xbe   : > { %772 = vmatmul.bf16.gmra.mxu2 %v3540_v14 }
  0xcc   : > { %679 = vmatmul.bf16.gmra.mxu0 %v3541_v15 }
  0xcd   : > { %728 = vmatmul.bf16.gmra.mxu1 %v3541_v15 }
  0xce   : > { %777 = vmatmul.bf16.gmra.mxu2 %v3541_v15 }
  0xd9   : > { %v645_v16 = vpop.f32.mrf.mxu0 }
  0xda   : > { %v694_v17 = vpop.f32.mrf.mxu1 }
  0xdb   : > { %v783_v18 = vpack.c.bf16 %v694_v17, %v645_v16 }
  0xdd   : > { %863 = vrot.lane.b32.xlu1 %v783_v18, %s4407_s21  ;;  %831 = vrot.lane.b32.xlu0 %v783_v18, %s4408_s26  ;;  %v927_v24 = vrot.slane %v783_v18, 4  ;;  %v1103_v26 = vunpack.c.l.b16 %v783_v18 }
  0xdf   : > { %v4589_v28 = vunpack.c.l.b16 %v927_v24 }
  0xe1   : > { %v743_v19 = vpop.f32.mrf.mxu2  ;;  %v647_v21 = vpop.f32.mrf.mxu0 }
  0xe2   : > { %v4583_v20 = vpack.c.bf16 %v743_v19, %v743_v19  ;;  %v696_v22 = vpop.f32.mrf.mxu1 }
  0xe3   : > { %v785_v23 = vpack.c.bf16 %v696_v22, %v647_v21 }
  0xe5   : > { %1039 = vrot.lane.b32.xlu1 %v4583_v20, %s4407_s21  ;;  %895 = vrot.lane.b32.xlu0 %v783_v18, %s4409_s11  ;;  %v928_v25 = vrot.slane %v785_v23, 4  ;;  %v1104_v27 = vunpack.c.l.b16 %v785_v23 }
  0xe6   : > { %865 = vrot.lane.b32.xlu2 %v785_v23, %s4407_s21 }
  0xe7   : > { %v4591_v29 = vunpack.c.l.b16 %v928_v25  ;;  %v4593_v30 = vpack.c.b16 %v1104_v27, %v1103_v26 }
  0xe9   : > { %v745_v31 = vpop.f32.mrf.mxu2  ;;  %v650_v32 = vpop.f32.mrf.mxu0  ;;  %v1143_v33 = vpack.c.b16 %v4591_v29, %v4589_v28 }
  0xea   : > { %v699_v34 = vpop.f32.mrf.mxu1  ;;  %v4597_v35 = vpack.c.bf16 %v745_v31, %v745_v31 }
  0xeb   : > { %v787_v36 = vpack.c.bf16 %v699_v34, %v650_v32 }
  0xed   : > { %1007 = vrot.lane.b32.xlu0 %v4583_v20, %s4408_s26  ;;  %897 = vrot.lane.b32.xlu1 %v785_v23, %s4409_s11  ;;  %v929_v38 = vrot.slane %v787_v36, 4  ;;  %v1105_v41 = vunpack.c.l.b16 %v787_v36 }
  0xee   : > { %1041 = vrot.lane.b32.xlu2 %v4597_v35, %s4407_s21 }
  0xef   : > { %v4607_v43 = vunpack.c.l.b16 %v929_v38 }
  0xf1   : > { %v652_v37 = vpop.f32.mrf.mxu0  ;;  %v748_v45 = vpop.f32.mrf.mxu2 }
  0xf2   : > { %v701_v39 = vpop.f32.mrf.mxu1  ;;  %v4614_v49 = vpack.c.bf16 %v748_v45, %v748_v45 }
  0xf3   : > { %v789_v40 = vpack.c.bf16 %v701_v39, %v652_v37 }
  0xf5   : > { %1009 = vrot.lane.b32.xlu1 %v4597_v35, %s4408_s26  ;;  %833 = vrot.lane.b32.xlu0 %v785_v23, %s4408_s26  ;;  %v930_v42 = vrot.slane %v789_v40, 4  ;;  %v1106_v44 = vunpack.c.l.b16 %v789_v40 }
  0xf6   : > { %899 = vrot.lane.b32.xlu2 %v787_v36, %s4409_s11 }
  0xf7   : > { %v4610_v46 = vunpack.c.l.b16 %v930_v42  ;;  %v4612_v47 = vpack.c.b16 %v1106_v44, %v1105_v41 }
  0xf9   : > { %v655_v48 = vpop.f32.mrf.mxu0  ;;  %v1144_v50 = vpack.c.b16 %v4610_v46, %v4607_v43  ;;  %v750_v58 = vpop.f32.mrf.mxu2 }
  0xfa   : > { %v704_v51 = vpop.f32.mrf.mxu1  ;;  %v4634_v3 = vpack.c.bf16 %v750_v58, %v750_v58 }
  0xfb   : > { %v791_v52 = vpack.c.bf16 %v704_v51, %v655_v48 }
  0xfd   : > { %1043 = vrot.lane.b32.xlu0 %v4614_v49, %s4407_s21  ;;  %835 = vrot.lane.b32.xlu1 %v787_v36, %s4408_s26  ;;  %v931_v54 = vrot.slane %v791_v52, 4  ;;  %v1107_v57 = vunpack.c.l.b16 %v791_v52 }
  0xfe   : > { %867 = vrot.lane.b32.xlu2 %v787_v36, %s4407_s21 }
  0xff   : > { %v4624_v60 = vunpack.c.l.b16 %v931_v54 }
 0x101   : > { %v657_v53 = vpop.f32.mrf.mxu0  ;;  %v753_v4 = vpop.f32.mrf.mxu2 }
 0x102   : > { %v706_v55 = vpop.f32.mrf.mxu1  ;;  %v4640_v9 = vpack.c.bf16 %v753_v4, %v753_v4 }
 0x103   : > { %v793_v56 = vpack.c.bf16 %v706_v55, %v657_v53 }
 0x105   : > { %901 = vrot.lane.b32.xlu0 %v789_v40, %s4409_s11  ;;  %837 = vrot.lane.b32.xlu1 %v789_v40, %s4408_s26  ;;  %v932_v59 = vrot.slane %v793_v56, 4  ;;  %v1108_v61 = vunpack.c.l.b16 %v793_v56 }
 0x106   : > { %1011 = vrot.lane.b32.xlu2 %v4614_v49, %s4408_s26 }
 0x107   : > { %v4628_v62 = vunpack.c.l.b16 %v932_v59  ;;  %v4630_v63 = vpack.c.b16 %v1108_v61, %v1107_v57 }
 0x109   : > { %v660_v0 = vpop.f32.mrf.mxu0  ;;  %v1145_v1 = vpack.c.b16 %v4628_v62, %v4624_v60  ;;  %v755_v15 = vpop.f32.mrf.mxu2 }
 0x10a   : > { %v709_v2 = vpop.f32.mrf.mxu1  ;;  %v4653_v19 = vpack.c.bf16 %v755_v15, %v755_v15 }
 0x10b   : > { %v795_v5 = vpack.c.bf16 %v709_v2, %v660_v0 }
 0x10d   : > { %869 = vrot.lane.b32.xlu0 %v789_v40, %s4407_s21  ;;  %1045 = vrot.lane.b32.xlu1 %v4634_v3, %s4407_s21  ;;  %v933_v7 = vrot.slane %v795_v5, 4  ;;  %v1109_v11 = vunpack.c.l.b16 %v795_v5 }
 0x10e   : > { %839 = vrot.lane.b32.xlu2 %v791_v52, %s4408_s26 }
 0x10f   : > { %v4645_v13 = vunpack.c.l.b16 %v933_v7 }
 0x111   : > { %v662_v6 = vpop.f32.mrf.mxu0  ;;  %v758_v38 = vpop.f32.mrf.mxu2 }
 0x112   : > { %v711_v8 = vpop.f32.mrf.mxu1  ;;  %v4688_v48 = vpack.c.bf16 %v758_v38, %v758_v38 }
 0x113   : > { %v797_v10 = vpack.c.bf16 %v711_v8, %v662_v6 }
 0x115   : > { %1013 = vrot.lane.b32.xlu0 %v4634_v3, %s4408_s26  ;;  %903 = vrot.lane.b32.xlu1 %v791_v52, %s4409_s11  ;;  %v934_v12 = vrot.slane %v797_v10, 4  ;;  %v1110_v14 = vunpack.c.l.b16 %v797_v10 }
 0x116   : > { %1047 = vrot.lane.b32.xlu2 %v4640_v9, %s4407_s21 }
 0x117   : > { %v4649_v16 = vunpack.c.l.b16 %v934_v12  ;;  %v4651_v17 = vpack.c.b16 %v1110_v14, %v1109_v11 }
 0x119   : > { %v665_v18 = vpop.f32.mrf.mxu0  ;;  %v1146_v21 = vpack.c.b16 %v4649_v16, %v4645_v13  ;;  %v760_v53 = vpop.f32.mrf.mxu2  ;;  %v1183_v13 = vsel %vm1151_vm0, %v1145_v1, 0  ;;  %v1180_v1 = vsel %vm1151_vm0, %v1144_v50, 0  ;;  %v1177_v50 = vsel %vm1151_vm0, %v1143_v33, 0 }
 0x11a   : > { %v714_v22 = vpop.f32.mrf.mxu1  ;;  %v4697_v58 = vpack.c.bf16 %v760_v53, %v760_v53 }
 0x11b   : > { %v4661_v23 = vpack.c.bf16 %v714_v22, %v665_v18 }
 0x11d   : > { %1049 = vrot.lane.b32.xlu0 %v4653_v19, %s4407_s21  ;;  %871 = vrot.lane.b32.xlu1 %v791_v52, %s4407_s21  ;;  %v1111_v27 = vunpack.c.l.b16 %v4661_v23 }
 0x11e   : > { %841 = vrot.lane.b32.xlu2 %v793_v56, %s4408_s26 }
 0x121   : > { %v667_v24 = vpop.f32.mrf.mxu0  ;;  %v763_v57 = vpop.f32.mrf.mxu2 }
 0x122   : > { %v716_v25 = vpop.f32.mrf.mxu1  ;;  %v4730_v22 = vpack.c.bf16 %v763_v57, %v763_v57 }
 0x123   : > { %v4663_v26 = vpack.c.bf16 %v716_v25, %v667_v24 }
 0x125   : > { %1015 = vrot.lane.b32.xlu1 %v4640_v9, %s4408_s26  ;;  %843 = vrot.lane.b32.xlu0 %v795_v5, %s4408_s26  ;;  %v1112_v31 = vunpack.c.l.b16 %v4663_v26 }
 0x126   : > { %905 = vrot.lane.b32.xlu2 %v793_v56, %s4409_s11 }
 0x127   : > { %v4671_v32 = vpack.c.b16 %v1112_v31, %v1111_v27 }
 0x129   : > { %v670_v34 = vpop.f32.mrf.mxu0 }
 0x12a   : > { %v719_v36 = vpop.f32.mrf.mxu1 }
 0x12b   : > { %v4676_v37 = vpack.c.bf16 %v719_v36, %v670_v34 }
 0x12d   : > { %907 = vrot.lane.b32.xlu0 %v795_v5, %s4409_s11  ;;  %845 = vrot.lane.b32.xlu1 %v797_v10, %s4408_s26  ;;  %v1113_v42 = vunpack.c.l.b16 %v4676_v37 }
 0x12e   : > { %873 = vrot.lane.b32.xlu2 %v793_v56, %s4407_s21 }
 0x131   : > { %v672_v39 = vpop.f32.mrf.mxu0 }
 0x132   : > { %v721_v40 = vpop.f32.mrf.mxu1 }
 0x133   : > { %v4678_v41 = vpack.c.bf16 %v721_v40, %v672_v39 }
 0x135   : > { %875 = vrot.lane.b32.xlu0 %v795_v5, %s4407_s21  ;;  %909 = vrot.lane.b32.xlu1 %v797_v10, %s4409_s11  ;;  %v1114_v44 = vunpack.c.l.b16 %v4678_v41  ;;  %v765_v5 = vpop.f32.mrf.mxu2 }
 0x136   : > { %1017 = vrot.lane.b32.xlu2 %v4653_v19, %s4408_s26 }
 0x137   : > { %v4686_v45 = vpack.c.b16 %v1114_v44, %v1113_v42 }
 0x139   : > { %v675_v51 = vpop.f32.mrf.mxu0 }
 0x13a   : > { %v724_v52 = vpop.f32.mrf.mxu1 }
 0x13b   : > { %v4707_v2 = vpack.c.bf16 %v724_v52, %v675_v51 }
 0x13d   : > { %1019 = vrot.lane.b32.xlu0 %v4688_v48, %s4408_s26  ;;  %877 = vrot.lane.b32.xlu1 %v797_v10, %s4407_s21  ;;  %v1115_v7 = vunpack.c.l.b16 %v4707_v2  ;;  %v939_v34 = vrot.slane %v4707_v2, 4  ;;  %v768_v38 = vpop.f32.mrf.mxu2 }
 0x13e   : > { %847 = vrot.lane.b32.xlu2 %v4661_v23, %s4408_s26 }
 0x13f   : > { %v1139_v52 = vunpack.c.l.b16 %v939_v34 }
 0x140   : > { %v4695_v54 = vpop.permute.xlu2 %865 }
 0x141   : > { %v677_v55 = vpop.f32.mrf.mxu0 }
 0x142   : > { %v726_v56 = vpop.f32.mrf.mxu1 }
 0x143   : > { %v4709_v4 = vpack.c.bf16 %v726_v56, %v677_v55  ;;  %v4749_v55 = vpack.c.bf16 %v765_v5, %v765_v5  ;;  %v937_v5 = vrot.slane %v4676_v37, 4 }
 0x145   : > { %1021 = vrot.lane.b32.xlu1 %v4697_v58, %s4408_s26  ;;  %849 = vrot.lane.b32.xlu0 %v4663_v26, %s4408_s26  ;;  %v1116_v8 = vunpack.c.l.b16 %v4709_v4  ;;  %v940_v36 = vrot.slane %v4709_v4, 4 }
 0x146   : > { %911 = vrot.lane.b32.xlu2 %v4661_v23, %s4409_s11 }
 0x147   : > { %v4728_v18 = vpack.c.b16 %v1116_v8, %v1115_v7  ;;  %v1140_v53 = vunpack.c.l.b16 %v940_v36  ;;  %v938_v7 = vrot.slane %v4678_v41, 4 }
 0x148   : > { %v4705_v59 = vpop.permute.xlu2 %1041 }
 0x149   : > { %6141 = vst [vmem:[#allocation15_spill] sm:$0xff] %v4705_v59  ;;  %v680_v61 = vpop.f32.mrf.mxu0  ;;  %v1149_v57 = vpack.c.b16 %v1140_v53, %v1139_v52 }
 0x14a   : > { %v729_v0 = vpop.f32.mrf.mxu1 }
 0x14b   : > { %v4711_v6 = vpack.c.bf16 %v729_v0, %v680_v61 }
 0x14d   : > { %913 = vrot.lane.b32.xlu0 %v4663_v26, %s4409_s11  ;;  %851 = vrot.lane.b32.xlu1 %v4676_v37, %s4408_s26  ;;  %v941_v15 = vrot.slane %v4711_v6, 4 }
 0x14e   : > { %879 = vrot.lane.b32.xlu2 %v4661_v23, %s4407_s21 }
 0x14f   : > { %v4721_v10 = vpop.permute.xlu1 %863  ;;  %v4723_v11 = vpop.permute.xlu0 %831  ;;  %v1141_v31 = vunpack.c.l.b16 %v941_v15  ;;  %v4766_v15 = vpack.c.bf16 %v768_v38, %v768_v38  ;;  %v935_v38 = vrot.slane %v4661_v23, 4 }
 0x150   : > { %v4725_v12 = vpop.permute.xlu2 %899 }
 0x151   : > { %v682_v14 = vpop.f32.mrf.mxu0 }
 0x152   : > { %v731_v24 = vpop.f32.mrf.mxu1 }
 0x153   : > { %v4732_v25 = vpack.c.bf16 %v731_v24, %v682_v14  ;;  %v770_v14 = vpop.f32.mrf.mxu2  ;;  %v1195_v24 = vsel %vm1151_vm0, %v1149_v57, 0 }
 0x155   : > { %881 = vrot.lane.b32.xlu0 %v4663_v26, %s4407_s21  ;;  %915 = vrot.lane.b32.xlu1 %v4676_v37, %s4409_s11  ;;  %v942_v27 = vrot.slane %v4732_v25, 4 }
 0x156   : > { %1023 = vrot.lane.b32.xlu2 %v4730_v22, %s4408_s26 }
 0x157   : > { %v4743_v39 = vpop.permute.xlu1 %1039  ;;  %v4745_v40 = vpop.permute.xlu0 %895  ;;  %v1142_v42 = vunpack.c.l.b16 %v942_v27  ;;  %v1137_v27 = vunpack.c.l.b16 %v937_v5 }
 0x158   : > { %6142 = vst [vmem:[#allocation16_spill] sm:$0xff] %v4743_v39  ;;  %v4747_v44 = vpop.permute.xlu2 %867  ;;  %v2377_v39 = vunpack.c.l.b16 %v4653_v19 }
 0x159   : > { %v1150_v51 = vpack.c.b16 %v1142_v42, %v1141_v31  ;;  %v1138_v31 = vunpack.c.l.b16 %v938_v7  ;;  %v936_v42 = vrot.slane %v4663_v26, 4 }
 0x15b   : > { %v1198_v56 = vsel %vm1151_vm0, %v1150_v51, 0  ;;  %v1148_v36 = vpack.c.b16 %v1138_v31, %v1137_v27  ;;  %v773_v52 = vpop.f32.mrf.mxu2  ;;  %v1136_v57 = vunpack.c.l.b16 %v936_v42  ;;  %v4799_v31 = vpack.c.bf16 %v770_v14, %v770_v14 }
 0x15c   : > { %1200 = vmatpush.bf16.xpose.msra.mxu3 %v1198_v56  ;;  %v1135_v56 = vunpack.c.l.b16 %v935_v38  ;;  %v1186_v14 = vsel %vm1151_vm0, %v1146_v21, 0 }
 0x15d   : > { %1025 = vrot.lane.b32.xlu0 %v4749_v55, %s4408_s26  ;;  %883 = vrot.lane.b32.xlu1 %v4676_v37, %s4407_s21  ;;  %v1192_v53 = vsel %vm1151_vm0, %v1148_v36, 0 }
 0x15e   : > { %853 = vrot.lane.b32.xlu2 %v4678_v41, %s4408_s26  ;;  %v1147_v5 = vpack.c.b16 %v1136_v57, %v1135_v56 }
 0x15f   : > { %v4758_v61 = vpop.permute.xlu0 %1007  ;;  %v4760_v0 = vpop.permute.xlu1 %897 }
 0x160   : > { %6143 = vst [vmem:[#allocation17_spill] sm:$0xff] %v4758_v61  ;;  %v4764_v8 = vpop.permute.xlu2 %1011  ;;  %v1189_v27 = vsel %vm1151_vm0, %v1147_v5, 0  ;;  %v2380_v61 = vunpack.c.l.b16 %v4730_v22 }
 0x161   : > { %6144 = vst [vmem:[#allocation18_spill] sm:$0xff] %v4764_v8  ;;  %v2373_v8 = vunpack.c.l.b16 %v4597_v35 }
 0x163   : > { %v775_v36 = vpop.f32.mrf.mxu2 }
 0x164   : > { %1201 = vmatpush.bf16.xpose.msra.mxu3 %v1195_v24  ;;  %v4796_v24 = vpack.c.bf16 %v773_v52, %v773_v52  ;;  %v4813_v42 = vpack.c.bf16 %v775_v36, %v775_v36 }
 0x165   : > { %1027 = vrot.lane.b32.xlu1 %v4766_v15, %s4408_s26  ;;  %855 = vrot.lane.b32.xlu0 %v4707_v2, %s4408_s26 }
 0x166   : > { %917 = vrot.lane.b32.xlu2 %v4678_v41, %s4409_s11 }
 0x167   : > { %v4775_v37 = vpop.permute.xlu1 %1009  ;;  %v4777_v34 = vpop.permute.xlu0 %833 }
 0x168   : > { %6145 = vst [vmem:[#allocation19_spill] sm:$0xff] %v4775_v37  ;;  %v4781_v51 = vpop.permute.xlu2 %839  ;;  %v2376_v37 = vunpack.c.l.b16 %v4640_v9 }
 0x16b   : > { %v778_v52 = vpop.f32.mrf.mxu2 }
 0x16c   : > { %1202 = vmatpush.bf16.xpose.msra.mxu3 %v1192_v53  ;;  %v4847_v60 = vpack.c.bf16 %v778_v52, %v778_v52 }
 0x16d   : > { %919 = vrot.lane.b32.xlu1 %v4707_v2, %s4409_s11  ;;  %887 = vrot.lane.b32.xlu0 %v4707_v2, %s4407_s21 }
 0x16e   : > { %885 = vrot.lane.b32.xlu2 %v4678_v41, %s4407_s21 }
 0x16f   : > { %v4790_v23 = vpop.permute.xlu0 %1043  ;;  %v4792_v26 = vpop.permute.xlu1 %835 }
 0x170   : > { %6146 = vst [vmem:[#allocation20_spill] sm:$0xff] %v4790_v23  ;;  %v4794_v7 = vpop.permute.xlu2 %1047 }
 0x171   : > { %6147 = vst [vmem:[#allocation21_spill] sm:$0xff] %v4794_v7 }
 0x173   : > { %v780_v16 = vpop.f32.mrf.mxu2 }
 0x174   : > { %1203 = vmatpush.bf16.xpose.msra.mxu3 %v1189_v27  ;;  %v4849_v62 = vpack.c.bf16 %v780_v16, %v780_v16  ;;  %v2386_v27 = vunpack.c.l.b16 %v4847_v60  ;;  %v2385_v16 = vunpack.c.l.b16 %v4813_v42 }
 0x175   : > { %1031 = vrot.lane.b32.xlu0 %v4796_v24, %s4408_s26  ;;  %889 = vrot.lane.b32.xlu1 %v4709_v4, %s4407_s21 }
 0x176   : > { %1029 = vrot.lane.b32.xlu2 %v4799_v31, %s4408_s26  ;;  %v2387_v36 = vunpack.c.l.b16 %v4849_v62 }
 0x177   : > { %v4807_v41 = vpop.permute.xlu0 %901  ;;  %v4809_v2 = vpop.permute.xlu1 %837 }
 0x178   : > { %v4811_v38 = vpop.permute.xlu2 %841  ;;  %v2395_v46 = vpack.c.b16 %v2387_v36, %v2386_v27  ;;  %v2382_v27 = vunpack.c.l.b16 %v4766_v15  ;;  %v2383_v36 = vunpack.c.l.b16 %v4799_v31 }
 0x17c   : > { %1204 = vmatpush.bf16.xpose.msra.mxu3 %v1186_v14 }
 0x17d   : > { %1033 = vrot.lane.b32.xlu1 %v4813_v42, %s4408_s26  ;;  %857 = vrot.lane.b32.xlu0 %v4709_v4, %s4408_s26 }
 0x17e   : > { %921 = vrot.lane.b32.xlu2 %v4709_v4, %s4409_s11 }
 0x17f   : > { %v4825_v53 = vpop.permute.xlu0 %869  ;;  %v4827_v56 = vpop.permute.xlu1 %1045 }
 0x180   : > { %6148 = vst [vmem:[#allocation22_spill] sm:$0xff] %v4827_v56  ;;  %v4829_v57 = vpop.permute.xlu2 %905 }
 0x184   : > { %1205 = vmatpush.bf16.xpose.msra.mxu3 %v1183_v13  ;;  %v2384_v13 = vunpack.c.l.b16 %v4796_v24 }
 0x185   : > { %859 = vrot.lane.b32.xlu0 %v4711_v6, %s4408_s26  ;;  %923 = vrot.lane.b32.xlu1 %v4711_v6, %s4409_s11 }
 0x186   : > { %891 = vrot.lane.b32.xlu2 %v4711_v6, %s4407_s21  ;;  %v2394_v33 = vpack.c.b16 %v2385_v16, %v2384_v13 }
 0x187   : > { %v4841_v21 = vpop.permute.xlu0 %1013  ;;  %v4843_v4 = vpop.permute.xlu1 %903 }
 0x188   : > { %6149 = vst [vmem:[#allocation23_spill] sm:$0xff] %v4841_v21  ;;  %v4845_v5 = vpop.permute.xlu2 %873 }
 0x18c   : > { %1206 = vmatpush.bf16.xpose.msra.mxu3 %v1180_v1 }
 0x18d   : > { %1051 = vrot.lane.b32.xlu1 %v4688_v48, %s4407_s21  ;;  %893 = vrot.lane.b32.xlu0 %v4732_v25, %s4407_s21 }
 0x18e   : > { %1035 = vrot.lane.b32.xlu2 %v4847_v60, %s4408_s26 }
 0x18f   : > { %v4863_v14 = vpop.permute.xlu0 %1049  ;;  %v4865_v52 = vpop.permute.xlu1 %871 }
 0x190   : > { %6150 = vst [vmem:[#allocation24_spill] sm:$0xff] %v4863_v14  ;;  %v4867_v43 = vpop.permute.xlu2 %1017 }
 0x191   : > { %6151 = vst [vmem:[#allocation25_spill] sm:$0xff] %v4867_v43 }
 0x194   : > { %1207 = vmatpush.bf16.xpose.msra.mxu3 %v1177_v50  ;;  %v2393_v50 = vpack.c.b16 %v2383_v36, %v2382_v27  ;;  %v2378_v27 = vunpack.c.l.b16 %v4688_v48  ;;  %v2379_v36 = vunpack.c.l.b16 %v4697_v58 }
 0x195   : > { %1055 = vrot.lane.b32.xlu0 %v4730_v22, %s4407_s21  ;;  %861 = vrot.lane.b32.xlu1 %v4732_v25, %s4408_s26 }
 0x196   : > { %925 = vrot.lane.b32.xlu2 %v4732_v25, %s4409_s11  ;;  %v2391_v59 = vpack.c.b16 %v2379_v36, %v2378_v27  ;;  %v2374_v27 = vunpack.c.l.b16 %v4614_v49  ;;  %v2375_v36 = vunpack.c.l.b16 %v4634_v3 }
 0x197   : > { %v4881_v1 = vpop.permute.xlu1 %1015  ;;  %v4883_v28 = vpop.permute.xlu0 %843 }
 0x198   : > { %6152 = vst [vmem:[#allocation26_spill] sm:$0xff] %v4881_v1  ;;  %v4885_v29 = vpop.permute.xlu2 %847  ;;  %v2389_v23 = vpack.c.b16 %v2375_v36, %v2374_v27 }
 0x199   : > { %6153 = vst [vmem:[#allocation27_spill] sm:$0xff] %v4883_v28 }
 0x19a   : > { %6154 = vst [vmem:[#allocation28_spill] sm:$0xff] %v4885_v29 }
 0x19b   : > { %3464 = vmatmul.msk.bf16.vlgmr.msra.gmra.mxu3 %vm1151_vm0, %v4593_v30 }
 0x19c   : > { %2404 = vmatpush.bf16.msrb.mxu3 %v2395_v46  ;;  %v2381_v46 = vunpack.c.l.b16 %v4749_v55 }
 0x19d   : > { %1061 = vrot.lane.b32.xlu0 %v4799_v31, %s4407_s21  ;;  %1057 = vrot.lane.b32.xlu1 %v4749_v55, %s4407_s21 }
 0x19e   : > { %1053 = vrot.lane.b32.xlu2 %v4697_v58, %s4407_s21 }
 0x19f   : > { %v4899_v13 = vpop.permute.xlu0 %907  ;;  %v4901_v16 = vpop.permute.xlu1 %845 }
 0x1a0   : > { %2405 = vmatpush.bf16.msrb.mxu3 %v2394_v33  ;;  %6155 = vst [vmem:[#allocation29_spill] sm:$0xff] %v4901_v16  ;;  %v4903_v30 = vpop.permute.xlu2 %911  ;;  %v2392_v33 = vpack.c.b16 %v2381_v46, %v2380_v61 }
 0x1a1   : > { %6156 = vst [vmem:[#allocation30_spill] sm:$0xff] %v4903_v30 }
 0x1a4   : > { %2406 = vmatpush.bf16.msrb.mxu3 %v2393_v50 }
 0x1a5   : > { %1067 = vrot.lane.b32.xlu0 %v4847_v60, %s4407_s21  ;;  %1063 = vrot.lane.b32.xlu1 %v4796_v24, %s4407_s21 }
 0x1a6   : > { %1059 = vrot.lane.b32.xlu2 %v4766_v15, %s4407_s21 }
 0x1a7   : > { %v4915_v61 = vpop.permute.xlu0 %875  ;;  %v4917_v50 = vpop.permute.xlu1 %909 }
 0x1a8   : > { %2407 = vmatpush.bf16.msrb.mxu3 %v2392_v33  ;;  %6157 = vst [vmem:[#allocation31_spill] sm:$0xff] %v4915_v61  ;;  %v4919_v46 = vpop.permute.xlu2 %879  ;;  %v2390_v33 = vpack.c.b16 %v2377_v39, %v2376_v37 }
 0x1a9   : > { %6158 = vst [vmem:[#allocation32_spill] sm:$0xff] %v4919_v46 }
 0x1ab   : > { %3465 = vmatmul.msk.bf16.gmra.mxu3 %vm1151_vm0, %v4612_v47 }
 0x1ac   : > { %2408 = vmatpush.bf16.msrb.mxu3 %v2391_v59  ;;  %v2372_v59 = vunpack.c.l.b16 %v4583_v20 }
 0x1ad   : > { %1073 = vrot.lane.b32.xlu0 %v4597_v35, %s4409_s11  ;;  %1075 = vrot.lane.b32.xlu1 %v4614_v49, %s4409_s11 }
 0x1ae   : > { %1065 = vrot.lane.b32.xlu2 %v4813_v42, %s4407_s21 }
 0x1af   : > { %v4933_v39 = vpop.permute.xlu0 %1019  ;;  %v4935_v37 = vpop.permute.xlu1 %877 }
 0x1b0   : > { %2409 = vmatpush.bf16.msrb.mxu3 %v2390_v33  ;;  %6159 = vst [vmem:[#allocation33_spill] sm:$0xff] %v4933_v39  ;;  %v4937_v47 = vpop.permute.xlu2 %1023  ;;  %v2388_v33 = vpack.c.b16 %v2373_v8, %v2372_v59 }
 0x1b1   : > { %6160 = vst [vmem:[#allocation34_spill] sm:$0xff] %v4935_v37 }
 0x1b2   : > { %6161 = vst [vmem:[#allocation35_spill] sm:$0xff] %v4937_v47 }
 0x1b4   : > { %2410 = vmatpush.bf16.msrb.mxu3 %v2389_v23 }
 0x1b5   : > { %1079 = vrot.lane.b32.xlu0 %v4640_v9, %s4409_s11  ;;  %1081 = vrot.lane.b32.xlu1 %v4653_v19, %s4409_s11 }
 0x1b6   : > { %1071 = vrot.lane.b32.xlu2 %v4583_v20, %s4409_s11 }
 0x1b7   : > { %v4945_v35 = vpop.permute.xlu1 %1021  ;;  %v4947_v49 = vpop.permute.xlu0 %849 }
 0x1b8   : > { %2411 = vmatpush.bf16.msrb.mxu3 %v2388_v33  ;;  %6162 = vst [vmem:[#allocation36_spill] sm:$0xff] %v4945_v35  ;;  %v4949_v23 = vpop.permute.xlu2 %853 }
 0x1b9   : > { %6163 = vst [vmem:[#allocation37_spill] sm:$0xff] %v4947_v49 }
 0x1ba   : > { %6164 = vst [vmem:[#allocation38_spill] sm:$0xff] %v4949_v23 }
 0x1bb   : > { %3466 = vmatmul.msk.bf16.gmra.mxu3 %vm1151_vm0, %v4630_v63 }
 0x1bd   : > { %1085 = vrot.lane.b32.xlu0 %v4697_v58, %s4409_s11  ;;  %1087 = vrot.lane.b32.xlu1 %v4730_v22, %s4409_s11 }
 0x1be   : > { %1077 = vrot.lane.b32.xlu2 %v4634_v3, %s4409_s11 }
 0x1bf   : > { %v4959_v9 = vpop.permute.xlu0 %913  ;;  %v4961_v20 = vpop.permute.xlu1 %851 }
 0x1c0   : > { %6165 = vst [vmem:[#allocation39_spill] sm:$0xff] %v4959_v9  ;;  %v4963_v19 = vpop.permute.xlu2 %917 }
 0x1c1   : > { %6166 = vst [vmem:[#allocation40_spill] sm:$0xff] %v4961_v20 }
 0x1c2   : > { %6167 = vst [vmem:[#allocation41_spill] sm:$0xff] %v4963_v19 }
 0x1c5   : > { %1091 = vrot.lane.b32.xlu0 %v4766_v15, %s4409_s11  ;;  %1093 = vrot.lane.b32.xlu1 %v4799_v31, %s4409_s11 }
 0x1c6   : > { %1083 = vrot.lane.b32.xlu2 %v4688_v48, %s4409_s11 }
 0x1c7   : > { %v4971_v63 = vpop.permute.xlu0 %881  ;;  %v4973_v58 = vpop.permute.xlu1 %915 }
 0x1c8   : > { %6168 = vst [vmem:[#allocation42_spill] sm:$0xff] %v4971_v63  ;;  %v4975_v3 = vpop.permute.xlu2 %885 }
 0x1c9   : > { %6169 = vst [vmem:[#allocation43_spill] sm:$0xff] %v4973_v58 }
 0x1ca   : > { %6170 = vst [vmem:[#allocation44_spill] sm:$0xff] %v4975_v3 }
 0x1cb   : > { %3467 = vmatmul.msk.bf16.gmra.mxu3 %vm1151_vm0, %v4651_v17 }
 0x1cd   : > { %1097 = vrot.lane.b32.xlu0 %v4813_v42, %s4409_s11  ;;  %1099 = vrot.lane.b32.xlu1 %v4847_v60, %s4409_s11 }
 0x1ce   : > { %1089 = vrot.lane.b32.xlu2 %v4749_v55, %s4409_s11 }
 0x1cf   : > { %v4985_v22 = vpop.permute.xlu0 %1025  ;;  %v4987_v48 = vpop.permute.xlu1 %883 }
 0x1d0   : > { %6171 = vst [vmem:[#allocation45_spill] sm:$0xff] %v4985_v22  ;;  %v4989_v8 = vpop.permute.xlu2 %1029 }
 0x1d1   : > { %6172 = vst [vmem:[#allocation46_spill] sm:$0xff] %v4987_v48 }
 0x1d2   : > { %6173 = vst [vmem:[#allocation47_spill] sm:$0xff] %v4989_v8 }
 0x1d5   : > { %1037 = vrot.lane.b32.xlu0 %v4849_v62, %s4408_s26  ;;  %1069 = vrot.lane.b32.xlu1 %v4849_v62, %s4407_s21 }
 0x1d6   : > { %1095 = vrot.lane.b32.xlu2 %v4796_v24, %s4409_s11 }
 0x1d7   : > { %v4997_v17 = vpop.permute.xlu1 %1027  ;;  %v4999_v15 = vpop.permute.xlu0 %855 }
 0x1d8   : > { %6174 = vst [vmem:[#allocation48_spill] sm:$0xff] %v4999_v15  ;;  %v5001_v55 = vpop.permute.xlu2 %921 }
 0x1d9   : > { %6175 = vst [vmem:[#allocation49_spill] sm:$0xff] %v5001_v55  ;;  %v988_v39 = vrot.slane %v5001_v55, 4 }
 0x1db   : > { %3468 = vmatmul.msk.bf16.gmra.mxu3 %vm1151_vm0, %v4671_v32 }
 0x1de   : > { %1101 = vrot.lane.b32.xlu2 %v4849_v62, %s4409_s11 }
 0x1df   : > { %v5007_v31 = vpop.permute.xlu1 %919  ;;  %v5009_v42 = vpop.permute.xlu0 %887 }
 0x1e0   : > { %6176 = vst [vmem:[#allocation50_spill] sm:$0xff] %v5007_v31  ;;  %v5011_v60 = vpop.permute.xlu2 %891  ;;  %v987_v1 = vrot.slane %v5007_v31, 4 }
 0x1e1   : > { %6177 = vst [vmem:[#allocation51_spill] sm:$0xff] %v5009_v42 }
 0x1e2   : > { %6178 = vst [vmem:[#allocation52_spill] sm:$0xff] %v5011_v60  ;;  %v1575_v47 = vunpack.c.l.b16 %v987_v1  ;;  %v985_v1 = vrot.slane %v4973_v58, 4 }
 0x1e7   : > { %v5013_v27 = vpop.permute.xlu0 %1031  ;;  %v5015_v24 = vpop.permute.xlu1 %889 }
 0x1e8   : > { %6179 = vst [vmem:[#allocation53_spill] sm:$0xff] %v5015_v24  ;;  %v5017_v36 = vpop.permute.xlu2 %1035 }
 0x1eb   : > { %3469 = vmatmul.msk.bf16.gmra.mxu3 %vm1151_vm0, %v4686_v45 }
 0x1ef   : > { %v5021_v59 = vpop.permute.xlu1 %1033  ;;  %v5023_v32 = vpop.permute.xlu0 %857 }
 0x1f0   : > { %6180 = vst [vmem:[#allocation54_spill] sm:$0xff] %v5023_v32  ;;  %v5025_v62 = vpop.permute.xlu2 %925 }
 0x1f1   : > { %6181 = vst [vmem:[#allocation55_spill] sm:$0xff] %v5025_v62  ;;  %v990_v33 = vrot.slane %v5025_v62, 4  ;;  %v973_v62 = vrot.slane %v5011_v60, 4  ;;  %v986_v60 = vrot.slane %v4963_v19, 4 }
 0x1f3   : > { %v1578_v14 = vunpack.c.l.b16 %v990_v33  ;;  %v1432_v31 = vunpack.c.l.b16 %v973_v62 }
 0x1f7   : > { %v5028_v21 = vpop.permute.xlu0 %859  ;;  %v5030_v56 = vpop.permute.xlu1 %923 }
 0x1f8   : > { %6182 = vst [vmem:[#allocation56_spill] sm:$0xff] %v5028_v21  ;;  %v989_v43 = vrot.slane %v5030_v56, 4  ;;  %v5033_v7 = vpop.permute.xlu2 %1053 }
 0x1f9   : > { %6183 = vst [vmem:[#allocation57_spill] sm:$0xff] %v5030_v56 }
 0x1fa   : > { %6184 = vst [vmem:[#allocation58_spill] sm:$0xff] %v5033_v7  ;;  %v1577_v45 = vunpack.c.l.b16 %v989_v43  ;;  %v1576_v7 = vunpack.c.l.b16 %v988_v39  ;;  %v1118_v39 = vunpack.c.l.b16 %v4732_v25  ;;  %v1574_v25 = vunpack.c.l.b16 %v986_v60 }
 0x1fb   : > { %3470 = vmatmul.msk.bf16.gmra.mxu3 %vm1151_vm0, %v4728_v18  ;;  %v972_v18 = vrot.slane %v5015_v24, 4  ;;  %v983_v60 = vrot.slane %v4903_v30, 4 }
 0x1fc   : > { %v1586_v35 = vpack.c.b16 %v1578_v14, %v1577_v45  ;;  %v1585_v14 = vpack.c.b16 %v1576_v7, %v1575_v47  ;;  %v971_v45 = vrot.slane %v5009_v42, 4 }
 0x1fe   : > { %v1633_v22 = vsel %vm1151_vm0, %v1586_v35, 0  ;;  %v1630_v24 = vsel %vm1151_vm0, %v1585_v14, 0 }
 0x1ff   : > { %v5041_v8 = vpop.permute.xlu1 %1051  ;;  %v5043_v56 = vpop.permute.xlu0 %893  ;;  %1635 = vmatpush.bf16.xpose.msrb.mxu2 %v1633_v22  ;;  %v1431_v22 = vunpack.c.l.b16 %v972_v18  ;;  %v969_v18 = vrot.slane %v4987_v48, 4 }
 0x200   : > { %6185 = vst [vmem:[#allocation59_spill] sm:$0xff] %v5041_v8  ;;  %v974_v33 = vrot.slane %v5043_v56, 4  ;;  %v5046_v43 = vpop.permute.xlu2 %1059  ;;  %v1117_v8 = vunpack.c.l.b16 %v4711_v6 }
 0x201   : > { %6186 = vst [vmem:[#allocation60_spill] sm:$0xff] %v5043_v56  ;;  %v957_v56 = vrot.slane %v5028_v21, 4  ;;  %v1428_v58 = vunpack.c.l.b16 %v969_v18  ;;  %v953_v18 = vrot.slane %v4961_v20, 4  ;;  %v951_v20 = vrot.slane %v4885_v29, 4 }
 0x202   : > { %v1433_v55 = vunpack.c.l.b16 %v974_v33  ;;  %v1573_v33 = vunpack.c.l.b16 %v985_v1  ;;  %v1126_v21 = vpack.c.b16 %v1118_v39, %v1117_v8 }
 0x203   : > { %v1287_v42 = vunpack.c.l.b16 %v957_v56 }
 0x204   : > { %v1441_v35 = vpack.c.b16 %v1433_v55, %v1432_v31  ;;  %v1430_v55 = vunpack.c.l.b16 %v971_v45  ;;  %v1584_v19 = vpack.c.b16 %v1574_v25, %v1573_v33  ;;  %v955_v45 = vrot.slane %v4999_v15, 4 }
 0x205   : > { %v1571_v25 = vunpack.c.l.b16 %v983_v60 }
 0x206   : > { %v1488_v62 = vsel %vm1151_vm0, %v1441_v35, 0  ;;  %v956_v35 = vrot.slane %v5023_v32, 4  ;;  %v1440_v1 = vpack.c.b16 %v1431_v22, %v1430_v55  ;;  %v1627_v33 = vsel %vm1151_vm0, %v1584_v19, 0 }
 0x207   : > { %1490 = vmatpush.bf16.xpose.msrb.mxu1 %v1488_v62  ;;  %v5057_v7 = vpop.permute.xlu0 %1055  ;;  %v5059_v47 = vpop.permute.xlu1 %861  ;;  %1636 = vmatpush.bf16.xpose.msrb.mxu2 %v1630_v24  ;;  %v984_v62 = vrot.slane %v4959_v9, 4  ;;  %v970_v24 = vrot.slane %v4975_v3, 4  ;;  %v981_v19 = vrot.slane %v4899_v13, 4 }
 0x208   : > { %6187 = vst [vmem:[#allocation61_spill] sm:$0xff] %v5059_v47  ;;  %v958_v31 = vrot.slane %v5059_v47, 4  ;;  %v5062_v6 = vpop.permute.xlu2 %1065  ;;  %v1286_v48 = vunpack.c.l.b16 %v956_v35  ;;  %v1485_v8 = vsel %vm1151_vm0, %v1440_v1, 0  ;;  %v968_v35 = vrot.slane %v4971_v63, 4 }
 0x209   : > { %v1572_v39 = vunpack.c.l.b16 %v984_v62  ;;  %v1429_v55 = vunpack.c.l.b16 %v970_v24  ;;  %v982_v1 = vrot.slane %v4917_v50, 4  ;;  %v1283_v24 = vunpack.c.l.b16 %v953_v18 }
 0x20a   : > { %v1288_v14 = vunpack.c.l.b16 %v958_v31  ;;  %v1285_v31 = vunpack.c.l.b16 %v955_v45  ;;  %v1427_v45 = vunpack.c.l.b16 %v968_v35  ;;  %v1569_v18 = vunpack.c.l.b16 %v981_v19 }
 0x20b   : > { %3471 = vmatmul.msk.bf16.gmra.mxu3 %vm1151_vm0, %v1126_v21  ;;  %v1583_v62 = vpack.c.b16 %v1572_v39, %v1571_v25  ;;  %v1570_v15 = vunpack.c.l.b16 %v982_v1  ;;  %v3576_v25 = vld [vmem:[#allocation8] sm:$0xff]   ;;  %v966_v35 = vrot.slane %v4935_v37, 4 }
 0x20c   : > { %v1296_v47 = vpack.c.b16 %v1288_v14, %v1287_v42  ;;  %v1295_v14 = vpack.c.b16 %v1286_v48, %v1285_v31 }
 0x20d   : > { %v1624_v48 = vsel %vm1151_vm0, %v1583_v62, 0  ;;  %v965_v62 = vrot.slane %v4915_v61, 4  ;;  %v945_v61 = vrot.slane %v4792_v26, 4 }
 0x20e   : > { %v1343_v56 = vsel %vm1151_vm0, %v1296_v47, 0  ;;  %v1439_v47 = vpack.c.b16 %v1429_v55, %v1428_v58  ;;  %v1340_v60 = vsel %vm1151_vm0, %v1295_v14, 0 }
 0x20f   : > { %1491 = vmatpush.bf16.xpose.msrb.mxu1 %v1485_v8  ;;  %v5073_v22 = vpop.permute.xlu0 %1061  ;;  %1345 = vmatpush.bf16.xpose.msrb.mxu0 %v1343_v56  ;;  %v5075_v21 = vpop.permute.xlu1 %1057  ;;  %v967_v8 = vrot.slane %v4919_v46, 4  ;;  %v954_v56 = vrot.slane %v4949_v23, 4  ;;  %v1582_v23 = vpack.c.b16 %v1570_v15, %v1569_v18  ;;  %v1424_v18 = vunpack.c.l.b16 %v965_v62 }
 0x210   : > { %1637 = vmatpush.bf16.xpose.msrb.mxu2 %v1627_v33  ;;  %v5078_v42 = vpop.permute.xlu2 %1071  ;;  %v1482_v33 = vsel %vm1151_vm0, %v1439_v47, 0  ;;  %v952_v47 = vrot.slane %v4947_v49, 4  ;;  %v977_v62 = vrot.slane %v4725_v12, 4 }
 0x211   : > { %v1426_v39 = vunpack.c.l.b16 %v967_v8  ;;  %v1284_v55 = vunpack.c.l.b16 %v954_v56  ;;  %v980_v8 = vrot.slane %v4829_v57, 4  ;;  %v1425_v56 = vunpack.c.l.b16 %v966_v35 }
 0x213   : > { %v1438_v14 = vpack.c.b16 %v1427_v45, %v1426_v39  ;;  %v1294_v1 = vpack.c.b16 %v1284_v55, %v1283_v24  ;;  %v1621_v39 = vsel %vm1151_vm0, %v1582_v23, 0  ;;  %v1281_v55 = vunpack.c.l.b16 %v951_v20 }
 0x214   : > { %v964_v23 = vrot.slane %v4845_v5, 4  ;;  %v949_v20 = vrot.slane %v4883_v28, 4 }
 0x215   : > { %v1479_v19 = vsel %vm1151_vm0, %v1438_v14, 0  ;;  %v1337_v46 = vsel %vm1151_vm0, %v1294_v1, 0  ;;  %v963_v14 = vrot.slane %v4865_v52, 4  ;;  %v1437_v1 = vpack.c.b16 %v1425_v56, %v1424_v18 }
 0x216   : > { %v1279_v18 = vunpack.c.l.b16 %v949_v20  ;;  %v975_v20 = vrot.slane %v4745_v40, 4 }
 0x217   : > { %1492 = vmatpush.bf16.xpose.msrb.mxu1 %v1482_v33  ;;  %v5088_v32 = vpop.permute.xlu0 %1067  ;;  %1346 = vmatpush.bf16.xpose.msrb.mxu0 %v1340_v60  ;;  %v5090_v58 = vpop.permute.xlu1 %1063  ;;  %v979_v33 = vrot.slane %v4843_v4, 4  ;;  %v3577_v60 = vunpack.c.l.bf16 %v3576_v25 }
 0x218   : > { %1638 = vmatpush.bf16.xpose.msrb.mxu2 %v1624_v48  ;;  %v5093_v31 = vpop.permute.xlu2 %1077  ;;  %v1282_v48 = vunpack.c.l.b16 %v952_v47  ;;  %v1568_v47 = vunpack.c.l.b16 %v980_v8 }
 0x219   : > { %v1567_v49 = vunpack.c.l.b16 %v979_v33 }
 0x21a   : > { %v1293_v33 = vpack.c.b16 %v1282_v48, %v1281_v55  ;;  %v1423_v55 = vunpack.c.l.b16 %v964_v23  ;;  %v947_v23 = vrot.slane %v4781_v51, 4 }
 0x21c   : > { %v1334_v63 = vsel %vm1151_vm0, %v1293_v33, 0 }
 0x21e   : > { %v1209_v3 = vpop.f32.mrf.mxu3 }
 0x21f   : > { %v5103_v45 = vadd.f32 %v3577_v60, %v1209_v3  ;;  %1493 = vmatpush.bf16.xpose.msrb.mxu1 %v1479_v19  ;;  %v5105_v24 = vpop.permute.xlu0 %1073  ;;  %1347 = vmatpush.bf16.xpose.msrb.mxu0 %v1337_v46  ;;  %v5107_v15 = vpop.permute.xlu1 %1075  ;;  %v950_v3 = vrot.slane %v4901_v16, 4  ;;  %v978_v46 = vrot.slane %v4807_v41, 4  ;;  %v1581_v60 = vpack.c.b16 %v1568_v47, %v1567_v49  ;;  %v3703_v47 = vld [vmem:[#allocation8 + $0x8] sm:$0xff]  }
 0x220   : > { %1639 = vmatpush.bf16.xpose.msrb.mxu2 %v1621_v39  ;;  %v5110_v35 = vpop.permute.xlu2 %1083  ;;  %v3578_v19 = vunpack.c.h.bf16 %v3576_v25  ;;  %v1422_v39 = vunpack.c.l.b16 %v963_v14  ;;  %v1565_v14 = vunpack.c.l.b16 %v977_v62 }
 0x221   : > { %6188 = vst [vmem:[#allocation62_spill] sm:$0xff] %v5103_v45  ;;  %1684 = vmax.xlane.f32.xlu0 %v5103_v45  ;;  %v1280_v8 = vunpack.c.l.b16 %v950_v3  ;;  %v1476_v45 = vsel %vm1151_vm0, %v1437_v1, 0  ;;  %v1566_v30 = vunpack.c.l.b16 %v978_v46  ;;  %v1618_v25 = vsel %vm1151_vm0, %v1581_v60, 0 }
 0x222   : > { %v962_v1 = vrot.slane %v4825_v53, 4  ;;  %v976_v46 = vrot.slane %v4760_v0, 4  ;;  %v3581_v60 = vunpack.c.l.bf16 %v3703_v47 }
 0x223   : > { %v1292_v33 = vpack.c.b16 %v1280_v8, %v1279_v18 }
 0x224   : > { %v1564_v16 = vunpack.c.l.b16 %v976_v46 }
 0x225   : > { %v1331_v9 = vsel %vm1151_vm0, %v1292_v33, 0 }
 0x226   : > { %v1211_v29 = vpop.f32.mrf.mxu3 }
 0x227   : > { %1494 = vmatpush.bf16.xpose.msrb.mxu1 %v1476_v45  ;;  %v5121_v56 = vpop.permute.xlu0 %1079  ;;  %1348 = vmatpush.bf16.xpose.msrb.mxu0 %v1334_v63  ;;  %v5123_v49 = vpop.permute.xlu1 %1081  ;;  %v5126_v48 = vadd.f32 %v3578_v19, %v1211_v29  ;;  %v948_v45 = vrot.slane %v4811_v38, 4  ;;  %v1436_v63 = vpack.c.b16 %v1423_v55, %v1422_v39  ;;  %v1580_v29 = vpack.c.b16 %v1566_v30, %v1565_v14 }
 0x228   : > { %1640 = vmatpush.bf16.xpose.msrb.mxu2 %v1618_v25  ;;  %v5128_v3 = vpop.permute.xlu2 %1089  ;;  %v961_v19 = vrot.slane %v4747_v44, 4  ;;  %v1421_v25 = vunpack.c.l.b16 %v962_v1  ;;  %v1277_v14 = vunpack.c.l.b16 %v947_v23  ;;  %v959_v1 = vrot.slane %v4721_v10, 4 }
 0x229   : > { %6189 = vst [vmem:[#allocation63_spill] sm:$0xff] %v5126_v48  ;;  %1686 = vmax.xlane.f32.xlu1 %v5126_v48  ;;  %v1278_v62 = vunpack.c.l.b16 %v948_v45  ;;  %v1473_v48 = vsel %vm1151_vm0, %v1436_v63, 0  ;;  %v1615_v55 = vsel %vm1151_vm0, %v1580_v29, 0  ;;  %v1563_v45 = vunpack.c.l.b16 %v975_v20 }
 0x22a   : > { %v1420_v18 = vunpack.c.l.b16 %v961_v19  ;;  %v1418_v29 = vunpack.c.l.b16 %v959_v1 }
 0x22b   : > { %v1291_v33 = vpack.c.b16 %v1278_v62, %v1277_v14  ;;  %v1579_v46 = vpack.c.b16 %v1564_v16, %v1563_v45  ;;  %v1540_v14 = vunpack.c.l.b16 %v4760_v0  ;;  %v1275_v45 = vunpack.c.l.b16 %v945_v61 }
 0x22c   : > { %v1435_v63 = vpack.c.b16 %v1421_v25, %v1420_v18  ;;  %v3704_v18 = vld [vmem:[#allocation8 + $0x10] sm:$0xff]  }
 0x22d   : > { %v1328_v20 = vsel %vm1151_vm0, %v1291_v33, 0  ;;  %v1612_v16 = vsel %vm1151_vm0, %v1579_v46, 0  ;;  %v944_v33 = vrot.slane %v4777_v34, 4 }
 0x22e   : > { %v1214_v28 = vpop.f32.mrf.mxu3  ;;  %v1470_v23 = vsel %vm1151_vm0, %v1435_v63, 0  ;;  %v1539_v63 = vunpack.c.l.b16 %v4745_v40 }
 0x22f   : > { %v5139_v39 = vadd.f32 %v3581_v60, %v1214_v28  ;;  %1495 = vmatpush.bf16.xpose.msrb.mxu1 %v1473_v48  ;;  %v5141_v8 = vpop.permute.xlu0 %1085  ;;  %1349 = vmatpush.bf16.xpose.msrb.mxu0 %v1331_v9  ;;  %v5143_v30 = vpop.permute.xlu1 %1087  ;;  %v946_v28 = vrot.slane %v4809_v2, 4  ;;  %v3582_v60 = vunpack.c.h.bf16 %v3703_v47  ;;  %v960_v9 = vrot.slane %v4695_v54, 4 }
 0x230   : > { %1641 = vmatpush.bf16.xpose.msrb.mxu2 %v1615_v55  ;;  %v1096_v48 = vpop.permute.xlu2 %1095  ;;  %v1555_v46 = vpack.c.b16 %v1540_v14, %v1539_v63 }
 0x231   : > { %6190 = vst [vmem:[#allocation64_spill] sm:$0xff] %v5139_v39  ;;  %1688 = vmax.xlane.f32.xlu1 %v5139_v39  ;;  %v1276_v55 = vunpack.c.l.b16 %v946_v28  ;;  %v1419_v25 = vunpack.c.l.b16 %v960_v9  ;;  %v3585_v28 = vunpack.c.l.bf16 %v3704_v18 }
 0x233   : > { %v1434_v1 = vpack.c.b16 %v1419_v25, %v1418_v29  ;;  %v1394_v29 = vunpack.c.l.b16 %v4721_v10 }
 0x235   : > { %v1467_v9 = vsel %vm1151_vm0, %v1434_v1, 0 }
 0x236   : > { %v1216_v19 = vpop.f32.mrf.mxu3 }
 0x237   : > { %1496 = vmatpush.bf16.xpose.msrb.mxu1 %v1470_v23  ;;  %v5153_v39 = vpop.permute.xlu0 %1091  ;;  %1350 = vmatpush.bf16.xpose.msrb.mxu0 %v1328_v20  ;;  %v5155_v62 = vpop.permute.xlu1 %1093  ;;  %v5158_v47 = vadd.f32 %v3582_v60, %v1216_v19  ;;  %v1290_v23 = vpack.c.b16 %v1276_v55, %v1275_v45  ;;  %v943_v20 = vrot.slane %v4723_v11, 4  ;;  %v1395_v45 = vunpack.c.l.b16 %v4695_v54 }
 0x238   : > { %1642 = vmatpush.bf16.xpose.msrb.mxu2 %v1612_v16  ;;  %v1102_v60 = vpop.permute.xlu2 %1101  ;;  %v1274_v16 = vunpack.c.l.b16 %v944_v33  ;;  %v2769_v10 = vunpack.c.l.b16 %v5153_v39  ;;  %v1249_v39 = vunpack.c.l.b16 %v4723_v11  ;;  %v2513_v11 = vunpack.c.l.b16 %v5013_v27 }
 0x239   : > { %1690 = vmax.xlane.f32.xlu2 %v5158_v47  ;;  %v1325_v40 = vsel %vm1151_vm0, %v1290_v23, 0  ;;  %v2774_v55 = vunpack.c.l.b16 %v1102_v60  ;;  %v1273_v14 = vunpack.c.l.b16 %v943_v20  ;;  %v2770_v60 = vunpack.c.l.b16 %v5155_v62 }
 0x23a   : > { %v1250_v62 = vunpack.c.l.b16 %v4777_v34  ;;  %v2643_v34 = vunpack.c.l.b16 %v5062_v6  ;;  %v1397_v6 = vunpack.c.l.b16 %v4825_v53  ;;  %v2763_v53 = vunpack.c.l.b16 %v5121_v56 }
 0x23b   : > { %v1289_v33 = vpack.c.b16 %v1274_v16, %v1273_v14  ;;  %v2515_v16 = vunpack.c.l.b16 %v5017_v36  ;;  %v2642_v36 = vunpack.c.l.b16 %v5090_v58 }
 0x23e   : > { %v1219_v19 = vpop.f32.mrf.mxu3 }
 0x23f   : > { %v5166_v37 = vadd.f32 %v3585_v28, %v1219_v19  ;;  %3488 = vmatmul.msk.bf16.vlgmr.msrb.gmra.mxu2 %vm1151_vm0, %v1555_v46  ;;  %1497 = vmatpush.bf16.xpose.msrb.mxu1 %v1467_v9  ;;  %v1098_v0 = vpop.permute.xlu0 %1097  ;;  %v1100_v61 = vpop.permute.xlu1 %1099  ;;  %v3586_v28 = vunpack.c.h.bf16 %v3704_v18  ;;  %v1410_v46 = vpack.c.b16 %v1395_v45, %v1394_v29  ;;  %v2771_v19 = vunpack.c.l.b16 %v1096_v48  ;;  %v5181_v29 = vld [vmem:[#allocation8 + $0x18] sm:$0xff]  }
 0x240   : > { %1351 = vmatpush.bf16.xpose.msrb.mxu0 %v1325_v40  ;;  %v2773_v25 = vunpack.c.l.b16 %v1100_v61  ;;  %v2772_v1 = vunpack.c.l.b16 %v1098_v0  ;;  %v1322_v40 = vsel %vm1151_vm0, %v1289_v33, 0  ;;  %v2644_v18 = vunpack.c.l.b16 %v5088_v32 }
 0x241   : > { %1692 = vmax.xlane.f32.xlu0 %v5166_v37  ;;  %v1541_v45 = vunpack.c.l.b16 %v4725_v12  ;;  %v3589_v33 = vunpack.c.l.bf16 %v5181_v29  ;;  %v2641_v12 = vunpack.c.l.b16 %v5073_v22  ;;  %v1396_v22 = vunpack.c.l.b16 %v4747_v44 }
 0x242   : > { %v2782_v63 = vpack.c.b16 %v2774_v55, %v2773_v25  ;;  %v2781_v9 = vpack.c.b16 %v2772_v1, %v2771_v19  ;;  %v1542_v55 = vunpack.c.l.b16 %v4807_v41  ;;  %v2514_v25 = vunpack.c.l.b16 %v5021_v59 }
 0x243   : > { %v2767_v1 = vunpack.c.l.b16 %v5143_v30  ;;  %v1265_v41 = vpack.c.b16 %v1250_v62, %v1249_v39  ;;  %v2768_v59 = vunpack.c.l.b16 %v5128_v3  ;;  %v2652_v30 = vpack.c.b16 %v2643_v34, %v2642_v36  ;;  %v6191_v3 = vld [vmem:[#allocation47_spill] sm:$0xff]  ;;  %v6194_v62 = vld [vmem:[#allocation36_spill] sm:$0xff] }
 0x244   : > { %2791 = vmatpush.bf16.msra.mxu2 %v2782_v63  ;;  %v2780_v63 = vpack.c.b16 %v2770_v60, %v2769_v10  ;;  %v1556_v58 = vpack.c.b16 %v1542_v55, %v1541_v45  ;;  %v2512_v10 = vunpack.c.l.b16 %v6191_v3  ;;  %v2765_v60 = vunpack.c.l.b16 %v5110_v35  ;;  %v6195_v36 = vld [vmem:[#allocation59_spill] sm:$0xff]  ;;  %v6196_v45 = vld [vmem:[#allocation33_spill] sm:$0xff] }
 0x245   : > { %v2638_v35 = vunpack.c.l.b16 %v5057_v7  ;;  %v1411_v39 = vpack.c.b16 %v1397_v6, %v1396_v22  ;;  %v2508_v55 = vunpack.c.l.b16 %v6194_v62  ;;  %v2507_v7 = vunpack.c.l.b16 %v6196_v45  ;;  %v6202_v22 = vld [vmem:[#allocation22_spill] sm:$0xff] }
 0x246   : > { %v1221_v23 = vpop.f32.mrf.mxu3  ;;  %3480 = vmatmul.msk.bf16.vlgmr.msrb.gmra.mxu1 %vm1151_vm0, %v1410_v46  ;;  %v2523_v46 = vpack.c.b16 %v2514_v25, %v2513_v11  ;;  %v1251_v11 = vunpack.c.l.b16 %v4792_v26  ;;  %v1252_v34 = vunpack.c.l.b16 %v4809_v2  ;;  %v6200_v2 = vld [vmem:[#allocation21_spill] sm:$0xff] }
 0x247   : > { %v1038_v20 = vpop.permute.xlu0 %1037  ;;  %v1070_v61 = vpop.permute.xlu1 %1069  ;;  %v5177_v54 = vadd.f32 %v3586_v28, %v1221_v23  ;;  %v2511_v28 = vunpack.c.l.b16 %v4997_v17  ;;  %v2779_v23 = vpack.c.b16 %v2768_v59, %v2767_v1  ;;  %v2640_v17 = vunpack.c.l.b16 %v5046_v43  ;;  %v6197_v1 = vld [vmem:[#allocation58_spill] sm:$0xff] }
 0x248   : > { %v2516_v48 = vunpack.c.l.b16 %v1038_v20  ;;  %1352 = vmatpush.bf16.xpose.msrb.mxu0 %v1322_v40  ;;  %v2645_v0 = vunpack.c.l.b16 %v1070_v61  ;;  %2792 = vmatpush.bf16.msra.mxu2 %v2781_v9  ;;  %v2766_v9 = vunpack.c.l.b16 %v5141_v8  ;;  %v6192_v8 = vld [vmem:[#allocation45_spill] sm:$0xff]  ;;  %v2762_v59 = vunpack.c.l.b16 %v5093_v31 }
 0x249   : > { %1694 = vmax.xlane.f32.xlu1 %v5177_v54  ;;  %v2510_v20 = vunpack.c.l.b16 %v6192_v8  ;;  %v2522_v40 = vpack.c.b16 %v2512_v10, %v2511_v28  ;;  %v2651_v61 = vpack.c.b16 %v2641_v12, %v2640_v17  ;;  %v6199_v28 = vld [vmem:[#allocation26_spill] sm:$0xff]  ;;  %v2520_v12 = vpack.c.b16 %v2508_v55, %v2507_v7  ;;  %v6203_v8 = vld [vmem:[#allocation23_spill] sm:$0xff] }
 0x24a   : > { %v2524_v14 = vpack.c.b16 %v2516_v48, %v2515_v16  ;;  %v2653_v32 = vpack.c.b16 %v2645_v0, %v2644_v18  ;;  %v2639_v16 = vunpack.c.l.b16 %v5075_v21  ;;  %v2764_v18 = vunpack.c.l.b16 %v5123_v49  ;;  %v6193_v0 = vld [vmem:[#allocation35_spill] sm:$0xff] }
 0x24b   : > { %v2778_v43 = vpack.c.b16 %v2766_v9, %v2765_v60  ;;  %v3590_v48 = vunpack.c.h.bf16 %v5181_v29  ;;  %v2509_v44 = vunpack.c.l.b16 %v6193_v0  ;;  %v2636_v21 = vunpack.c.l.b16 %v6195_v36  ;;  %v6207_v0 = vld [vmem:[#allocation16_spill] sm:$0xff] }
 0x24c   : > { %2662 = vmatpush.bf16.msra.mxu1 %v2653_v32  ;;  %2793 = vmatpush.bf16.msra.mxu2 %v2780_v63  ;;  %v2761_v49 = vunpack.c.l.b16 %v5107_v15  ;;  %v2777_v29 = vpack.c.b16 %v2764_v18, %v2763_v53  ;;  %v2637_v63 = vunpack.c.l.b16 %v6197_v1  ;;  %v6198_v15 = vld [vmem:[#allocation24_spill] sm:$0xff]  ;;  %v2760_v9 = vunpack.c.l.b16 %v5105_v24  ;;  %v6205_v53 = vld [vmem:[#allocation18_spill] sm:$0xff] }
 0x24d   : > { %v2521_v25 = vpack.c.b16 %v2510_v20, %v2509_v44  ;;  %v2634_v6 = vunpack.c.l.b16 %v6200_v2  ;;  %v2759_v31 = vunpack.c.l.b16 %v5078_v42  ;;  %v1266_v10 = vpack.c.b16 %v1252_v34, %v1251_v11  ;;  %v6206_v42 = vld [vmem:[#allocation20_spill] sm:$0xff]  ;;  %v6217_v2 = vld [vmem:[#allocation39_spill] sm:$0xff] }
 0x24e   : > { %v1224_v19 = vpop.f32.mrf.mxu3  ;;  %v2776_v26 = vpack.c.b16 %v2762_v59, %v2761_v49  ;;  %v2633_v60 = vunpack.c.l.b16 %v6202_v22  ;;  %v2504_v20 = vunpack.c.l.b16 %v6203_v8  ;;  %v2503_v18 = vunpack.c.l.b16 %v6205_v53 }
 0x24f   : > { %v5198_v27 = vadd.f32 %v3589_v33, %v1224_v19  ;;  %3472 = vmatmul.msk.bf16.vlgmr.msrb.gmra.mxu0 %vm1151_vm0, %v1265_v41  ;;  %3489 = vmatmul.msk.bf16.gmra.mxu2 %vm1151_vm0, %v1556_v58  ;;  %v3706_v33 = vld [vmem:[#allocation8 + $0x20] sm:$0xff]   ;;  %v1543_v41 = vunpack.c.l.b16 %v4843_v4  ;;  %v2635_v58 = vunpack.c.l.b16 %v6198_v15  ;;  %v1544_v19 = vunpack.c.l.b16 %v4829_v57  ;;  %v6201_v4 = vld [vmem:[#allocation25_spill] sm:$0xff] }
 0x250   : > { %2533 = vmatpush.bf16.msra.mxu0 %v2524_v14  ;;  %2663 = vmatpush.bf16.msra.mxu1 %v2652_v30  ;;  %v2650_v14 = vpack.c.b16 %v2639_v16, %v2638_v35  ;;  %v2649_v30 = vpack.c.b16 %v2637_v63, %v2636_v21  ;;  %v2506_v3 = vunpack.c.l.b16 %v6201_v4  ;;  %v2630_v44 = vunpack.c.l.b16 %v6207_v0  ;;  %v6208_v35 = vld [vmem:[#allocation19_spill] sm:$0xff]  ;;  %v3707_v63 = vld [vmem:[#allocation8 + $0x28] sm:$0xff]  }
 0x251   : > { %2794 = vmatpush.bf16.msra.mxu2 %v2779_v23  ;;  %1696 = vmax.xlane.f32.xlu2 %v5198_v27  ;;  %v3593_v23 = vunpack.c.l.bf16 %v3706_v33  ;;  %v1557_v17 = vpack.c.b16 %v1544_v19, %v1543_v41  ;;  %v2648_v57 = vpack.c.b16 %v2635_v58, %v2634_v6  ;;  %v2518_v55 = vpack.c.b16 %v2504_v20, %v2503_v18  ;;  %v6209_v21 = vld [vmem:[#allocation15_spill] sm:$0xff] }
 0x252   : > { %v3594_v36 = vunpack.c.h.bf16 %v3706_v33  ;;  %v1546_v33 = vunpack.c.l.b16 %v4917_v50  ;;  %v1253_v11 = vunpack.c.l.b16 %v4781_v51  ;;  %v1545_v34 = vunpack.c.l.b16 %v4899_v13  ;;  %v6214_v50 = vld [vmem:[#allocation31_spill] sm:$0xff] }
 0x253   : > { %v3597_v41 = vunpack.c.l.bf16 %v3707_v63  ;;  %v1548_v6 = vunpack.c.l.b16 %v6217_v2  ;;  %v6218_v4 = vld [vmem:[#allocation27_spill] sm:$0xff] }
 0x254   : > { %2534 = vmatpush.bf16.msra.mxu0 %v2523_v46  ;;  %2664 = vmatpush.bf16.msra.mxu1 %v2651_v61  ;;  %v2505_v46 = vunpack.c.l.b16 %v6199_v28  ;;  %v2775_v61 = vpack.c.b16 %v2760_v9, %v2759_v31  ;;  %v1558_v15 = vpack.c.b16 %v1546_v33, %v1545_v34  ;;  %v3708_v9 = vld [vmem:[#allocation8 + $0x30] sm:$0xff]   ;;  %v6219_v31 = vld [vmem:[#allocation30_spill] sm:$0xff]  ;;  %v6239_v2 = vld [vmem:[#allocation55_spill] sm:$0xff] }
 0x255   : > { %2795 = vmatpush.bf16.msra.mxu2 %v2778_v43  ;;  %v2632_v43 = vunpack.c.l.b16 %v6206_v42  ;;  %v3602_v53 = vunpack.c.h.bf16 %v3708_v9  ;;  %v6232_v33 = vld [vmem:[#allocation38_spill] sm:$0xff]  ;;  %v6233_v34 = vld [vmem:[#allocation49_spill] sm:$0xff] }
 0x256   : > { %v1226_v56 = vpop.f32.mrf.mxu3  ;;  %3481 = vmatmul.msk.bf16.gmra.mxu1 %vm1151_vm0, %v1411_v39  ;;  %v2502_v39 = vunpack.c.l.b16 %v6208_v35 }
 0x257   : > { %v5219_v32 = vadd.f32 %v3590_v48, %v1226_v56  ;;  %v1398_v48 = vunpack.c.l.b16 %v4865_v52  ;;  %v2647_v62 = vpack.c.b16 %v2633_v60, %v2632_v43  ;;  %v6210_v56 = vld [vmem:[#allocation17_spill] sm:$0xff] }
 0x258   : > { %2535 = vmatpush.bf16.msra.mxu0 %v2522_v40  ;;  %2665 = vmatpush.bf16.msra.mxu1 %v2650_v14  ;;  %v2519_v40 = vpack.c.b16 %v2506_v3, %v2505_v46  ;;  %v2631_v14 = vunpack.c.l.b16 %v6209_v21  ;;  %v2501_v49 = vunpack.c.l.b16 %v6210_v56  ;;  %v6213_v46 = vld [vmem:[#allocation34_spill] sm:$0xff]  ;;  %v1255_v3 = vunpack.c.l.b16 %v6218_v4 }
 0x259   : > { %2796 = vmatpush.bf16.msra.mxu2 %v2777_v29  ;;  %1698 = vmax.xlane.f32.xlu0 %v5219_v32 }
 0x25a   : > { %v2646_v29 = vpack.c.b16 %v2631_v14, %v2630_v44  ;;  %v2517_v45 = vpack.c.b16 %v2502_v39, %v2501_v49  ;;  %v6225_v44 = vld [vmem:[#allocation43_spill] sm:$0xff]  ;;  %v6226_v39 = vld [vmem:[#allocation28_spill] sm:$0xff]  ;;  %v6228_v14 = vld [vmem:[#allocation46_spill] sm:$0xff] }
 0x25b   : > { %v1549_v35 = vunpack.c.l.b16 %v6225_v44  ;;  %v1404_v56 = vunpack.c.l.b16 %v6228_v14  ;;  %v6229_v49 = vld [vmem:[#allocation44_spill] sm:$0xff]  ;;  %v3726_v44 = vld [vmem:[#allocation8 + $0xc0] sm:$0xff]  }
 0x25c   : > { %2536 = vmatpush.bf16.msra.mxu0 %v2521_v25  ;;  %2666 = vmatpush.bf16.msra.mxu1 %v2649_v30  ;;  %v1399_v25 = vunpack.c.l.b16 %v4845_v5  ;;  %v1254_v5 = vunpack.c.l.b16 %v4811_v38  ;;  %v1401_v38 = vunpack.c.l.b16 %v6213_v46  ;;  %v3598_v30 = vunpack.c.h.bf16 %v3707_v63  ;;  %v6231_v63 = vld [vmem:[#allocation50_spill] sm:$0xff] }
 0x25d   : > { %2797 = vmatpush.bf16.msra.mxu2 %v2776_v26  ;;  %v6216_v26 = vld [vmem:[#allocation29_spill] sm:$0xff] }
 0x25e   : > { %v1229_v24 = vpop.f32.mrf.mxu3  ;;  %v1412_v52 = vpack.c.b16 %v1399_v25, %v1398_v48  ;;  %v1267_v59 = vpack.c.b16 %v1254_v5, %v1253_v11  ;;  %v6224_v48 = vld [vmem:[#allocation37_spill] sm:$0xff]  ;;  %v1551_v5 = vunpack.c.l.b16 %v6231_v63  ;;  %v1260_v11 = vunpack.c.l.b16 %v6232_v33 }
 0x25f   : > { %v5237_v16 = vadd.f32 %v3593_v23, %v1229_v24  ;;  %3473 = vmatmul.msk.bf16.gmra.mxu0 %vm1151_vm0, %v1266_v10  ;;  %3490 = vmatmul.msk.bf16.gmra.mxu2 %vm1151_vm0, %v1557_v17  ;;  %v1256_v23 = vunpack.c.l.b16 %v6216_v26  ;;  %v1547_v10 = vunpack.c.l.b16 %v6219_v31  ;;  %v3601_v17 = vunpack.c.l.bf16 %v3708_v9  ;;  %v6222_v24 = vld [vmem:[#allocation32_spill] sm:$0xff] }
 0x260   : > { %2537 = vmatpush.bf16.msra.mxu0 %v2520_v12  ;;  %2667 = vmatpush.bf16.msra.mxu1 %v2648_v57  ;;  %v1400_v12 = vunpack.c.l.b16 %v6214_v50  ;;  %v6221_v57 = vld [vmem:[#allocation42_spill] sm:$0xff]  ;;  %v1258_v0 = vunpack.c.l.b16 %v6224_v48  ;;  %v6238_v26 = vld [vmem:[#allocation48_spill] sm:$0xff] }
 0x261   : > { %6204 = vst [vmem:[#allocation47_spill] sm:$0xff] %v5237_v16  ;;  %2798 = vmatpush.bf16.msra.mxu2 %v2775_v61  ;;  %1700 = vmax.xlane.f32.xlu0 %v5237_v16  ;;  %v1559_v22 = vpack.c.b16 %v1548_v6, %v1547_v10  ;;  %v1268_v60 = vpack.c.b16 %v1256_v23, %v1255_v3  ;;  %v1402_v61 = vunpack.c.l.b16 %v6222_v24  ;;  %v1261_v23 = vunpack.c.l.b16 %v6238_v26  ;;  %v6240_v31 = vld [vmem:[#allocation60_spill] sm:$0xff] }
 0x262   : > { %v1413_v51 = vpack.c.b16 %v1401_v38, %v1400_v12  ;;  %v6235_v38 = vld [vmem:[#allocation51_spill] sm:$0xff]  ;;  %v1554_v6 = vunpack.c.l.b16 %v6239_v2  ;;  %v1409_v10 = vunpack.c.l.b16 %v6240_v31  ;;  %v6244_v2 = vld [vmem:[#allocation62_spill] sm:$0xff] }
 0x263   : > { %v1406_v50 = vunpack.c.l.b16 %v6235_v38 }
 0x264   : > { %2538 = vmatpush.bf16.msra.mxu0 %v2519_v40  ;;  %2668 = vmatpush.bf16.msra.mxu1 %v2647_v62  ;;  %v1403_v40 = vunpack.c.l.b16 %v6221_v57  ;;  %v1257_v62 = vunpack.c.l.b16 %v6226_v39  ;;  %v3673_v39 = vunpack.c.l.bf16 %v3726_v44 }
 0x266   : > { %v1231_v7 = vpop.f32.mrf.mxu3  ;;  %3482 = vmatmul.msk.bf16.gmra.mxu1 %vm1151_vm0, %v1412_v52  ;;  %v1414_v18 = vpack.c.b16 %v1403_v40, %v1402_v61  ;;  %v1405_v52 = vunpack.c.l.b16 %v6229_v49  ;;  %v6243_v40 = vld [vmem:[#allocation56_spill] sm:$0xff] }
 0x267   : > { %v5251_v1 = vadd.f32 %v3594_v36, %v1231_v7  ;;  %v1269_v36 = vpack.c.b16 %v1258_v0, %v1257_v62  ;;  %v1263_v24 = vunpack.c.l.b16 %v6243_v40 }
 0x268   : > { %2539 = vmatpush.bf16.msra.mxu0 %v2518_v55  ;;  %2669 = vmatpush.bf16.msra.mxu1 %v2646_v29  ;;  %v6227_v55 = vld [vmem:[#allocation41_spill] sm:$0xff]  ;;  %v1415_v29 = vpack.c.b16 %v1405_v52, %v1404_v56  ;;  %v5321_v56 = vld [vmem:[#allocation8 + $0x88] sm:$0xff]  }
 0x269   : > { %6211 = vst [vmem:[#allocation45_spill] sm:$0xff] %v5251_v1  ;;  %1702 = vmax.xlane.f32.xlu1 %v5251_v1  ;;  %v1550_v25 = vunpack.c.l.b16 %v6227_v55  ;;  %v3645_v49 = vunpack.c.l.bf16 %v5321_v56  ;;  %v5494_v1 = vld [vmem:[#allocation8 + $0xf8] sm:$0xff]  }
 0x26b   : > { %v1560_v21 = vpack.c.b16 %v1550_v25, %v1549_v35  ;;  %v3710_v35 = vld [vmem:[#allocation8 + $0x40] sm:$0xff]  }
 0x26c   : > { %2540 = vmatpush.bf16.msra.mxu0 %v2517_v45  ;;  %v6230_v45 = vld [vmem:[#allocation40_spill] sm:$0xff]  ;;  %v3609_v62 = vunpack.c.l.bf16 %v3710_v35 }
 0x26d   : > { %v1259_v7 = vunpack.c.l.b16 %v6230_v45 }
 0x26e   : > { %v1234_v58 = vpop.f32.mrf.mxu3 }
 0x26f   : > { %v5258_v28 = vadd.f32 %v3597_v41, %v1234_v58  ;;  %3474 = vmatmul.msk.bf16.gmra.mxu0 %vm1151_vm0, %v1267_v59  ;;  %3491 = vmatmul.msk.bf16.gmra.mxu2 %vm1151_vm0, %v1558_v15  ;;  %v1552_v41 = vunpack.c.l.b16 %v6233_v34  ;;  %v1270_v59 = vpack.c.b16 %v1260_v11, %v1259_v7  ;;  %v6234_v58 = vld [vmem:[#allocation53_spill] sm:$0xff] }
 0x270   : > { %v1407_v46 = vunpack.c.l.b16 %v6234_v58 }
 0x271   : > { %6212 = vst [vmem:[#allocation35_spill] sm:$0xff] %v5258_v28  ;;  %1704 = vmax.xlane.f32.xlu1 %v5258_v28  ;;  %v1561_v15 = vpack.c.b16 %v1552_v41, %v1551_v5  ;;  %v3727_v41 = vld [vmem:[#allocation8 + $0xc8] sm:$0xff]  }
 0x272   : > { %v1416_v12 = vpack.c.b16 %v1407_v46, %v1406_v50  ;;  %v3677_v58 = vunpack.c.l.bf16 %v3727_v41  ;;  %v3674_v46 = vunpack.c.h.bf16 %v3726_v44  ;;  %v6246_v44 = vld [vmem:[#allocation64_spill] sm:$0xff] }
 0x276   : > { %v1236_v19 = vpop.f32.mrf.mxu3  ;;  %3483 = vmatmul.msk.bf16.gmra.mxu1 %vm1151_vm0, %v1413_v51 }
 0x277   : > { %v5266_v13 = vadd.f32 %v3598_v30, %v1236_v19  ;;  %v6236_v30 = vld [vmem:[#allocation54_spill] sm:$0xff]  ;;  %v6237_v19 = vld [vmem:[#allocation57_spill] sm:$0xff] }
 0x278   : > { %v1262_v51 = vunpack.c.l.b16 %v6236_v30  ;;  %v1553_v9 = vunpack.c.l.b16 %v6237_v19 }
 0x279   : > { %6215 = vst [vmem:[#allocation36_spill] sm:$0xff] %v5266_v13  ;;  %1706 = vmax.xlane.f32.xlu2 %v5266_v13 }
 0x27a   : > { %v1271_v4 = vpack.c.b16 %v1262_v51, %v1261_v23  ;;  %v1562_v3 = vpack.c.b16 %v1554_v6, %v1553_v9 }
 0x27e   : > { %v1239_v8 = vpop.f32.mrf.mxu3 }
 0x27f   : > { %v5273_v20 = vadd.f32 %v3601_v17, %v1239_v8  ;;  %3475 = vmatmul.msk.bf16.gmra.mxu0 %vm1151_vm0, %v1268_v60  ;;  %3492 = vmatmul.msk.bf16.gmra.mxu2 %vm1151_vm0, %v1559_v22  ;;  %v6241_v17 = vld [vmem:[#allocation52_spill] sm:$0xff]  ;;  %v6242_v8 = vld [vmem:[#allocation61_spill] sm:$0xff] }
 0x280   : > { %v1408_v22 = vunpack.c.l.b16 %v6241_v17  ;;  %v1264_v57 = vunpack.c.l.b16 %v6242_v8 }
 0x281   : > { %6220 = vst [vmem:[#allocation59_spill] sm:$0xff] %v5273_v20  ;;  %1708 = vmax.xlane.f32.xlu1 %v5273_v20 }
 0x282   : > { %v1417_v60 = vpack.c.b16 %v1409_v10, %v1408_v22  ;;  %v1272_v61 = vpack.c.b16 %v1264_v57, %v1263_v24 }
 0x286   : > { %v1241_v42 = vpop.f32.mrf.mxu3  ;;  %3484 = vmatmul.msk.bf16.gmra.mxu1 %vm1151_vm0, %v1414_v18 }
 0x287   : > { %v5281_v43 = vadd.f32 %v3602_v53, %v1241_v42  ;;  %v3718_v53 = vld [vmem:[#allocation8 + $0x80] sm:$0xff]  }
 0x288   : > { %v3641_v18 = vunpack.c.l.bf16 %v3718_v53  ;;  %v3642_v52 = vunpack.c.h.bf16 %v3718_v53 }
 0x289   : > { %6223 = vst [vmem:[#allocation33_spill] sm:$0xff] %v5281_v43  ;;  %1710 = vmax.xlane.f32.xlu2 %v5281_v43 }
 0x28f   : > { %3476 = vmatmul.msk.bf16.gmra.mxu0 %vm1151_vm0, %v1269_v36  ;;  %3493 = vmatmul.msk.bf16.gmra.mxu2 %vm1151_vm0, %v1560_v21 }
 0x294   : > { %v1685_v51 = vpop.xlane.xlu0 %1684 }
 0x295   : > { %v1812_v6 = vsub.f32 %v6244_v2, %v1685_v51 }
 0x296   : > { %3485 = vmatmul.msk.bf16.gmra.mxu1 %vm1151_vm0, %v1415_v29  ;;  %v3610_v29 = vunpack.c.h.bf16 %v3710_v35 }
 0x297   : > { %v1876_v22 = vmul.f32 1.442695, %v1812_v6  ;;  %v3720_v6 = vld [vmem:[#allocation8 + $0x90] sm:$0xff]  }
 0x29c   : > { %v1687_v50 = vpop.xlane.xlu1 %1686 }
 0x29f   : > { %3477 = vmatmul.msk.bf16.gmra.mxu0 %vm1151_vm0, %v1270_v59  ;;  %3494 = vmatmul.msk.bf16.gmra.mxu2 %vm1151_vm0, %v1561_v15  ;;  %v3678_v15 = vunpack.c.h.bf16 %v3727_v41 }
 0x2a6   : > { %3486 = vmatmul.msk.bf16.gmra.mxu1 %vm1151_vm0, %v1416_v12 }
 0x2ac   : > { %v1691_v63 = vpop.xlane.xlu2 %1690 }
 0x2ad   : > { %v1815_v59 = vsub.f32 %v5158_v47, %v1691_v63  ;;  %v3711_v47 = vld [vmem:[#allocation8 + $0x48] sm:$0xff]  }
 0x2ae   : > { %v3613_v31 = vunpack.c.l.bf16 %v3711_v47  ;;  %v3614_v10 = vunpack.c.h.bf16 %v3711_v47 }
 0x2af   : > { %3478 = vmatmul.msk.bf16.gmra.mxu0 %vm1151_vm0, %v1271_v4  ;;  %3495 = vmatmul.msk.bf16.gmra.mxu2 %vm1151_vm0, %v1562_v3  ;;  %v1882_v12 = vmul.f32 1.442695, %v1815_v59  ;;  %v6245_v4 = vld [vmem:[#allocation63_spill] sm:$0xff]  ;;  %v5372_v59 = vld [vmem:[#allocation8 + $0xd8] sm:$0xff]  }
 0x2b0   : > { %v1813_v3 = vsub.f32 %v6245_v4, %v1687_v50  ;;  %v3721_v4 = vld [vmem:[#allocation8 + $0x98] sm:$0xff]  }
 0x2b1   : > { %3948 = vpow2.f32 %v1882_v12 }
 0x2b2   : > { %v1878_v8 = vmul.f32 1.442695, %v1813_v3  ;;  %3950 = vpow2.f32 %v1876_v22  ;;  %v3654_v3 = vunpack.c.h.bf16 %v3721_v4 }
 0x2b4   : > { %v1693_v57 = vpop.xlane.xlu0 %1692  ;;  %3952 = vpow2.f32 %v1878_v8 }
 0x2b6   : > { %3487 = vmatmul.msk.bf16.gmra.mxu1 %vm1151_vm0, %v1417_v60 }
 0x2b7   : > { %v5349_v24 = vpop.eup %3948 }
 0x2bf   : > { %3479 = vmatmul.msk.bf16.gmra.mxu0 %vm1151_vm0, %v1272_v61  ;;  %v1689_v61 = vpop.xlane.xlu1 %1688 }
 0x2c0   : > { %v1814_v35 = vsub.f32 %v6246_v44, %v1689_v61  ;;  %v5403_v44 = vld [vmem:[#allocation8 + $0x60] sm:$0xff]  }
 0x2c2   : > { %v1644_v42 = vpop.f32.mrf.mxu2 }
 0x2c3   : > { %v1499_v48 = vpop.f32.mrf.mxu1  ;;  %v5317_v36 = vadd.f32 %v3673_v39, %v1644_v42  ;;  %v1816_v42 = vsub.f32 %v5166_v37, %v1693_v57  ;;  %v3646_v37 = vunpack.c.h.bf16 %v5321_v56  ;;  %v3685_v56 = vunpack.c.l.bf16 %v5372_v59 }
 0x2c4   : > { %v5314_v0 = vadd.f32 %v3641_v18, %v1499_v48  ;;  %v3728_v48 = vld [vmem:[#allocation8 + $0xd0] sm:$0xff]  }
 0x2c5   : > { %v3682_v39 = vunpack.c.h.bf16 %v3728_v48 }
 0x2c6   : > { %1748 = vmax.xlane.f32.xlu1 %v5314_v0 }
 0x2ca   : > { %v1646_v55 = vpop.f32.mrf.mxu2 }
 0x2cb   : > { %v1501_v25 = vpop.f32.mrf.mxu1  ;;  %v5340_v23 = vadd.f32 %v3674_v46, %v1646_v55  ;;  %v1884_v55 = vmul.f32 1.442695, %v1816_v42  ;;  %v3712_v46 = vld [vmem:[#allocation8 + $0x50] sm:$0xff]  }
 0x2cc   : > { %v1354_v21 = vpop.f32.mrf.mxu0  ;;  %v5328_v11 = vadd.f32 %v3642_v52, %v1501_v25  ;;  %v3617_v50 = vunpack.c.l.bf16 %v3712_v46 }
 0x2cd   : > { %v5319_v14 = vadd.f32 %v3609_v62, %v1354_v21  ;;  %v1880_v21 = vmul.f32 1.442695, %v1814_v35  ;;  %3954 = vpow2.f32 %v1884_v55  ;;  %v3650_v55 = vunpack.c.h.bf16 %v3720_v6 }
 0x2ce   : > { %1780 = vmax.xlane.f32.xlu1 %v5317_v36 }
 0x2cf   : > { %1716 = vmax.xlane.f32.xlu2 %v5319_v14  ;;  %3956 = vpow2.f32 %v1880_v21 }
 0x2d2   : > { %v1649_v45 = vpop.f32.mrf.mxu2 }
 0x2d3   : > { %v1504_v7 = vpop.f32.mrf.mxu1  ;;  %v5338_v26 = vadd.f32 %v3677_v58, %v1649_v45 }
 0x2d4   : > { %v1356_v5 = vpop.f32.mrf.mxu0  ;;  %v5326_v33 = vadd.f32 %v3645_v49, %v1504_v7 }
 0x2d5   : > { %v5330_v34 = vadd.f32 %v3610_v29, %v1356_v5  ;;  %v5362_v29 = vpop.eup %3950 }
 0x2d6   : > { %1752 = vmax.xlane.f32.xlu1 %v5326_v33  ;;  %v5364_v45 = vpop.eup %3952 }
 0x2d7   : > { %1750 = vmax.xlane.f32.xlu2 %v5328_v11  ;;  %1718 = vmax.xlane.f32.xlu0 %v5330_v34  ;;  %v5370_v41 = vpop.eup %3954 }
 0x2d8   : > { %v5376_v58 = vpop.eup %3956 }
 0x2da   : > { %v1651_v38 = vpop.f32.mrf.mxu2 }
 0x2db   : > { %v1506_v30 = vpop.f32.mrf.mxu1  ;;  %v5336_v9 = vadd.f32 %v3678_v15, %v1651_v38  ;;  %v3681_v38 = vunpack.c.l.bf16 %v3728_v48  ;;  %v3713_v48 = vld [vmem:[#allocation8 + $0x58] sm:$0xff]  }
 0x2dc   : > { %v1359_v19 = vpop.f32.mrf.mxu0  ;;  %v5374_v15 = vadd.f32 %v3646_v37, %v1506_v30 }
 0x2dd   : > { %v5351_v53 = vadd.f32 %v3613_v31, %v1359_v19  ;;  %v3649_v31 = vunpack.c.l.bf16 %v3720_v6 }
 0x2de   : > { %1786 = vmax.xlane.f32.xlu1 %v5336_v9 }
 0x2df   : > { %1782 = vmax.xlane.f32.xlu2 %v5340_v23  ;;  %1784 = vmax.xlane.f32.xlu0 %v5338_v26 }
 0x2e2   : > { %v1654_v17 = vpop.f32.mrf.mxu2 }
 0x2e3   : > { %v5347_v60 = vpop.f32.mrf.mxu1  ;;  %v5384_v30 = vadd.f32 %v3681_v38, %v1654_v17 }
 0x2e4   : > { %v1361_v40 = vpop.f32.mrf.mxu0  ;;  %v5398_v61 = vadd.f32 %v3649_v31, %v5347_v60  ;;  %v5426_v31 = vld [vmem:[#allocation8 + $0xa8] sm:$0xff]  }
 0x2e5   : > { %v5353_v18 = vadd.f32 %v3614_v10, %v1361_v40  ;;  %v3618_v10 = vunpack.c.h.bf16 %v3712_v46  ;;  %v1695_v40 = vpop.xlane.xlu1 %1694 }
 0x2e6   : > { %2010 = vadd.xlane.f32.xlu1 %v5349_v24  ;;  %v1817_v35 = vsub.f32 %v5177_v54, %v1695_v40  ;;  %v3653_v54 = vunpack.c.l.bf16 %v3721_v4  ;;  %v3622_v4 = vunpack.c.h.bf16 %v3713_v48  ;;  %v3661_v40 = vunpack.c.l.bf16 %v5426_v31 }
 0x2e7   : > { %1720 = vmax.xlane.f32.xlu2 %v5351_v53  ;;  %1722 = vmax.xlane.f32.xlu0 %v5353_v18 }
 0x2ea   : > { %v1656_v62 = vpop.f32.mrf.mxu2 }
 0x2eb   : > { %v1511_v25 = vpop.f32.mrf.mxu1  ;;  %v5360_v52 = vadd.f32 %v3682_v39, %v1656_v62  ;;  %v3621_v39 = vunpack.c.l.bf16 %v3713_v48  ;;  %v3625_v62 = vunpack.c.l.bf16 %v5403_v44  ;;  %v3715_v48 = vld [vmem:[#allocation8 + $0x68] sm:$0xff]  }
 0x2ec   : > { %v1364_v49 = vpop.f32.mrf.mxu0  ;;  %v5413_v46 = vadd.f32 %v3650_v55, %v1511_v25 }
 0x2ed   : > { %v5386_v2 = vadd.f32 %v3617_v50, %v1364_v49  ;;  %v1886_v49 = vmul.f32 1.442695, %v1817_v35 }
 0x2ee   : > { %1790 = vmax.xlane.f32.xlu1 %v5360_v52 }
 0x2ef   : > { %2006 = vadd.xlane.f32.xlu0 %v5364_v45  ;;  %2004 = vadd.xlane.f32.xlu2 %v5362_v29  ;;  %3958 = vpow2.f32 %v1886_v49  ;;  %v3722_v49 = vld [vmem:[#allocation8 + $0xa0] sm:$0xff]  }
 0x2f0   : > { %v3657_v20 = vunpack.c.l.bf16 %v3722_v49 }
 0x2f2   : > { %v1659_v7 = vpop.f32.mrf.mxu2 }
 0x2f3   : > { %v1514_v63 = vpop.f32.mrf.mxu1  ;;  %v5382_v19 = vadd.f32 %v3685_v56, %v1659_v7  ;;  %v3730_v56 = vld [vmem:[#allocation8 + $0xe0] sm:$0xff]  }
 0x2f4   : > { %v1366_v5 = vpop.f32.mrf.mxu0  ;;  %v3690_v38 = vunpack.c.h.bf16 %v3730_v56 }
 0x2f5   : > { %v5400_v42 = vadd.f32 %v3618_v10, %v1366_v5  ;;  %v3686_v10 = vunpack.c.h.bf16 %v5372_v59 }
 0x2f6   : > { %2012 = vadd.xlane.f32.xlu1 %v5370_v41 }
 0x2f7   : > { %2008 = vadd.xlane.f32.xlu0 %v5376_v58  ;;  %1754 = vmax.xlane.f32.xlu2 %v5374_v15 }
 0x2fa   : > { %v1661_v12 = vpop.f32.mrf.mxu2 }
 0x2fb   : > { %v1516_v51 = vpop.f32.mrf.mxu1 }
 0x2fc   : > { %v1369_v47 = vpop.f32.mrf.mxu0  ;;  %v5395_v17 = vadd.f32 %v3654_v3, %v1516_v51  ;;  %v5422_v3 = vpop.eup %3958 }
 0x2fd   : > { %v5409_v7 = vadd.f32 %v3621_v39, %v1369_v47  ;;  %v5420_v47 = vadd.f32 %v3653_v54, %v1514_v63  ;;  %v1697_v39 = vpop.xlane.xlu2 %1696  ;;  %v5445_v54 = vpop.xlane.xlu1 %1702 }
 0x2fe   : > { %1792 = vmax.xlane.f32.xlu1 %v5382_v19  ;;  %6247 = vst [vmem:[#allocation58_spill] sm:$0xff] %v5445_v54  ;;  %v1818_v59 = vsub.f32 %v5198_v27, %v1697_v39  ;;  %v5461_v27 = vld [vmem:[#allocation8 + $0x70] sm:$0xff]  }
 0x2ff   : > { %1788 = vmax.xlane.f32.xlu0 %v5384_v30  ;;  %1724 = vmax.xlane.f32.xlu2 %v5386_v2 }
 0x302   : > { %v5391_v22 = vpop.f32.mrf.mxu2 }
 0x303   : > { %v5393_v8 = vpop.f32.mrf.mxu1 }
 0x304   : > { %v1371_v57 = vpop.f32.mrf.mxu0 }
 0x305   : > { %v5439_v55 = vadd.f32 %v3622_v4, %v1371_v57  ;;  %v3630_v57 = vunpack.c.h.bf16 %v3715_v48  ;;  %v1888_v4 = vmul.f32 1.442695, %v1818_v59 }
 0x306   : > { %1762 = vmax.xlane.f32.xlu1 %v5395_v17 }
 0x307   : > { %1726 = vmax.xlane.f32.xlu0 %v5400_v42  ;;  %1756 = vmax.xlane.f32.xlu2 %v5398_v61  ;;  %3960 = vpow2.f32 %v1888_v4  ;;  %v3732_v4 = vld [vmem:[#allocation8 + $0xf0] sm:$0xff]  }
 0x30a   : > { %v1666_v21 = vpop.f32.mrf.mxu2 }
 0x30b   : > { %v1521_v60 = vpop.f32.mrf.mxu1  ;;  %v5424_v25 = vadd.f32 %v3690_v38, %v1666_v21  ;;  %v5441_v21 = vadd.f32 %v3686_v10, %v1661_v12  ;;  %v3689_v38 = vunpack.c.l.bf16 %v3730_v56  ;;  %v1699_v10 = vpop.xlane.xlu0 %1698 }
 0x30c   : > { %v1374_v37 = vpop.f32.mrf.mxu0  ;;  %v1819_v56 = vsub.f32 %v5219_v32, %v1699_v10  ;;  %v5486_v10 = vpop.xlane.xlu2 %1706 }
 0x30d   : > { %v5411_v5 = vadd.f32 %v3625_v62, %v1374_v37  ;;  %v5476_v28 = vpop.eup %3960  ;;  %6252 = vst [vmem:[#allocation22_spill] sm:$0xff] %v5486_v10 }
 0x30e   : > { %v1890_v59 = vmul.f32 1.442695, %v1819_v56  ;;  %v3698_v56 = vunpack.c.h.bf16 %v3732_v4 }
 0x30f   : > { %1758 = vmax.xlane.f32.xlu0 %v5413_v46  ;;  %1728 = vmax.xlane.f32.xlu2 %v5409_v7 }
 0x310   : > { %1732 = vmax.xlane.f32.xlu1 %v5411_v5  ;;  %3962 = vpow2.f32 %v1890_v59  ;;  %v3629_v59 = vunpack.c.l.bf16 %v3715_v48 }
 0x312   : > { %v5418_v50 = vpop.f32.mrf.mxu2 }
 0x313   : > { %v1524_v51 = vpop.f32.mrf.mxu1 }
 0x314   : > { %v1376_v6 = vpop.f32.mrf.mxu0  ;;  %v5443_v37 = vadd.f32 %v3661_v40, %v1524_v51  ;;  %v5452_v51 = vadd.f32 %v3689_v38, %v5391_v22  ;;  %v5455_v40 = vadd.f32 %v3657_v20, %v5393_v8  ;;  %v5469_v22 = vpop.xlane.xlu1 %1704  ;;  %v3658_v20 = vunpack.c.h.bf16 %v3722_v49 }
 0x315   : > { %6249 = vst [vmem:[#allocation26_spill] sm:$0xff] %v5469_v22  ;;  %v3633_v8 = vunpack.c.l.bf16 %v5461_v27  ;;  %v3626_v49 = vunpack.c.h.bf16 %v5403_v44 }
 0x317   : > { %1760 = vmax.xlane.f32.xlu0 %v5420_v47  ;;  %2014 = vadd.xlane.f32.xlu2 %v5422_v3 }
 0x318   : > { %1798 = vmax.xlane.f32.xlu1 %v5424_v25 }
 0x31a   : > { %v5437_v62 = vpop.f32.mrf.mxu2 }
 0x31b   : > { %v5433_v35 = vpop.f32.mrf.mxu1 }
 0x31c   : > { %v5435_v63 = vpop.f32.mrf.mxu0  ;;  %v5483_v32 = vpop.xlane.xlu1 %1708 }
 0x31d   : > { %6251 = vst [vmem:[#allocation25_spill] sm:$0xff] %v5483_v32 }
 0x31f   : > { %1730 = vmax.xlane.f32.xlu0 %v5439_v55  ;;  %1794 = vmax.xlane.f32.xlu2 %v5441_v21 }
 0x320   : > { %1768 = vmax.xlane.f32.xlu1 %v5443_v37 }
 0x322   : > { %v5463_v39 = vpop.f32.mrf.mxu2 }
 0x323   : > { %v5459_v13 = vpop.f32.mrf.mxu1 }
 0x324   : > { %v1381_v12 = vpop.f32.mrf.mxu0 }
 0x325   : > { %v5457_v43 = vadd.f32 %v3630_v57, %v1381_v12  ;;  %v5472_v57 = vadd.f32 %v3658_v20, %v1521_v60  ;;  %v5488_v20 = vadd.f32 %v3626_v49, %v1376_v6  ;;  %v3701_v6 = vunpack.c.l.bf16 %v5494_v1 }
 0x327   : > { %6248 = vst [vmem:[#allocation24_spill] sm:$0xff] %v5457_v43  ;;  %1796 = vmax.xlane.f32.xlu0 %v5452_v51  ;;  %1764 = vmax.xlane.f32.xlu2 %v5455_v40 }
 0x328   : > { %1738 = vmax.xlane.f32.xlu1 %v5457_v43 }
 0x32a   : > { %v1676_v60 = vpop.f32.mrf.mxu2 }
 0x32b   : > { %v5478_v16 = vpop.f32.mrf.mxu1  ;;  %v5492_v22 = vadd.f32 %v3698_v56, %v1676_v60  ;;  %v5506_v56 = vadd.f32 %v3629_v59, %v5435_v63 }
 0x32c   : > { %v1384_v38 = vpop.f32.mrf.mxu0 }
 0x32d   : > { %v5474_v12 = vadd.f32 %v3633_v8, %v1384_v38  ;;  %v5490_v8 = vpop.eup %3962  ;;  %v3731_v38 = vld [vmem:[#allocation8 + $0xe8] sm:$0xff]   ;;  %6254 = vst [vmem:[#allocation18_spill] sm:$0xff] %v5492_v22 }
 0x32e   : > { %6253 = vst [vmem:[#allocation23_spill] sm:$0xff] %v5490_v8  ;;  %v3693_v44 = vunpack.c.l.bf16 %v3731_v38  ;;  %v3694_v48 = vunpack.c.h.bf16 %v3731_v38  ;;  %v3724_v38 = vld [vmem:[#allocation8 + $0xb0] sm:$0xff]  }
 0x32f   : > { %6250 = vst [vmem:[#allocation21_spill] sm:$0xff] %v5474_v12  ;;  %1766 = vmax.xlane.f32.xlu0 %v5472_v57  ;;  %2016 = vadd.xlane.f32.xlu2 %v5476_v28 }
 0x330   : > { %1740 = vmax.xlane.f32.xlu1 %v5474_v12  ;;  %v5499_v12 = vpop.xlane.xlu2 %1710  ;;  %v5503_v60 = vadd.f32 %v3693_v44, %v5418_v50  ;;  %v5517_v50 = vpop.xlane.xlu0 %1700 }
 0x331   : > { %6255 = vst [vmem:[#allocation20_spill] sm:$0xff] %v5499_v12  ;;  %v3662_v12 = vunpack.c.h.bf16 %v5426_v31  ;;  %v3665_v31 = vunpack.c.l.bf16 %v3724_v38 }
 0x332   : > { %v1679_v49 = vpop.f32.mrf.mxu2  ;;  %6256 = vst [vmem:[#allocation16_spill] sm:$0xff] %v5503_v60 }
 0x333   : > { %v1534_v32 = vpop.f32.mrf.mxu1  ;;  %v5508_v54 = vadd.f32 %v3701_v6, %v1679_v49  ;;  %6258 = vst [vmem:[#allocation15_spill] sm:$0xff] %v5517_v50  ;;  %v5520_v6 = vadd.f32 %v3694_v48, %v5437_v62  ;;  %v5523_v49 = vadd.f32 %v3662_v12, %v5433_v35  ;;  %v3717_v50 = vld [vmem:[#allocation8 + $0x78] sm:$0xff]  }
 0x334   : > { %v1386_v12 = vpop.f32.mrf.mxu0 }
 0x335   : > { %6257 = vst [vmem:[#allocation19_spill] sm:$0xff] %v5508_v54 }
 0x336   : > { %6259 = vst [vmem:[#allocation17_spill] sm:$0xff] %v5520_v6 }
 0x337   : > { %1734 = vmax.xlane.f32.xlu2 %v5488_v20  ;;  %2018 = vadd.xlane.f32.xlu0 %v5490_v8  ;;  %6260 = vst [vmem:[#allocation34_spill] sm:$0xff] %v5523_v49 }
 0x338   : > { %1806 = vmax.xlane.f32.xlu1 %v5492_v22  ;;  %v3725_v22 = vld [vmem:[#allocation8 + $0xb8] sm:$0xff]  }
 0x339   : > { %v1749_v10 = vpop.xlane.xlu1 %1748  ;;  %v3670_v63 = vunpack.c.h.bf16 %v3725_v22 }
 0x33a   : > { %v1844_v43 = vsub.f32 %v5314_v0, %v1749_v10  ;;  %v3697_v0 = vunpack.c.l.bf16 %v3732_v4  ;;  %v3634_v4 = vunpack.c.h.bf16 %v5461_v27  ;;  %v3669_v27 = vunpack.c.l.bf16 %v3725_v22  ;;  %v1681_v22 = vpop.f32.mrf.mxu2 }
 0x33b   : > { %v1536_v59 = vpop.f32.mrf.mxu1 }
 0x33c   : > { %v5535_v35 = vadd.f32 %v3697_v0, %v5463_v39 }
 0x33e   : > { %6262 = vst [vmem:[#allocation29_spill] sm:$0xff] %v5535_v35 }
 0x33f   : > { %1800 = vmax.xlane.f32.xlu2 %v5503_v60  ;;  %1736 = vmax.xlane.f32.xlu0 %v5506_v56  ;;  %v5525_v60 = vadd.f32 %v3670_v63, %v1536_v59 }
 0x340   : > { %1808 = vmax.xlane.f32.xlu1 %v5508_v54  ;;  %v1940_v54 = vmul.f32 1.442695, %v1844_v43  ;;  %v5538_v43 = vadd.f32 %v3665_v31, %v5459_v13  ;;  %v5554_v31 = vadd.f32 %v3634_v4, %v1386_v12 }
 0x341   : > { %v5515_v8 = vpop.xlane.xlu1 %1780  ;;  %6261 = vst [vmem:[#allocation31_spill] sm:$0xff] %v5525_v60 }
 0x342   : > { %v1717_v44 = vpop.xlane.xlu2 %1716  ;;  %3964 = vpow2.f32 %v1940_v54  ;;  %6263 = vst [vmem:[#allocation39_spill] sm:$0xff] %v5538_v43  ;;  %v3666_v54 = vunpack.c.h.bf16 %v3724_v38  ;;  %v3637_v38 = vunpack.c.l.bf16 %v3717_v50 }
 0x344   : > { %v5552_v0 = vadd.f32 %v3666_v54, %v5478_v16 }
 0x347   : > { %1770 = vmax.xlane.f32.xlu2 %v5523_v49  ;;  %1802 = vmax.xlane.f32.xlu0 %v5520_v6 }
 0x348   : > { %1778 = vmax.xlane.f32.xlu1 %v5525_v60  ;;  %v5540_v63 = vpop.eup %3964 }
 0x349   : > { %v5530_v10 = vpop.xlane.xlu1 %1752  ;;  %6264 = vst [vmem:[#allocation27_spill] sm:$0xff] %v5540_v63 }
 0x34a   : > { %v1751_v62 = vpop.xlane.xlu2 %1750  ;;  %v5532_v48 = vpop.xlane.xlu0 %1718 }
 0x34f   : > { %1772 = vmax.xlane.f32.xlu2 %v5538_v43  ;;  %1804 = vmax.xlane.f32.xlu0 %v5535_v35  ;;  %v1389_v35 = vpop.f32.mrf.mxu0 }
 0x350   : > { %2068 = vadd.xlane.f32.xlu1 %v5540_v63  ;;  %v5565_v12 = vadd.f32 %v3637_v38, %v1389_v35 }
 0x351   : > { %v5546_v59 = vpop.xlane.xlu1 %1786 }
 0x352   : > { %v1783_v60 = vpop.xlane.xlu2 %1782  ;;  %v5548_v39 = vpop.xlane.xlu0 %1784 }
 0x353   : > { %v1861_v13 = vsub.f32 %v5340_v23, %v1783_v60  ;;  %v5563_v60 = vadd.f32 %v3669_v27, %v1534_v32  ;;  %v3638_v32 = vunpack.c.h.bf16 %v3717_v50 }
 0x355   : > { %v1974_v43 = vmul.f32 1.442695, %v1861_v13 }
 0x357   : > { %3966 = vpow2.f32 %v1974_v43  ;;  %1742 = vmax.xlane.f32.xlu2 %v5554_v31  ;;  %1774 = vmax.xlane.f32.xlu0 %v5552_v0  ;;  %v1860_v43 = vsub.f32 %v5317_v36, %v5515_v8  ;;  %v1391_v4 = vpop.f32.mrf.mxu0 }
 0x359   : > { %v2011_v63 = vpop.xlane.xlu1 %2010  ;;  %v1972_v38 = vmul.f32 1.442695, %v1860_v43 }
 0x35a   : > { %v1721_v49 = vpop.xlane.xlu2 %1720  ;;  %v5558_v6 = vpop.xlane.xlu0 %1722 }
 0x35b   : > { %v1830_v23 = vsub.f32 %v5351_v53, %v1721_v49  ;;  %v1828_v53 = vsub.f32 %v5319_v14, %v1717_v44  ;;  %v3702_v49 = vunpack.c.h.bf16 %v5494_v1  ;;  %v1845_v14 = vsub.f32 %v5328_v11, %v1751_v62 }
 0x35c   : > { %v1829_v1 = vsub.f32 %v5330_v34, %v5532_v48 }
 0x35d   : > { %v5561_v16 = vpop.eup %3966  ;;  %v1912_v54 = vmul.f32 1.442695, %v1830_v23  ;;  %v1908_v23 = vmul.f32 1.442695, %v1828_v53  ;;  %v5578_v8 = vadd.f32 %v3702_v49, %v1681_v22  ;;  %v1942_v44 = vmul.f32 1.442695, %v1845_v14 }
 0x35e   : > { %2102 = vadd.xlane.f32.xlu1 %v5561_v16  ;;  %v1846_v14 = vsub.f32 %v5326_v33, %v5530_v10 }
 0x35f   : > { %3968 = vpow2.f32 %v1912_v54  ;;  %1744 = vmax.xlane.f32.xlu2 %v5565_v12  ;;  %1776 = vmax.xlane.f32.xlu0 %v5563_v60  ;;  %v5580_v54 = vadd.f32 %v3638_v32, %v1391_v4  ;;  %v1910_v4 = vmul.f32 1.442695, %v1829_v1 }
 0x361   : > { %v5574_v35 = vpop.xlane.xlu1 %1790 }
 0x362   : > { %v2005_v13 = vpop.xlane.xlu2 %2004  ;;  %v2007_v27 = vpop.xlane.xlu0 %2006 }
 0x363   : > { %3970 = vrcp.f32 %v2005_v13 }
 0x364   : > { %3972 = vrcp.f32 %v2007_v27 }
 0x365   : > { %v5576_v36 = vpop.eup %3968  ;;  %3974 = vpow2.f32 %v1972_v38 }
 0x366   : > { %2040 = vadd.xlane.f32.xlu1 %v5576_v36  ;;  %3976 = vpow2.f32 %v1908_v23 }
 0x367   : > { %1810 = vmax.xlane.f32.xlu2 %v5578_v8  ;;  %1746 = vmax.xlane.f32.xlu0 %v5580_v54 }
 0x369   : > { %v3971_v50 = vpop.eup %3970  ;;  %v5588_v43 = vpop.xlane.xlu1 %2012 }
 0x36a   : > { %v3973_v22 = vpop.eup %3972  ;;  %v1755_v53 = vpop.xlane.xlu2 %1754  ;;  %v2196_v11 = vmul.f32 %v3971_v50, %v5362_v29 }
 0x36b   : > { %v2009_v49 = vpop.xlane.xlu0 %2008  ;;  %v1847_v62 = vsub.f32 %v5374_v15, %v1755_v53  ;;  %v2197_v32 = vmul.f32 %v3973_v22, %v5364_v45  ;;  %v5593_v27 = vpop.eup %3974  ;;  %v1862_v45 = vsub.f32 %v5338_v26, %v5548_v39  ;;  %v1944_v53 = vmul.f32 1.442695, %v1846_v14 }
 0x36c   : > { %3978 = vrcp.f32 %v2009_v49  ;;  %v2260_v13 = vpack.c.bf16 %v2196_v11, %v2196_v11  ;;  %v5595_v38 = vpop.eup %3976  ;;  %v1863_v26 = vsub.f32 %v5336_v9, %v5546_v59 }
 0x36d   : > { %3980 = vpow2.f32 %v1942_v44  ;;  %v1946_v34 = vmul.f32 1.442695, %v1847_v62  ;;  %v2261_v48 = vpack.c.bf16 %v2197_v32, %v2197_v32  ;;  %v1976_v10 = vmul.f32 1.442695, %v1862_v45 }
 0x36e   : > { %3982 = vrcp.f32 %v2011_v63  ;;  %v2340_v23 = vunpack.c.l.b16 %v2260_v13  ;;  %v1831_v32 = vsub.f32 %v5353_v18, %v5558_v6  ;;  %v1978_v13 = vmul.f32 1.442695, %v1863_v26 }
 0x36f   : > { %3984 = vpow2.f32 %v1946_v34  ;;  %2036 = vadd.xlane.f32.xlu2 %v5595_v38  ;;  %2100 = vadd.xlane.f32.xlu0 %v5593_v27  ;;  %v2341_v29 = vunpack.c.l.b16 %v2261_v48 }
 0x370   : > { %3986 = vpow2.f32 %v1910_v4 }
 0x371   : > { %v5603_v15 = vpop.xlane.xlu1 %1792  ;;  %v2356_v1 = vpack.c.b16 %v2341_v29, %v2340_v23  ;;  %3988 = vpow2.f32 %v1944_v53  ;;  %v1914_v23 = vmul.f32 1.442695, %v1831_v32 }
 0x372   : > { %v3979_v50 = vpop.eup %3978  ;;  %v1725_v44 = vpop.xlane.xlu2 %1724  ;;  %3990 = vpow2.f32 %v1976_v10 }
 0x373   : > { %v1789_v63 = vpop.xlane.xlu0 %1788  ;;  %v5605_v22 = vpop.eup %3980  ;;  %2412 = vmatmul.bf16.vlgmr.msrb.gmra.mxu3 %v2356_v1  ;;  %v2198_v11 = vmul.f32 %v3979_v50, %v5376_v58  ;;  %3992 = vpow2.f32 %v1978_v13 }
 0x374   : > { %v3983_v33 = vpop.eup %3982 }
 0x375   : > { %v5607_v49 = vpop.eup %3984  ;;  %v2199_v39 = vmul.f32 %v3983_v33, %v5349_v24  ;;  %v2262_v58 = vpack.c.bf16 %v2198_v11, %v2198_v11  ;;  %v1864_v24 = vsub.f32 %v5384_v30, %v1789_v63 }
 0x376   : > { %v5610_v62 = vpop.eup %3986  ;;  %2074 = vadd.xlane.f32.xlu1 %v5607_v49 }
 0x377   : > { %2070 = vadd.xlane.f32.xlu2 %v5605_v22  ;;  %2038 = vadd.xlane.f32.xlu0 %v5610_v62  ;;  %v2263_v59 = vpack.c.bf16 %v2199_v39, %v2199_v39  ;;  %v5623_v14 = vpop.eup %3988  ;;  %v2342_v45 = vunpack.c.l.b16 %v2262_v58  ;;  %v1980_v33 = vmul.f32 1.442695, %v1864_v24 }
 0x378   : > { %v5625_v1 = vpop.eup %3990 }
 0x379   : > { %v5620_v4 = vpop.xlane.xlu1 %1762  ;;  %v2343_v18 = vunpack.c.l.b16 %v2263_v59  ;;  %v5634_v26 = vpop.eup %3992 }
 0x37a   : > { %v1757_v34 = vpop.xlane.xlu2 %1756 }
 0x37b   : > { %v1727_v48 = vpop.xlane.xlu0 %1726  ;;  %v1848_v9 = vsub.f32 %v5398_v61, %v1757_v34  ;;  %v1832_v61 = vsub.f32 %v5386_v2, %v1725_v44  ;;  %v2357_v6 = vpack.c.b16 %v2343_v18, %v2342_v45  ;;  %v5642_v2 = vpop.f32.mrf.mxu3  ;;  %v1851_v45 = vsub.f32 %v5395_v17, %v5620_v4 }
 0x37c   : > { %v1833_v44 = vsub.f32 %v5400_v42, %v1727_v48 }
 0x37d   : > { %v1948_v29 = vmul.f32 1.442695, %v1848_v9  ;;  %v1916_v30 = vmul.f32 1.442695, %v1832_v61 }
 0x37e   : > { %v1918_v34 = vmul.f32 1.442695, %v1833_v44 }
 0x37f   : > { %3994 = vpow2.f32 %v1948_v29  ;;  %2072 = vadd.xlane.f32.xlu0 %v5623_v14  ;;  %2104 = vadd.xlane.f32.xlu2 %v5625_v1 }
 0x380   : > { %3996 = vpow2.f32 %v1914_v23 }
 0x381   : > { %3998 = vrcp.f32 %v5588_v43 }
 0x382   : > { %v1729_v50 = vpop.xlane.xlu2 %1728  ;;  %4000 = vpow2.f32 %v1980_v33 }
 0x383   : > { %v1759_v53 = vpop.xlane.xlu0 %1758  ;;  %v5631_v10 = vpop.xlane.xlu1 %1732  ;;  %2417 = vmatmul.bf16.gmra.mxu3 %v2357_v6  ;;  %4002 = vpow2.f32 %v1916_v30 }
 0x384   : > { %v1849_v11 = vsub.f32 %v5413_v46, %v1759_v53  ;;  %v1865_v46 = vsub.f32 %v5360_v52, %v5574_v35  ;;  %v1834_v52 = vsub.f32 %v5409_v7, %v1729_v50  ;;  %v5661_v35 = vld [vmem:[#allocation8 + $0x38] sm:$0xff]   ;;  %v1246_v61 = vpop.f32.mrf.mxu3 }
 0x385   : > { %v5636_v63 = vpop.eup %3994  ;;  %v3606_v18 = vunpack.c.h.bf16 %v5661_v35 }
 0x386   : > { %v1950_v39 = vmul.f32 1.442695, %v1849_v11  ;;  %v5639_v32 = vpop.eup %3996  ;;  %2076 = vadd.xlane.f32.xlu1 %v5636_v63  ;;  %v1982_v59 = vmul.f32 1.442695, %v1865_v46  ;;  %v1920_v33 = vmul.f32 1.442695, %v1834_v52 }
 0x387   : > { %2106 = vadd.xlane.f32.xlu0 %v5634_v26  ;;  %2042 = vadd.xlane.f32.xlu2 %v5639_v32  ;;  %v3999_v13 = vpop.eup %3998  ;;  %v1954_v11 = vmul.f32 1.442695, %v1851_v45  ;;  %v5671_v17 = vadd.f32 %v3606_v18, %v1246_v61 }
 0x388   : > { %4004 = vpow2.f32 %v1950_v39  ;;  %v5649_v9 = vpop.eup %4000  ;;  %v2200_v48 = vmul.f32 %v3999_v13, %v5370_v41  ;;  %v1866_v13 = vsub.f32 %v5382_v19, %v5603_v15 }
 0x389   : > { %v5653_v42 = vpop.eup %4002 }
 0x38a   : > { %v2015_v43 = vpop.xlane.xlu2 %2014  ;;  %v2264_v50 = vpack.c.bf16 %v2200_v48, %v2200_v48  ;;  %v1984_v45 = vmul.f32 1.442695, %v1866_v13 }
 0x38b   : > { %v1761_v58 = vpop.xlane.xlu0 %1760  ;;  %4006 = vrcp.f32 %v2015_v43  ;;  %v5651_v23 = vpop.xlane.xlu1 %1798 }
 0x38c   : > { %4008 = vpow2.f32 %v1918_v34  ;;  %v1850_v41 = vsub.f32 %v5420_v47, %v1761_v58  ;;  %v2344_v44 = vunpack.c.l.b16 %v2264_v50 }
 0x38d   : > { %4010 = vpow2.f32 %v1982_v59 }
 0x38e   : > { %2108 = vadd.xlane.f32.xlu1 %v5649_v9  ;;  %v5657_v29 = vpop.eup %4004  ;;  %v1952_v4 = vmul.f32 1.442695, %v1850_v41  ;;  %4012 = vpow2.f32 %v1920_v33 }
 0x38f   : > { %2044 = vadd.xlane.f32.xlu0 %v5653_v42  ;;  %2078 = vadd.xlane.f32.xlu2 %v5657_v29  ;;  %4014 = vpow2.f32 %v1954_v11 }
 0x390   : > { %4016 = vpow2.f32 %v1952_v4 }
 0x391   : > { %v4007_v24 = vpop.eup %4006 }
 0x392   : > { %v1795_v6 = vpop.xlane.xlu2 %1794  ;;  %v2201_v7 = vmul.f32 %v4007_v24, %v5422_v3  ;;  %v5669_v39 = vpop.eup %4008 }
 0x393   : > { %v1731_v53 = vpop.xlane.xlu0 %1730  ;;  %v5674_v43 = vpop.eup %4010  ;;  %v1867_v3 = vsub.f32 %v5441_v21, %v1795_v6 }
 0x394   : > { %v2265_v30 = vpack.c.bf16 %v2201_v7, %v2201_v7  ;;  %v5676_v47 = vpop.xlane.xlu1 %1768  ;;  %v5683_v52 = vpop.eup %4012  ;;  %v1835_v19 = vsub.f32 %v5439_v55, %v1731_v53 }
 0x395   : > { %v1986_v48 = vmul.f32 1.442695, %v1867_v3  ;;  %v5685_v24 = vpop.eup %4014  ;;  %v1854_v13 = vsub.f32 %v5443_v37, %v5676_v47 }
 0x396   : > { %2046 = vadd.xlane.f32.xlu1 %v5669_v39  ;;  %v2345_v46 = vunpack.c.l.b16 %v2265_v30  ;;  %v5688_v18 = vpop.eup %4016  ;;  %v1922_v50 = vmul.f32 1.442695, %v1835_v19  ;;  %v6265_v19 = vld [vmem:[#allocation23_spill] sm:$0xff] }
 0x397   : > { %1714 = vmax.xlane.f32.xlu0 %v5671_v17  ;;  %2110 = vadd.xlane.f32.xlu2 %v5674_v43  ;;  %4018 = vpow2.f32 %v1986_v48  ;;  %v1836_v48 = vsub.f32 %v5411_v5, %v5631_v10 }
 0x398   : > { %v2358_v58 = vpack.c.b16 %v2345_v46, %v2344_v44  ;;  %4020 = vpow2.f32 %v1984_v45  ;;  %v3605_v45 = vunpack.c.l.bf16 %v5661_v35  ;;  %v6266_v35 = vld [vmem:[#allocation24_spill] sm:$0xff] }
 0x39a   : > { %v1765_v34 = vpop.xlane.xlu2 %1764  ;;  %2422 = vmatmul.bf16.gmra.mxu3 %v2358_v58 }
 0x39b   : > { %v1797_v59 = vpop.xlane.xlu0 %1796  ;;  %v1852_v21 = vsub.f32 %v5455_v40, %v1765_v34  ;;  %v1869_v40 = vsub.f32 %v5424_v25, %v5651_v23 }
 0x39c   : > { %v5694_v15 = vpop.xlane.xlu1 %1738  ;;  %v1868_v55 = vsub.f32 %v5452_v51, %v1797_v59 }
 0x39d   : > { %v1956_v7 = vmul.f32 1.442695, %v1852_v21  ;;  %v5697_v11 = vpop.eup %4018  ;;  %v1990_v44 = vmul.f32 1.442695, %v1869_v40  ;;  %v5732_v40 = vadd.f32 %v3605_v45, %v5642_v2  ;;  %v6269_v45 = vld [vmem:[#allocation45_spill] sm:$0xff] }
 0x39e   : > { %2048 = vadd.xlane.f32.xlu1 %v5683_v52  ;;  %v5699_v30 = vpop.eup %4020  ;;  %v1988_v3 = vmul.f32 1.442695, %v1868_v55  ;;  %v1839_v55 = vsub.f32 %v6266_v35, %v5694_v15 }
 0x39f   : > { %2082 = vadd.xlane.f32.xlu0 %v5685_v24  ;;  %2080 = vadd.xlane.f32.xlu2 %v5688_v18 }
 0x3a2   : > { %v2017_v61 = vpop.xlane.xlu2 %2016 }
 0x3a3   : > { %v1767_v41 = vpop.xlane.xlu0 %1766  ;;  %4022 = vrcp.f32 %v2017_v61 }
 0x3a4   : > { %v1853_v6 = vsub.f32 %v5472_v57, %v1767_v41  ;;  %v5706_v46 = vpop.xlane.xlu1 %1740 }
 0x3a6   : > { %v1958_v33 = vmul.f32 1.442695, %v1853_v6  ;;  %v1960_v6 = vmul.f32 1.442695, %v1854_v13 }
 0x3a7   : > { %2114 = vadd.xlane.f32.xlu0 %v5697_v11  ;;  %2112 = vadd.xlane.f32.xlu2 %v5699_v30 }
 0x3a8   : > { %4024 = vpow2.f32 %v1958_v33 }
 0x3a9   : > { %4026 = vpow2.f32 %v1956_v7  ;;  %v4023_v4 = vpop.eup %4022 }
 0x3aa   : > { %4028 = vpow2.f32 %v1922_v50  ;;  %v1735_v57 = vpop.xlane.xlu2 %1734  ;;  %v2202_v23 = vmul.f32 %v4023_v4, %v5476_v28  ;;  %v1924_v50 = vmul.f32 1.442695, %v1836_v48  ;;  %v6267_v4 = vld [vmem:[#allocation16_spill] sm:$0xff] }
 0x3ab   : > { %v2019_v53 = vpop.xlane.xlu0 %2018  ;;  %v1837_v34 = vsub.f32 %v5488_v20, %v1735_v57 }
 0x3ac   : > { %4030 = vrcp.f32 %v2019_v53  ;;  %v2266_v41 = vpack.c.bf16 %v2202_v23, %v2202_v23  ;;  %v5727_v20 = vpop.xlane.xlu1 %1806  ;;  %v1930_v23 = vmul.f32 1.442695, %v1839_v55 }
 0x3ad   : > { %4032 = vpow2.f32 %v1990_v44  ;;  %v1926_v37 = vmul.f32 1.442695, %v1837_v34 }
 0x3ae   : > { %v5708_v58 = vpop.eup %4024  ;;  %4034 = vpow2.f32 %v1988_v3  ;;  %v2346_v5 = vunpack.c.l.b16 %v2266_v41  ;;  %v6271_v41 = vld [vmem:[#allocation34_spill] sm:$0xff] }
 0x3af   : > { %v5710_v25 = vpop.eup %4026  ;;  %2086 = vadd.xlane.f32.xlu1 %v5708_v58  ;;  %4036 = vpow2.f32 %v1960_v6 }
 0x3b0   : > { %v5714_v51 = vpop.eup %4028  ;;  %2084 = vadd.xlane.f32.xlu0 %v5710_v25  ;;  %4038 = vpow2.f32 %v1926_v37 }
 0x3b1   : > { %2050 = vadd.xlane.f32.xlu2 %v5714_v51  ;;  %4040 = vpow2.f32 %v1924_v50 }
 0x3b2   : > { %v4031_v59 = vpop.eup %4030  ;;  %v1801_v28 = vpop.xlane.xlu2 %1800  ;;  %4042 = vpow2.f32 %v1930_v23 }
 0x3b3   : > { %v1737_v21 = vpop.xlane.xlu0 %1736  ;;  %v2203_v61 = vmul.f32 %v4031_v59, %v6265_v19  ;;  %v5725_v7 = vpop.eup %4032  ;;  %v1870_v2 = vsub.f32 %v6267_v4, %v1801_v28  ;;  %v6270_v28 = vld [vmem:[#allocation17_spill] sm:$0xff] }
 0x3b4   : > { %v5729_v33 = vpop.eup %4034  ;;  %v1838_v57 = vsub.f32 %v5506_v56, %v1737_v21  ;;  %v6268_v56 = vld [vmem:[#allocation58_spill] sm:$0xff]  ;;  %v1809_v19 = vpop.xlane.xlu1 %1808 }
 0x3b5   : > { %v2267_v47 = vpack.c.bf16 %v2203_v61, %v2203_v61  ;;  %v5741_v34 = vpop.eup %4036  ;;  %v1992_v59 = vmul.f32 1.442695, %v1870_v2  ;;  %v1821_v21 = vsub.f32 %v6269_v45, %v6268_v56  ;;  %v6273_v2 = vld [vmem:[#allocation15_spill] sm:$0xff] }
 0x3b6   : > { %v1928_v13 = vmul.f32 1.442695, %v1838_v57  ;;  %v5743_v15 = vpop.eup %4038 }
 0x3b7   : > { %2118 = vadd.xlane.f32.xlu1 %v5725_v7  ;;  %v2347_v10 = vunpack.c.l.b16 %v2267_v47  ;;  %v5746_v48 = vpop.eup %4040  ;;  %v1894_v50 = vmul.f32 1.442695, %v1821_v21 }
 0x3b8   : > { %2116 = vadd.xlane.f32.xlu0 %v5729_v33  ;;  %4044 = vpow2.f32 %v1928_v13  ;;  %v6275_v13 = vld [vmem:[#allocation39_spill] sm:$0xff] }
 0x3b9   : > { %1712 = vmax.xlane.f32.xlu2 %v5732_v40  ;;  %v2359_v53 = vpack.c.b16 %v2347_v10, %v2346_v5  ;;  %4046 = vpow2.f32 %v1992_v59  ;;  %v5754_v10 = vpop.eup %4042 }
 0x3ba   : > { %v1771_v44 = vpop.xlane.xlu2 %1770  ;;  %4048 = vpow2.f32 %v1894_v50  ;;  %v6278_v50 = vld [vmem:[#allocation18_spill] sm:$0xff] }
 0x3bb   : > { %2427 = vmatmul.bf16.gmra.mxu3 %v2359_v53  ;;  %v1803_v3 = vpop.xlane.xlu0 %1802  ;;  %v1855_v6 = vsub.f32 %v6271_v41, %v1771_v44  ;;  %v6272_v53 = vld [vmem:[#allocation21_spill] sm:$0xff]  ;;  %v6274_v44 = vld [vmem:[#allocation47_spill] sm:$0xff] }
 0x3bc   : > { %v1871_v61 = vsub.f32 %v6270_v28, %v1803_v3  ;;  %v1840_v4 = vsub.f32 %v6272_v53, %v5706_v46  ;;  %v1820_v3 = vsub.f32 %v6274_v44, %v6273_v2  ;;  %v5767_v23 = vpop.xlane.xlu1 %1778 }
 0x3bd   : > { %v1962_v35 = vmul.f32 1.442695, %v1855_v6 }
 0x3be   : > { %v1994_v5 = vmul.f32 1.442695, %v1871_v61  ;;  %v5756_v55 = vpop.eup %4044  ;;  %v1932_v21 = vmul.f32 1.442695, %v1840_v4  ;;  %v1892_v28 = vmul.f32 1.442695, %v1820_v3 }
 0x3bf   : > { %2088 = vadd.xlane.f32.xlu1 %v5741_v34  ;;  %v5759_v57 = vpop.eup %4046 }
 0x3c0   : > { %2054 = vadd.xlane.f32.xlu0 %v5743_v15  ;;  %4050 = vpow2.f32 %v1994_v5  ;;  %v5770_v61 = vpop.eup %4048  ;;  %v1873_v5 = vsub.f32 %v6278_v50, %v5727_v20  ;;  %v6283_v50 = vld [vmem:[#allocation35_spill] sm:$0xff] }
 0x3c1   : > { %2052 = vadd.xlane.f32.xlu2 %v5746_v48  ;;  %4052 = vpow2.f32 %v1962_v35  ;;  %6276 = vst [vmem:[#allocation30_spill] sm:$0xff] %v5770_v61 }
 0x3c2   : > { %v1773_v37 = vpop.xlane.xlu2 %1772  ;;  %4054 = vpow2.f32 %v1932_v21  ;;  %v1998_v44 = vmul.f32 1.442695, %v1873_v5 }
 0x3c3   : > { %v1805_v47 = vpop.xlane.xlu0 %1804  ;;  %v1856_v59 = vsub.f32 %v6275_v13, %v1773_v37  ;;  %4056 = vpow2.f32 %v1892_v28  ;;  %v6279_v37 = vld [vmem:[#allocation29_spill] sm:$0xff] }
 0x3c4   : > { %v1872_v35 = vsub.f32 %v6279_v37, %v1805_v47  ;;  %v2069_v3 = vpop.xlane.xlu1 %2068  ;;  %v6281_v47 = vld [vmem:[#allocation19_spill] sm:$0xff] }
 0x3c5   : > { %v1964_v46 = vmul.f32 1.442695, %v1856_v59 }
 0x3c6   : > { %v5772_v41 = vpop.eup %4050  ;;  %v1996_v13 = vmul.f32 1.442695, %v1872_v35 }
 0x3c7   : > { %2058 = vadd.xlane.f32.xlu1 %v5754_v10  ;;  %v5775_v6 = vpop.eup %4052  ;;  %4058 = vpow2.f32 %v1964_v46  ;;  %v1874_v46 = vsub.f32 %v6281_v47, %v1809_v19 }
 0x3c8   : > { %2056 = vadd.xlane.f32.xlu0 %v5756_v55  ;;  %6277 = vst [vmem:[#allocation42_spill] sm:$0xff] %v5775_v6  ;;  %v5785_v59 = vpop.eup %4054  ;;  %4060 = vpow2.f32 %v1998_v44 }
 0x3c9   : > { %2120 = vadd.xlane.f32.xlu2 %v5759_v57  ;;  %6280 = vst [vmem:[#allocation32_spill] sm:$0xff] %v5785_v59  ;;  %v5787_v20 = vpop.eup %4056  ;;  %4062 = vpow2.f32 %v1996_v13 }
 0x3ca   : > { %v1743_v56 = vpop.xlane.xlu2 %1742 }
 0x3cb   : > { %v1775_v45 = vpop.xlane.xlu0 %1774  ;;  %v1841_v53 = vsub.f32 %v5554_v31, %v1743_v56  ;;  %v6282_v56 = vld [vmem:[#allocation26_spill] sm:$0xff] }
 0x3cc   : > { %v1857_v31 = vsub.f32 %v5552_v0, %v1775_v45  ;;  %v1822_v5 = vsub.f32 %v6283_v50, %v6282_v56 }
 0x3cd   : > { %v1934_v21 = vmul.f32 1.442695, %v1841_v53  ;;  %v5790_v28 = vpop.eup %4058  ;;  %v2000_v53 = vmul.f32 1.442695, %v1874_v46 }
 0x3ce   : > { %v1896_v44 = vmul.f32 1.442695, %v1822_v5 }
 0x3cf   : > { %2022 = vadd.xlane.f32.xlu1 %v5770_v61  ;;  %4064 = vpow2.f32 %v1934_v21  ;;  %v1966_v61 = vmul.f32 1.442695, %v1857_v31 }
 0x3d0   : > { %2122 = vadd.xlane.f32.xlu0 %v5772_v41 }
 0x3d1   : > { %2090 = vadd.xlane.f32.xlu2 %v5775_v6  ;;  %v5798_v6 = vpop.eup %4060 }
 0x3d2   : > { %v1745_v4 = vpop.xlane.xlu2 %1744  ;;  %v5800_v19 = vpop.eup %4062 }
 0x3d3   : > { %v5783_v2 = vpop.xlane.xlu0 %1776  ;;  %v1842_v13 = vsub.f32 %v5565_v12, %v1745_v4  ;;  %v6286_v4 = vld [vmem:[#allocation22_spill] sm:$0xff] }
 0x3d5   : > { %v5803_v0 = vpop.eup %4064  ;;  %v1936_v56 = vmul.f32 1.442695, %v1842_v13 }
 0x3d7   : > { %2060 = vadd.xlane.f32.xlu1 %v5785_v59  ;;  %v2103_v59 = vpop.xlane.xlu1 %2102 }
 0x3d8   : > { %2020 = vadd.xlane.f32.xlu0 %v5787_v20  ;;  %4066 = vrcp.f32 %v2103_v59 }
 0x3d9   : > { %2092 = vadd.xlane.f32.xlu2 %v5790_v28  ;;  %4068 = vpow2.f32 %v2000_v53 }
 0x3da   : > { %v1811_v37 = vpop.xlane.xlu2 %1810  ;;  %4070 = vpow2.f32 %v1966_v61 }
 0x3db   : > { %v1747_v35 = vpop.xlane.xlu0 %1746  ;;  %4072 = vpow2.f32 %v1896_v44  ;;  %v1875_v21 = vsub.f32 %v5578_v8, %v1811_v37  ;;  %v1858_v8 = vsub.f32 %v5563_v60, %v5783_v2  ;;  %v6287_v37 = vld [vmem:[#allocation36_spill] sm:$0xff] }
 0x3dc   : > { %v1843_v45 = vsub.f32 %v5580_v54, %v1747_v35  ;;  %v1823_v35 = vsub.f32 %v6287_v37, %v6286_v4 }
 0x3dd   : > { %v2002_v54 = vmul.f32 1.442695, %v1875_v21  ;;  %v1968_v60 = vmul.f32 1.442695, %v1858_v8 }
 0x3de   : > { %v1938_v59 = vmul.f32 1.442695, %v1843_v45  ;;  %v4067_v31 = vpop.eup %4066 }
 0x3df   : > { %2126 = vadd.xlane.f32.xlu1 %v5798_v6  ;;  %v5810_v50 = vpop.eup %4068  ;;  %v2245_v61 = vmul.f32 %v4067_v31, %v5561_v16  ;;  %v2041_v44 = vpop.xlane.xlu1 %2040 }
 0x3e0   : > { %2124 = vadd.xlane.f32.xlu0 %v5800_v19  ;;  %6284 = vst [vmem:[#allocation37_spill] sm:$0xff] %v5810_v50  ;;  %v5812_v5 = vpop.eup %4070 }
 0x3e1   : > { %2062 = vadd.xlane.f32.xlu2 %v5803_v0  ;;  %v5815_v12 = vpop.eup %4072 }
 0x3e2   : > { %v2037_v47 = vpop.xlane.xlu2 %2036  ;;  %6285 = vst [vmem:[#allocation43_spill] sm:$0xff] %v5815_v12 }
 0x3e3   : > { %v2101_v46 = vpop.xlane.xlu0 %2100 }
 0x3e4   : > { %4074 = vrcp.f32 %v2101_v46 }
 0x3e5   : > { %4076 = vrcp.f32 %v2069_v3  ;;  %v6288_v3 = vld [vmem:[#allocation31_spill] sm:$0xff] }
 0x3e6   : > { %4078 = vrcp.f32 %v2037_v47  ;;  %v1859_v53 = vsub.f32 %v6288_v3, %v5767_v23  ;;  %v2309_v47 = vpack.c.bf16 %v2245_v61, %v2245_v61  ;;  %v6289_v23 = vld [vmem:[#allocation20_spill] sm:$0xff] }
 0x3e7   : > { %2128 = vadd.xlane.f32.xlu1 %v5810_v50  ;;  %4080 = vpow2.f32 %v1938_v59  ;;  %v1898_v59 = vmul.f32 1.442695, %v1823_v35 }
 0x3e8   : > { %2094 = vadd.xlane.f32.xlu0 %v5812_v5  ;;  %4082 = vpow2.f32 %v1936_v56  ;;  %v1970_v56 = vmul.f32 1.442695, %v1859_v53  ;;  %v6292_v53 = vld [vmem:[#allocation25_spill] sm:$0xff] }
 0x3e9   : > { %2024 = vadd.xlane.f32.xlu2 %v5815_v12  ;;  %4084 = vpow2.f32 %v2002_v54  ;;  %v6290_v54 = vld [vmem:[#allocation33_spill] sm:$0xff]  ;;  %v6291_v12 = vld [vmem:[#allocation27_spill] sm:$0xff] }
 0x3ea   : > { %v4075_v45 = vpop.eup %4074  ;;  %v2071_v13 = vpop.xlane.xlu2 %2070  ;;  %v1825_v3 = vsub.f32 %v6290_v54, %v6289_v23 }
 0x3eb   : > { %v2039_v16 = vpop.xlane.xlu0 %2038  ;;  %v4077_v21 = vpop.eup %4076  ;;  %v2244_v2 = vmul.f32 %v4075_v45, %v5593_v27  ;;  %4086 = vrcp.f32 %v2071_v13  ;;  %v2728_v27 = vunpack.c.l.b16 %v2309_v47  ;;  %v6293_v45 = vld [vmem:[#allocation59_spill] sm:$0xff] }
 0x3ec   : > { %v4079_v46 = vpop.eup %4078  ;;  %4088 = vrcp.f32 %v2039_v16  ;;  %v2228_v50 = vmul.f32 %v4077_v21, %v6291_v12  ;;  %v1824_v13 = vsub.f32 %v6293_v45, %v6292_v53  ;;  %v2075_v21 = vpop.xlane.xlu1 %2074 }
 0x3ed   : > { %v5827_v31 = vpop.eup %4080  ;;  %v2308_v4 = vpack.c.bf16 %v2244_v2, %v2244_v2  ;;  %4090 = vpow2.f32 %v1968_v60  ;;  %v2212_v8 = vmul.f32 %v4079_v46, %v5595_v38  ;;  %v1902_v38 = vmul.f32 1.442695, %v1825_v3 }
 0x3ee   : > { %v5829_v37 = vpop.eup %4082  ;;  %4092 = vpow2.f32 %v1898_v59  ;;  %v2292_v23 = vpack.c.bf16 %v2228_v50, %v2228_v50 }
 0x3ef   : > { %2066 = vadd.xlane.f32.xlu1 %v5827_v31  ;;  %v5835_v61 = vpop.eup %4084  ;;  %v2727_v35 = vunpack.c.l.b16 %v2308_v4  ;;  %4094 = vpow2.f32 %v1970_v56  ;;  %v2276_v46 = vpack.c.bf16 %v2212_v8, %v2212_v8  ;;  %v1900_v4 = vmul.f32 1.442695, %v1824_v13 }
 0x3f0   : > { %2064 = vadd.xlane.f32.xlu0 %v5829_v37  ;;  %4096 = vrcp.f32 %v2041_v44  ;;  %v2598_v50 = vunpack.c.l.b16 %v2292_v23 }
 0x3f1   : > { %2130 = vadd.xlane.f32.xlu2 %v5835_v61  ;;  %v4087_v16 = vpop.eup %4086  ;;  %v2743_v12 = vpack.c.b16 %v2728_v27, %v2727_v35  ;;  %v2469_v44 = vunpack.c.l.b16 %v2276_v46 }
 0x3f2   : > { %v4089_v2 = vpop.eup %4088  ;;  %v2229_v47 = vmul.f32 %v4087_v16, %v5605_v22  ;;  %v2105_v60 = vpop.xlane.xlu2 %2104 }
 0x3f3   : > { %v2073_v54 = vpop.xlane.xlu0 %2072  ;;  %v2213_v59 = vmul.f32 %v4089_v2, %v5610_v62  ;;  %2799 = vmatmul.bf16.vlgmr.msra.gmra.mxu2 %v2743_v12  ;;  %v5844_v45 = vpop.eup %4090 }
 0x3f4   : > { %v2293_v53 = vpack.c.bf16 %v2229_v47, %v2229_v47  ;;  %4098 = vrcp.f32 %v2073_v54  ;;  %v5846_v27 = vpop.eup %4092 }
 0x3f5   : > { %4100 = vrcp.f32 %v2075_v21  ;;  %v2277_v56 = vpack.c.bf16 %v2213_v59, %v2213_v59  ;;  %v5849_v22 = vpop.eup %4094 }
 0x3f6   : > { %v2599_v35 = vunpack.c.l.b16 %v2293_v53  ;;  %4102 = vrcp.f32 %v2105_v60  ;;  %v4097_v8 = vpop.eup %4096 }
 0x3f7   : > { %2096 = vadd.xlane.f32.xlu1 %v5844_v45  ;;  %4104 = vpow2.f32 %v1902_v38  ;;  %v2470_v62 = vunpack.c.l.b16 %v2277_v56  ;;  %v2214_v46 = vmul.f32 %v4097_v8, %v5576_v36 }
 0x3f8   : > { %2026 = vadd.xlane.f32.xlu0 %v5846_v27  ;;  %4106 = vpow2.f32 %v1900_v4  ;;  %v2614_v3 = vpack.c.b16 %v2599_v35, %v2598_v50 }
 0x3f9   : > { %2098 = vadd.xlane.f32.xlu2 %v5849_v22  ;;  %v2485_v13 = vpack.c.b16 %v2470_v62, %v2469_v44  ;;  %v2077_v16 = vpop.xlane.xlu1 %2076  ;;  %v2278_v62 = vpack.c.bf16 %v2214_v46, %v2214_v46 }
 0x3fa   : > { %v4099_v12 = vpop.eup %4098  ;;  %2670 = vmatmul.bf16.vlgmr.msra.gmra.mxu1 %v2614_v3  ;;  %v2043_v21 = vpop.xlane.xlu2 %2042 }
 0x3fb   : > { %v2107_v2 = vpop.xlane.xlu0 %2106  ;;  %v4101_v23 = vpop.eup %4100  ;;  %4108 = vrcp.f32 %v2043_v21  ;;  %2541 = vmatmul.bf16.vlgmr.msra.gmra.mxu0 %v2485_v13  ;;  %v2230_v60 = vmul.f32 %v4099_v12, %v5623_v14 }
 0x3fc   : > { %v4103_v47 = vpop.eup %4102  ;;  %4110 = vrcp.f32 %v2107_v2  ;;  %v2231_v59 = vmul.f32 %v4101_v23, %v5607_v49 }
 0x3fd   : > { %v5854_v54 = vpop.eup %4104  ;;  %v2246_v4 = vmul.f32 %v4103_v47, %v5625_v1  ;;  %v2294_v53 = vpack.c.bf16 %v2230_v60, %v2230_v60  ;;  %v2471_v1 = vunpack.c.l.b16 %v2278_v62 }
 0x3fe   : > { %6294 = vst [vmem:[#allocation28_spill] sm:$0xff] %v5854_v54  ;;  %v5856_v38 = vpop.eup %4106  ;;  %v2295_v3 = vpack.c.bf16 %v2231_v59, %v2231_v59 }
 0x3ff   : > { %2030 = vadd.xlane.f32.xlu1 %v5854_v54  ;;  %v2310_v36 = vpack.c.bf16 %v2246_v4, %v2246_v4  ;;  %v2600_v8 = vunpack.c.l.b16 %v2294_v53 }
 0x400   : > { %2028 = vadd.xlane.f32.xlu0 %v5856_v38  ;;  %v2601_v23 = vunpack.c.l.b16 %v2295_v3 }
 0x401   : > { %v4109_v56 = vpop.eup %4108  ;;  %v2109_v50 = vpop.xlane.xlu1 %2108  ;;  %v2729_v47 = vunpack.c.l.b16 %v2310_v36 }
 0x402   : > { %v4111_v35 = vpop.eup %4110  ;;  %v2215_v14 = vmul.f32 %v4109_v56, %v5639_v32  ;;  %v2079_v13 = vpop.xlane.xlu2 %2078  ;;  %v2615_v32 = vpack.c.b16 %v2601_v23, %v2600_v8 }
 0x403   : > { %v2045_v44 = vpop.xlane.xlu0 %2044  ;;  %v2247_v12 = vmul.f32 %v4111_v35, %v5634_v26 }
 0x404   : > { %4112 = vrcp.f32 %v2045_v44  ;;  %v2279_v49 = vpack.c.bf16 %v2215_v14, %v2215_v14 }
 0x405   : > { %4114 = vrcp.f32 %v2079_v13  ;;  %v2311_v21 = vpack.c.bf16 %v2247_v12, %v2247_v12 }
 0x406   : > { %4116 = vrcp.f32 %v2077_v16  ;;  %v2472_v2 = vunpack.c.l.b16 %v2279_v49 }
 0x407   : > { %4118 = vrcp.f32 %v2109_v50  ;;  %v2730_v60 = vunpack.c.l.b16 %v2311_v21 }
 0x408   : > { %v2486_v54 = vpack.c.b16 %v2472_v2, %v2471_v1 }
 0x409   : > { %v2047_v59 = vpop.xlane.xlu1 %2046  ;;  %v2744_v56 = vpack.c.b16 %v2730_v60, %v2729_v47 }
 0x40a   : > { %v4113_v46 = vpop.eup %4112  ;;  %4120 = vrcp.f32 %v2047_v59  ;;  %2675 = vmatmul.bf16.gmra.mxu1 %v2615_v32  ;;  %v2111_v35 = vpop.xlane.xlu2 %2110 }
 0x40b   : > { %v4115_v44 = vpop.eup %4114  ;;  %v1715_v26 = vpop.xlane.xlu0 %1714  ;;  %2546 = vmatmul.bf16.gmra.mxu0 %v2486_v54  ;;  %2804 = vmatmul.bf16.gmra.mxu2 %v2744_v56  ;;  %4122 = vrcp.f32 %v2111_v35  ;;  %v2216_v62 = vmul.f32 %v4113_v46, %v5653_v42 }
 0x40c   : > { %v4117_v4 = vpop.eup %4116  ;;  %v1827_v16 = vsub.f32 %v5671_v17, %v1715_v26  ;;  %v2233_v50 = vmul.f32 %v4115_v44, %v5657_v29 }
 0x40d   : > { %v4119_v53 = vpop.eup %4118  ;;  %v2232_v3 = vmul.f32 %v4117_v4, %v5636_v63  ;;  %v2280_v54 = vpack.c.bf16 %v2216_v62, %v2216_v62 }
 0x40e   : > { %v1906_v14 = vmul.f32 1.442695, %v1827_v16  ;;  %v2248_v13 = vmul.f32 %v4119_v53, %v5649_v9  ;;  %v2297_v36 = vpack.c.bf16 %v2233_v50, %v2233_v50 }
 0x40f   : > { %v2296_v17 = vpack.c.bf16 %v2232_v3, %v2232_v3  ;;  %v2473_v47 = vunpack.c.l.b16 %v2280_v54 }
 0x410   : > { %4124 = vpow2.f32 %v1906_v14  ;;  %v4121_v12 = vpop.eup %4120  ;;  %v2312_v23 = vpack.c.bf16 %v2248_v13, %v2248_v13  ;;  %v2603_v42 = vunpack.c.l.b16 %v2297_v36 }
 0x411   : > { %v2217_v49 = vmul.f32 %v4121_v12, %v5669_v39  ;;  %v4123_v8 = vpop.eup %4122  ;;  %v2602_v39 = vunpack.c.l.b16 %v2296_v17  ;;  %v2049_v26 = vpop.xlane.xlu1 %2048 }
 0x412   : > { %v2081_v1 = vpop.xlane.xlu2 %2080  ;;  %v2249_v29 = vmul.f32 %v4123_v8, %v5674_v43  ;;  %v2731_v46 = vunpack.c.l.b16 %v2312_v23 }
 0x413   : > { %v2083_v21 = vpop.xlane.xlu0 %2082  ;;  %v2281_v2 = vpack.c.bf16 %v2217_v49, %v2217_v49  ;;  %v2616_v56 = vpack.c.b16 %v2603_v42, %v2602_v39 }
 0x414   : > { %4126 = vrcp.f32 %v2083_v21  ;;  %v2313_v60 = vpack.c.bf16 %v2249_v29, %v2249_v29 }
 0x415   : > { %4128 = vrcp.f32 %v2081_v1  ;;  %v2474_v9 = vunpack.c.l.b16 %v2281_v2 }
 0x416   : > { %v5872_v63 = vpop.eup %4124  ;;  %v2732_v59 = vunpack.c.l.b16 %v2313_v60 }
 0x417   : > { %2034 = vadd.xlane.f32.xlu0 %v5872_v63  ;;  %v2487_v32 = vpack.c.b16 %v2474_v9, %v2473_v47 }
 0x418   : > { %v2745_v4 = vpack.c.b16 %v2732_v59, %v2731_v46 }
 0x41a   : > { %v4127_v44 = vpop.eup %4126  ;;  %2680 = vmatmul.bf16.gmra.mxu1 %v2616_v56  ;;  %v2113_v16 = vpop.xlane.xlu2 %2112 }
 0x41b   : > { %v4129_v35 = vpop.eup %4128  ;;  %v2115_v43 = vpop.xlane.xlu0 %2114  ;;  %2551 = vmatmul.bf16.gmra.mxu0 %v2487_v32  ;;  %2809 = vmatmul.bf16.gmra.mxu2 %v2745_v4  ;;  %v2235_v50 = vmul.f32 %v4127_v44, %v5685_v24 }
 0x41c   : > { %4130 = vrcp.f32 %v2115_v43  ;;  %v2234_v53 = vmul.f32 %v4129_v35, %v5688_v18 }
 0x41d   : > { %4132 = vrcp.f32 %v2113_v16  ;;  %v2299_v62 = vpack.c.bf16 %v2235_v50, %v2235_v50 }
 0x41e   : > { %4134 = vrcp.f32 %v2049_v26  ;;  %v2298_v14 = vpack.c.bf16 %v2234_v53, %v2234_v53 }
 0x41f   : > { %v2605_v18 = vunpack.c.l.b16 %v2299_v62 }
 0x420   : > { %v2604_v17 = vunpack.c.l.b16 %v2298_v14 }
 0x422   : > { %v4131_v3 = vpop.eup %4130  ;;  %v2087_v13 = vpop.xlane.xlu1 %2086  ;;  %v2617_v47 = vpack.c.b16 %v2605_v18, %v2604_v17 }
 0x423   : > { %v4133_v12 = vpop.eup %4132  ;;  %4136 = vrcp.f32 %v2087_v13  ;;  %v2085_v36 = vpop.xlane.xlu0 %2084  ;;  %v2251_v49 = vmul.f32 %v4131_v3, %v5697_v11 }
 0x424   : > { %v2051_v54 = vpop.xlane.xlu2 %2050  ;;  %4138 = vrcp.f32 %v2085_v36  ;;  %v2250_v8 = vmul.f32 %v4133_v12, %v5699_v30  ;;  %v4135_v21 = vpop.eup %4134 }
 0x425   : > { %4140 = vrcp.f32 %v2051_v54  ;;  %v2315_v1 = vpack.c.bf16 %v2251_v49, %v2251_v49  ;;  %v2218_v23 = vmul.f32 %v4135_v21, %v5683_v52 }
 0x426   : > { %v2314_v24 = vpack.c.bf16 %v2250_v8, %v2250_v8 }
 0x427   : > { %v2734_v2 = vunpack.c.l.b16 %v2315_v1  ;;  %v2282_v59 = vpack.c.bf16 %v2218_v23, %v2218_v23 }
 0x428   : > { %v2733_v29 = vunpack.c.l.b16 %v2314_v24 }
 0x429   : > { %v4137_v42 = vpop.eup %4136  ;;  %v2475_v35 = vunpack.c.l.b16 %v2282_v59 }
 0x42a   : > { %v4139_v9 = vpop.eup %4138  ;;  %v2119_v60 = vpop.xlane.xlu1 %2118  ;;  %v2746_v39 = vpack.c.b16 %v2734_v2, %v2733_v29  ;;  %2685 = vmatmul.bf16.gmra.mxu1 %v2617_v47  ;;  %v2237_v52 = vmul.f32 %v4137_v42, %v5708_v58 }
 0x42b   : > { %v4141_v11 = vpop.eup %4140  ;;  %4142 = vrcp.f32 %v2119_v60  ;;  %v2117_v32 = vpop.xlane.xlu0 %2116  ;;  %v2236_v44 = vmul.f32 %v4139_v9, %v5710_v25 }
 0x42c   : > { %v1713_v30 = vpop.xlane.xlu2 %1712  ;;  %2814 = vmatmul.bf16.gmra.mxu2 %v2746_v39  ;;  %4144 = vrcp.f32 %v2117_v32  ;;  %v2219_v46 = vmul.f32 %v4141_v11, %v5714_v51  ;;  %v2301_v50 = vpack.c.bf16 %v2237_v52, %v2237_v52 }
 0x42d   : > { %v1826_v56 = vsub.f32 %v5732_v40, %v1713_v30  ;;  %v2300_v53 = vpack.c.bf16 %v2236_v44, %v2236_v44 }
 0x42e   : > { %v2283_v26 = vpack.c.bf16 %v2219_v46, %v2219_v46  ;;  %v2607_v36 = vunpack.c.l.b16 %v2301_v50 }
 0x42f   : > { %v1904_v4 = vmul.f32 1.442695, %v1826_v56  ;;  %v2606_v25 = vunpack.c.l.b16 %v2300_v53 }
 0x430   : > { %v2476_v43 = vunpack.c.l.b16 %v2283_v26 }
 0x431   : > { %v4143_v16 = vpop.eup %4142  ;;  %4146 = vpow2.f32 %v1904_v4  ;;  %v2618_v17 = vpack.c.b16 %v2607_v36, %v2606_v25  ;;  %v6296_v36 = vld [vmem:[#allocation30_spill] sm:$0xff] }
 0x432   : > { %v4145_v14 = vpop.eup %4144  ;;  %v2089_v62 = vpop.xlane.xlu1 %2088  ;;  %v2488_v3 = vpack.c.b16 %v2476_v43, %v2475_v35  ;;  %v2253_v51 = vmul.f32 %v4143_v16, %v5725_v7 }
 0x433   : > { %v2055_v13 = vpop.xlane.xlu0 %2054  ;;  %v2252_v40 = vmul.f32 %v4145_v14, %v5729_v33 }
 0x434   : > { %v2053_v12 = vpop.xlane.xlu2 %2052  ;;  %2556 = vmatmul.bf16.gmra.mxu0 %v2488_v3  ;;  %4148 = vrcp.f32 %v2055_v13  ;;  %v2317_v58 = vpack.c.bf16 %v2253_v51, %v2253_v51  ;;  %v6295_v13 = vld [vmem:[#allocation42_spill] sm:$0xff] }
 0x435   : > { %4150 = vrcp.f32 %v2053_v12  ;;  %v2316_v49 = vpack.c.bf16 %v2252_v40, %v2252_v40 }
 0x436   : > { %v2736_v54 = vunpack.c.l.b16 %v2317_v58 }
 0x437   : > { %v5886_v8 = vpop.eup %4146  ;;  %v2735_v21 = vunpack.c.l.b16 %v2316_v49 }
 0x438   : > { %2032 = vadd.xlane.f32.xlu2 %v5886_v8 }
 0x439   : > { %v2747_v18 = vpack.c.b16 %v2736_v54, %v2735_v21 }
 0x43a   : > { %v4149_v7 = vpop.eup %4148  ;;  %v2059_v1 = vpop.xlane.xlu1 %2058  ;;  %2690 = vmatmul.bf16.gmra.mxu1 %v2618_v17 }
 0x43b   : > { %v4151_v24 = vpop.eup %4150  ;;  %v2057_v33 = vpop.xlane.xlu0 %2056  ;;  %v2221_v2 = vmul.f32 %v4149_v7, %v5743_v15  ;;  %4152 = vrcp.f32 %v2059_v1 }
 0x43c   : > { %v2121_v29 = vpop.xlane.xlu2 %2120  ;;  %2819 = vmatmul.bf16.gmra.mxu2 %v2747_v18  ;;  %v2220_v23 = vmul.f32 %v4151_v24, %v5746_v48  ;;  %4154 = vrcp.f32 %v2057_v33 }
 0x43d   : > { %v2285_v42 = vpack.c.bf16 %v2221_v2, %v2221_v2  ;;  %4156 = vrcp.f32 %v2121_v29 }
 0x43e   : > { %v2284_v47 = vpack.c.bf16 %v2220_v23, %v2220_v23  ;;  %4158 = vrcp.f32 %v2089_v62 }
 0x43f   : > { %v2478_v9 = vunpack.c.l.b16 %v2285_v42 }
 0x440   : > { %v2477_v60 = vunpack.c.l.b16 %v2284_v47 }
 0x441   : > { %v4153_v39 = vpop.eup %4152 }
 0x442   : > { %v2023_v11 = vpop.xlane.xlu1 %2022  ;;  %v2489_v32 = vpack.c.b16 %v2478_v9, %v2477_v60  ;;  %v4155_v30 = vpop.eup %4154  ;;  %v2223_v44 = vmul.f32 %v4153_v39, %v5754_v10  ;;  %v6297_v60 = vld [vmem:[#allocation32_spill] sm:$0xff] }
 0x443   : > { %v2123_v46 = vpop.xlane.xlu0 %2122  ;;  %v4157_v59 = vpop.eup %4156  ;;  %v2222_v48 = vmul.f32 %v4155_v30, %v5756_v55 }
 0x444   : > { %v2091_v56 = vpop.xlane.xlu2 %2090  ;;  %2561 = vmatmul.bf16.gmra.mxu0 %v2489_v32  ;;  %4160 = vrcp.f32 %v2123_v46  ;;  %v4159_v15 = vpop.eup %4158  ;;  %v2254_v52 = vmul.f32 %v4157_v59, %v5759_v57  ;;  %v2287_v16 = vpack.c.bf16 %v2223_v44, %v2223_v44 }
 0x445   : > { %4162 = vrcp.f32 %v2091_v56  ;;  %v2238_v26 = vmul.f32 %v4159_v15, %v5741_v34  ;;  %v2286_v43 = vpack.c.bf16 %v2222_v48, %v2222_v48 }
 0x446   : > { %4164 = vrcp.f32 %v2023_v11  ;;  %v2318_v62 = vpack.c.bf16 %v2254_v52, %v2254_v52  ;;  %v2480_v57 = vunpack.c.l.b16 %v2287_v16 }
 0x447   : > { %v2302_v40 = vpack.c.bf16 %v2238_v26, %v2238_v26  ;;  %v2479_v12 = vunpack.c.l.b16 %v2286_v43 }
 0x448   : > { %v2737_v34 = vunpack.c.l.b16 %v2318_v62 }
 0x449   : > { %v2608_v54 = vunpack.c.l.b16 %v2302_v40  ;;  %v2490_v7 = vpack.c.b16 %v2480_v57, %v2479_v12 }
 0x44a   : > { %v4161_v4 = vpop.eup %4160  ;;  %v2061_v35 = vpop.xlane.xlu1 %2060 }
 0x44b   : > { %v4163_v53 = vpop.eup %4162  ;;  %v2021_v50 = vpop.xlane.xlu0 %2020  ;;  %v2255_v14 = vmul.f32 %v4161_v4, %v5772_v41 }
 0x44c   : > { %v4165_v3 = vpop.eup %4164  ;;  %v2093_v51 = vpop.xlane.xlu2 %2092  ;;  %4166 = vrcp.f32 %v2021_v50  ;;  %v2239_v55 = vmul.f32 %v4163_v53, %v6295_v13 }
 0x44d   : > { %v2319_v10 = vpack.c.bf16 %v2255_v14, %v2255_v14  ;;  %4168 = vrcp.f32 %v2061_v35  ;;  %v2205_v49 = vmul.f32 %v4165_v3, %v6296_v36 }
 0x44e   : > { %v2303_v58 = vpack.c.bf16 %v2239_v55, %v2239_v55 }
 0x44f   : > { %v2738_v25 = vunpack.c.l.b16 %v2319_v10  ;;  %v2269_v2 = vpack.c.bf16 %v2205_v49, %v2205_v49 }
 0x450   : > { %v2609_v21 = vunpack.c.l.b16 %v2303_v58  ;;  %v6298_v58 = vld [vmem:[#allocation37_spill] sm:$0xff] }
 0x451   : > { %v2748_v17 = vpack.c.b16 %v2738_v25, %v2737_v34  ;;  %v2349_v9 = vunpack.c.l.b16 %v2269_v2 }
 0x452   : > { %v4167_v41 = vpop.eup %4166  ;;  %v2127_v18 = vpop.xlane.xlu1 %2126  ;;  %v2619_v1 = vpack.c.b16 %v2609_v21, %v2608_v54 }
 0x453   : > { %4170 = vrcp.f32 %v2127_v18  ;;  %2824 = vmatmul.bf16.gmra.mxu2 %v2748_v17  ;;  %v2125_v24 = vpop.xlane.xlu0 %2124  ;;  %v2204_v33 = vmul.f32 %v4167_v41, %v5787_v20  ;;  %v4169_v23 = vpop.eup %4168 }
 0x454   : > { %v2063_v29 = vpop.xlane.xlu2 %2062  ;;  %2566 = vmatmul.bf16.gmra.mxu0 %v2490_v7  ;;  %2695 = vmatmul.bf16.gmra.mxu1 %v2619_v1  ;;  %4172 = vrcp.f32 %v2125_v24  ;;  %v2224_v39 = vmul.f32 %v4169_v23, %v6297_v60 }
 0x455   : > { %4174 = vrcp.f32 %v2063_v29  ;;  %v2268_v42 = vpack.c.bf16 %v2204_v33, %v2204_v33 }
 0x456   : > { %4176 = vrcp.f32 %v2093_v51  ;;  %v2288_v26 = vpack.c.bf16 %v2224_v39, %v2224_v39 }
 0x457   : > { %v2348_v47 = vunpack.c.l.b16 %v2268_v42 }
 0x459   : > { %v4171_v11 = vpop.eup %4170  ;;  %v2360_v32 = vpack.c.b16 %v2349_v9, %v2348_v47  ;;  %v6299_v47 = vld [vmem:[#allocation43_spill] sm:$0xff] }
 0x45a   : > { %v4173_v30 = vpop.eup %4172  ;;  %v2129_v46 = vpop.xlane.xlu1 %2128  ;;  %v2257_v59 = vmul.f32 %v4171_v11, %v5798_v6  ;;  %v2481_v6 = vunpack.c.l.b16 %v2288_v26 }
 0x45b   : > { %v4175_v20 = vpop.eup %4174  ;;  %2432 = vmatmul.bf16.gmra.mxu3 %v2360_v32  ;;  %v2095_v56 = vpop.xlane.xlu0 %2094  ;;  %v2256_v15 = vmul.f32 %v4173_v30, %v5800_v19 }
 0x45c   : > { %v4177_v48 = vpop.eup %4176  ;;  %v2025_v44 = vpop.xlane.xlu2 %2024  ;;  %4178 = vrcp.f32 %v2095_v56  ;;  %v2225_v52 = vmul.f32 %v4175_v20, %v5803_v0  ;;  %v2321_v4 = vpack.c.bf16 %v2257_v59, %v2257_v59 }
 0x45d   : > { %v2320_v35 = vpack.c.bf16 %v2256_v15, %v2256_v15  ;;  %4180 = vrcp.f32 %v2129_v46  ;;  %v2240_v50 = vmul.f32 %v4177_v48, %v5790_v28 }
 0x45e   : > { %v2289_v43 = vpack.c.bf16 %v2225_v52, %v2225_v52  ;;  %v2740_v16 = vunpack.c.l.b16 %v2321_v4 }
 0x45f   : > { %v2739_v53 = vunpack.c.l.b16 %v2320_v35  ;;  %v2304_v55 = vpack.c.bf16 %v2240_v50, %v2240_v50 }
 0x460   : > { %v2482_v14 = vunpack.c.l.b16 %v2289_v43 }
 0x461   : > { %v2749_v62 = vpack.c.b16 %v2740_v16, %v2739_v53  ;;  %v2610_v28 = vunpack.c.l.b16 %v2304_v55 }
 0x462   : > { %v4179_v3 = vpop.eup %4178  ;;  %v2067_v51 = vpop.xlane.xlu1 %2066  ;;  %v2491_v19 = vpack.c.b16 %v2482_v14, %v2481_v6 }
 0x463   : > { %4182 = vrcp.f32 %v2067_v51  ;;  %2829 = vmatmul.bf16.gmra.mxu2 %v2749_v62  ;;  %v2065_v13 = vpop.xlane.xlu0 %2064  ;;  %v2241_v0 = vmul.f32 %v4179_v3, %v5812_v5  ;;  %v4181_v10 = vpop.eup %4180  ;;  %v6300_v62 = vld [vmem:[#allocation28_spill] sm:$0xff] }
 0x464   : > { %v2131_v40 = vpop.xlane.xlu2 %2130  ;;  %2571 = vmatmul.bf16.gmra.mxu0 %v2491_v19  ;;  %4184 = vrcp.f32 %v2065_v13  ;;  %v2258_v34 = vmul.f32 %v4181_v10, %v6298_v58 }
 0x465   : > { %4186 = vrcp.f32 %v2131_v40  ;;  %v2305_v12 = vpack.c.bf16 %v2241_v0, %v2241_v0 }
 0x466   : > { %4188 = vrcp.f32 %v2025_v44  ;;  %v2322_v33 = vpack.c.bf16 %v2258_v34, %v2258_v34 }
 0x467   : > { %v2611_v57 = vunpack.c.l.b16 %v2305_v12 }
 0x468   : > { %v2741_v9 = vunpack.c.l.b16 %v2322_v33 }
 0x469   : > { %v4183_v25 = vpop.eup %4182  ;;  %v2620_v36 = vpack.c.b16 %v2611_v57, %v2610_v28 }
 0x46a   : > { %v4185_v49 = vpop.eup %4184  ;;  %v2097_v54 = vpop.xlane.xlu1 %2096  ;;  %v2227_v21 = vmul.f32 %v4183_v25, %v5827_v31 }
 0x46b   : > { %v4187_v17 = vpop.eup %4186  ;;  %4190 = vrcp.f32 %v2097_v54  ;;  %2700 = vmatmul.bf16.gmra.mxu1 %v2620_v36  ;;  %v2027_v5 = vpop.xlane.xlu0 %2026  ;;  %v2226_v41 = vmul.f32 %v4185_v49, %v5829_v37 }
 0x46c   : > { %v4189_v18 = vpop.eup %4188  ;;  %v2099_v7 = vpop.xlane.xlu2 %2098  ;;  %4192 = vrcp.f32 %v2027_v5  ;;  %v2291_v1 = vpack.c.bf16 %v2227_v21, %v2227_v21  ;;  %v2259_v24 = vmul.f32 %v4187_v17, %v5835_v61 }
 0x46d   : > { %4194 = vrcp.f32 %v2099_v7  ;;  %v2290_v2 = vpack.c.bf16 %v2226_v41, %v2226_v41  ;;  %v2206_v31 = vmul.f32 %v4189_v18, %v6299_v47 }
 0x46e   : > { %v2484_v29 = vunpack.c.l.b16 %v2291_v1  ;;  %v2323_v23 = vpack.c.bf16 %v2259_v24, %v2259_v24 }
 0x46f   : > { %v2483_v42 = vunpack.c.l.b16 %v2290_v2  ;;  %v2270_v56 = vpack.c.bf16 %v2206_v31, %v2206_v31 }
 0x470   : > { %v2742_v60 = vunpack.c.l.b16 %v2323_v23 }
 0x471   : > { %v4191_v39 = vpop.eup %4190  ;;  %v2492_v11 = vpack.c.b16 %v2484_v29, %v2483_v42  ;;  %v2350_v35 = vunpack.c.l.b16 %v2270_v56 }
 0x472   : > { %v4193_v32 = vpop.eup %4192  ;;  %v2031_v37 = vpop.xlane.xlu1 %2030  ;;  %v2750_v30 = vpack.c.b16 %v2742_v60, %v2741_v9  ;;  %v2242_v46 = vmul.f32 %v4191_v39, %v5844_v45 }
 0x473   : > { %v4195_v59 = vpop.eup %4194  ;;  %4196 = vrcp.f32 %v2031_v37  ;;  %v2029_v61 = vpop.xlane.xlu0 %2028  ;;  %v2207_v20 = vmul.f32 %v4193_v32, %v5846_v27 }
 0x474   : > { %2576 = vmatmul.bf16.gmra.mxu0 %v2492_v11  ;;  %2834 = vmatmul.bf16.gmra.mxu2 %v2750_v30  ;;  %4198 = vrcp.f32 %v2029_v61  ;;  %v2243_v15 = vmul.f32 %v4195_v59, %v5849_v22  ;;  %v2306_v48 = vpack.c.bf16 %v2242_v46, %v2242_v46 }
 0x475   : > { %v2271_v44 = vpack.c.bf16 %v2207_v20, %v2207_v20 }
 0x476   : > { %v2307_v52 = vpack.c.bf16 %v2243_v15, %v2243_v15  ;;  %v2612_v26 = vunpack.c.l.b16 %v2306_v48  ;;  %v5913_v4 = vpop.f32.mrf.mxu2 }
 0x477   : > { %v2351_v43 = vunpack.c.l.b16 %v2271_v44  ;;  %v5915_v45 = vpop.f32.mrf.mxu1 }
 0x478   : > { %v2613_v16 = vunpack.c.l.b16 %v2307_v52  ;;  %v5917_v50 = vpop.f32.mrf.mxu0 }
 0x479   : > { %v4197_v53 = vpop.eup %4196  ;;  %v2361_v27 = vpack.c.b16 %v2351_v43, %v2350_v35  ;;  %v3573_v43 = vld [vmem:[#allocation7 + $0x38] sm:$0xff] }
 0x47a   : > { %v4199_v6 = vpop.eup %4198  ;;  %v2621_v14 = vpack.c.b16 %v2613_v16, %v2612_v26  ;;  %v2209_v3 = vmul.f32 %v4197_v53, %v6300_v62  ;;  %3734 = vmatpush.bf16.msra.mxu3 %v3573_v43  ;;  %3138 = vmatpush.bf16.msrb.mxu0 %v3573_v43  ;;  %v3572_v62 = vld [vmem:[#allocation7 + $0x30] sm:$0xff] }
 0x47b   : > { %2437 = vmatmul.bf16.gmra.mxu3 %v2361_v27  ;;  %v2208_v22 = vmul.f32 %v4199_v6, %v5856_v38 }
 0x47c   : > { %2705 = vmatmul.bf16.gmra.mxu1 %v2621_v14  ;;  %v2273_v10 = vpack.c.bf16 %v2209_v3, %v2209_v3 }
 0x47d   : > { %v2272_v40 = vpack.c.bf16 %v2208_v22, %v2208_v22 }
 0x47e   : > { %v5921_v51 = vpop.f32.mrf.mxu2  ;;  %v2353_v28 = vunpack.c.l.b16 %v2273_v10  ;;  %3735 = vmatpush.bf16.msra.mxu3 %v3572_v62  ;;  %3139 = vmatpush.bf16.msrb.mxu0 %v3572_v62 }
 0x47f   : > { %v3943_v19 = vpack.i.bf16 %v5921_v51, %v5913_v4  ;;  %v5925_v13 = vpop.f32.mrf.mxu1  ;;  %v2352_v38 = vunpack.c.l.b16 %v2272_v40 }
 0x480   : > { %v5927_v0 = vpop.f32.mrf.mxu0  ;;  %v3938_v55 = vpack.i.bf16 %v5925_v13, %v5915_v45 }
 0x481   : > { %v3933_v12 = vpack.i.bf16 %v5927_v0, %v5917_v50  ;;  %v2362_v34 = vpack.c.b16 %v2353_v28, %v2352_v38 }
 0x487   : > { %v2676_v57 = vpop.f32.mrf.mxu1 }
 0x488   : > { %v2547_v58 = vpop.f32.mrf.mxu0 }
 0x48a   : > { %v2035_v29 = vpop.xlane.xlu0 %2034 }
 0x48b   : > { %2442 = vmatmul.bf16.gmra.mxu3 %v2362_v34  ;;  %4200 = vrcp.f32 %v2035_v29  ;;  %v3571_v34 = vld [vmem:[#allocation7 + $0x28] sm:$0xff] }
 0x48c   : > { %3736 = vmatpush.bf16.msra.mxu3 %v3571_v34  ;;  %3140 = vmatpush.bf16.msrb.mxu0 %v3571_v34 }
 0x48e   : > { %v2805_v25 = vpop.f32.mrf.mxu2 }
 0x48f   : > { %v2678_v36 = vpop.f32.mrf.mxu1 }
 0x490   : > { %v2549_v49 = vpop.f32.mrf.mxu0  ;;  %v3833_v54 = vpack.i.bf16 %v2678_v36, %v2676_v57  ;;  %v3570_v36 = vld [vmem:[#allocation7 + $0x20] sm:$0xff] }
 0x491   : > { %v3828_v21 = vpack.i.bf16 %v2549_v49, %v2547_v58  ;;  %v4201_v9 = vpop.eup %4200  ;;  %3737 = vmatpush.bf16.msra.mxu3 %v3570_v36  ;;  %3141 = vmatpush.bf16.msrb.mxu0 %v3570_v36 }
 0x492   : > { %3834 = vrot.lane.b32.xlu2 %v3833_v54, %s4407_s21  ;;  %v2211_v39 = vmul.f32 %v4201_v9, %v5872_v63 }
 0x493   : > { %3829 = vrot.lane.b32.xlu1 %v3828_v21, %s4409_s11  ;;  %v3569_v21 = vld [vmem:[#allocation7 + $0x18] sm:$0xff] }
 0x494   : > { %v2275_v59 = vpack.c.bf16 %v2211_v39, %v2211_v39 }
 0x495   : > { %3738 = vmatpush.bf16.msra.mxu3 %v3569_v21  ;;  %3142 = vmatpush.bf16.msrb.mxu0 %v3569_v21 }
 0x496   : > { %v2807_v17 = vpop.f32.mrf.mxu2  ;;  %v2355_v15 = vunpack.c.l.b16 %v2275_v59 }
 0x497   : > { %v3838_v5 = vpack.i.bf16 %v2807_v17, %v2805_v25  ;;  %v2681_v41 = vpop.f32.mrf.mxu1 }
 0x498   : > { %v2552_v18 = vpop.f32.mrf.mxu0 }
 0x499   : > { %3839 = vrot.lane.b32.xlu0 %v3838_v5, %s4408_s26  ;;  %v3568_v5 = vld [vmem:[#allocation7 + $0x10] sm:$0xff] }
 0x49a   : > { %3739 = vmatpush.bf16.msra.mxu3 %v3568_v5  ;;  %3143 = vmatpush.bf16.msrb.mxu0 %v3568_v5 }
 0x49e   : > { %v2810_v7 = vpop.f32.mrf.mxu2 }
 0x49f   : > { %v2683_v1 = vpop.f32.mrf.mxu1 }
 0x4a0   : > { %v2554_v24 = vpop.f32.mrf.mxu0  ;;  %v3848_v33 = vpack.i.bf16 %v2683_v1, %v2681_v41  ;;  %v5950_v41 = vpop.f32.mrf.mxu3 }
 0x4a1   : > { %v3843_v2 = vpack.i.bf16 %v2554_v24, %v2552_v18  ;;  %v3567_v24 = vld [vmem:[#allocation7 + $0x8] sm:$0xff] }
 0x4a2   : > { %3849 = vrot.lane.b32.xlu0 %v3848_v33, %s4407_s21  ;;  %3740 = vmatpush.bf16.msra.mxu3 %v3567_v24 }
 0x4a3   : > { %3844 = vrot.lane.b32.xlu1 %v3843_v2, %s4409_s11  ;;  %v3566_v2 = vld [vmem:[#allocation7] sm:$0xff]  ;;  %3144 = vmatpush.bf16.msrb.mxu0 %v3567_v24 }
 0x4a6   : > { %v2812_v23 = vpop.f32.mrf.mxu2  ;;  %3741 = vmatpush.bf16.msra.mxu3 %v3566_v2 }
 0x4a7   : > { %v3853_v42 = vpack.i.bf16 %v2812_v23, %v2810_v7  ;;  %v2686_v47 = vpop.f32.mrf.mxu1  ;;  %3145 = vmatpush.bf16.msrb.mxu0 %v3566_v2 }
 0x4a9   : > { %3854 = vrot.lane.b32.xlu2 %v3853_v42, %s4408_s26 }
 0x4ab   : > { %v2033_v31 = vpop.xlane.xlu2 %2032 }
 0x4ac   : > { %4202 = vrcp.f32 %v2033_v31  ;;  %v5954_v31 = vpop.f32.mrf.mxu3 }
 0x4af   : > { %v2815_v60 = vpop.f32.mrf.mxu2  ;;  %v2688_v11 = vpop.f32.mrf.mxu1 }
 0x4b0   : > { %v3863_v37 = vpack.i.bf16 %v2688_v11, %v2686_v47 }
 0x4b1   : > { %v2557_v32 = vpop.f32.mrf.mxu0 }
 0x4b2   : > { %v4203_v30 = vpop.eup %4202  ;;  %3864 = vrot.lane.b32.xlu0 %v3863_v37, %s4407_s21 }
 0x4b3   : > { %v2210_v46 = vmul.f32 %v4203_v30, %v5886_v8 }
 0x4b5   : > { %v2274_v61 = vpack.c.bf16 %v2210_v46, %v2210_v46 }
 0x4b7   : > { %v2817_v20 = vpop.f32.mrf.mxu2  ;;  %v2354_v56 = vunpack.c.l.b16 %v2274_v61  ;;  %v2691_v44 = vpop.f32.mrf.mxu1 }
 0x4b8   : > { %v3868_v48 = vpack.i.bf16 %v2817_v20, %v2815_v60 }
 0x4b9   : > { %v2559_v52 = vpop.f32.mrf.mxu0  ;;  %v2363_v26 = vpack.c.b16 %v2355_v15, %v2354_v56 }
 0x4ba   : > { %v3858_v35 = vpack.i.bf16 %v2559_v52, %v2557_v32  ;;  %3869 = vrot.lane.b32.xlu2 %v3868_v48, %s4408_s26  ;;  %v2418_v32 = vpop.f32.mrf.mxu3 }
 0x4bb   : > { %2447 = vmatmul.bf16.gmra.mxu3 %v2363_v26 }
 0x4bc   : > { %3859 = vrot.lane.b32.xlu1 %v3858_v35, %s4409_s11 }
 0x4bf   : > { %v2820_v63 = vpop.f32.mrf.mxu2  ;;  %v2693_v16 = vpop.f32.mrf.mxu1 }
 0x4c0   : > { %v3878_v8 = vpack.i.bf16 %v2693_v16, %v2691_v44 }
 0x4c1   : > { %v2562_v53 = vpop.f32.mrf.mxu0 }
 0x4c2   : > { %3879 = vrot.lane.b32.xlu0 %v3878_v8, %s4407_s21  ;;  %v2420_v61 = vpop.f32.mrf.mxu3 }
 0x4c7   : > { %v2822_v27 = vpop.f32.mrf.mxu2 }
 0x4c8   : > { %v3883_v6 = vpack.i.bf16 %v2822_v27, %v2820_v63 }
 0x4c9   : > { %v2564_v14 = vpop.f32.mrf.mxu0 }
 0x4ca   : > { %v3873_v22 = vpack.i.bf16 %v2564_v14, %v2562_v53  ;;  %3884 = vrot.lane.b32.xlu2 %v3883_v6, %s4408_s26  ;;  %v2423_v63 = vpop.f32.mrf.mxu3 }
 0x4cc   : > { %3874 = vrot.lane.b32.xlu1 %v3873_v22, %s4409_s11 }
 0x4d1   : > { %v2567_v3 = vpop.f32.mrf.mxu0  ;;  %v2696_v40 = vpop.f32.mrf.mxu1 }
 0x4d2   : > { %v2425_v6 = vpop.f32.mrf.mxu3 }
 0x4d6   : > { %v2825_v10 = vpop.f32.mrf.mxu2 }
 0x4d9   : > { %v2569_v38 = vpop.f32.mrf.mxu0  ;;  %v2698_v28 = vpop.f32.mrf.mxu1 }
 0x4da   : > { %v3888_v57 = vpack.i.bf16 %v2569_v38, %v2567_v3  ;;  %v3893_v58 = vpack.i.bf16 %v2698_v28, %v2696_v40  ;;  %v2428_v34 = vpop.f32.mrf.mxu3 }
 0x4dc   : > { %3894 = vrot.lane.b32.xlu0 %v3893_v58, %s4407_s21  ;;  %3889 = vrot.lane.b32.xlu1 %v3888_v57, %s4409_s11 }
 0x4de   : > { %v2827_v25 = vpop.f32.mrf.mxu2 }
 0x4df   : > { %v3898_v49 = vpack.i.bf16 %v2827_v25, %v2825_v10 }
 0x4e1   : > { %v2572_v54 = vpop.f32.mrf.mxu0  ;;  %3899 = vrot.lane.b32.xlu2 %v3898_v49, %s4408_s26 }
 0x4e2   : > { %v2430_v25 = vpop.f32.mrf.mxu3 }
 0x4e6   : > { %v2830_v17 = vpop.f32.mrf.mxu2 }
 0x4e8   : > { %v2701_v18 = vpop.f32.mrf.mxu1 }
 0x4e9   : > { %v2574_v7 = vpop.f32.mrf.mxu0 }
 0x4ea   : > { %v3903_v1 = vpack.i.bf16 %v2574_v7, %v2572_v54 }
 0x4ec   : > { %3904 = vrot.lane.b32.xlu1 %v3903_v1, %s4409_s11  ;;  %v3835_v48 = vpop.permute.xlu2 %3834 }
 0x4ed   : > { %v3837_v26 = vunpack.i.h.bf16 %v3835_v48  ;;  %v3836_v35 = vunpack.i.l.bf16 %v3835_v48 }
 0x4ee   : > { %v2832_v33 = vpop.f32.mrf.mxu2 }
 0x4ef   : > { %v3913_v29 = vpack.i.bf16 %v2832_v33, %v2830_v17 }
 0x4f0   : > { %v2703_v23 = vpop.f32.mrf.mxu1 }
 0x4f1   : > { %v2577_v42 = vpop.f32.mrf.mxu0  ;;  %v3908_v47 = vpack.i.bf16 %v2703_v23, %v2701_v18  ;;  %3914 = vrot.lane.b32.xlu2 %v3913_v29, %s4408_s26  ;;  %v2433_v23 = vpop.f32.mrf.mxu3 }
 0x4f3   : > { %3909 = vrot.lane.b32.xlu0 %v3908_v47, %s4407_s21 }
 0x4f7   : > { %v2835_v9 = vpop.f32.mrf.mxu2 }
 0x4f9   : > { %v2579_v60 = vpop.f32.mrf.mxu0  ;;  %v2706_v39 = vpop.f32.mrf.mxu1 }
 0x4fa   : > { %v3918_v11 = vpack.i.bf16 %v2579_v60, %v2577_v42  ;;  %v2435_v60 = vpop.f32.mrf.mxu3 }
 0x4fc   : > { %3919 = vrot.lane.b32.xlu1 %v3918_v11, %s4409_s11 }
 0x4ff   : > { %v2837_v37 = vpop.f32.mrf.mxu2 }
 0x500   : > { %v3928_v30 = vpack.i.bf16 %v2837_v37, %v2835_v9 }
 0x501   : > { %v2708_v46 = vpop.f32.mrf.mxu1 }
 0x502   : > { %v3923_v59 = vpack.i.bf16 %v2708_v46, %v2706_v39  ;;  %3929 = vrot.lane.b32.xlu2 %v3928_v30, %s4408_s26 }
 0x503   : > { %v3855_v14 = vpop.permute.xlu2 %3854 }
 0x504   : > { %3924 = vrot.lane.b32.xlu0 %v3923_v59, %s4407_s21  ;;  %3934 = vrot.lane.b32.xlu1 %v3933_v12, %s4409_s11  ;;  %v3857_v10 = vunpack.i.h.bf16 %v3855_v14  ;;  %v3856_v38 = vunpack.i.l.bf16 %v3855_v14 }
 0x505   : > { %v3830_v20 = vpop.permute.xlu1 %3829 }
 0x506   : > { %v3832_v56 = vunpack.i.h.bf16 %v3830_v20  ;;  %v3831_v15 = vunpack.i.l.bf16 %v3830_v20 }
 0x508   : > { %v3035_v44 = vsel %vm1151_vm0, %v2420_v61, %v3832_v56  ;;  %v3034_v52 = vsel %vm1151_vm0, %v2418_v32, %v3831_v15 }
 0x509   : > { %v3051_v4 = vsel %vm3048_vm1, %v3034_v52, %v3836_v35  ;;  %v3052_v51 = vsel %vm3048_vm1, %v3035_v44, %v3837_v26 }
 0x50a   : > { %3944 = vrot.lane.b32.xlu2 %v3943_v19, %s4408_s26 }
 0x50b   : > { %v3840_v50 = vpop.permute.xlu0 %3839 }
 0x50c   : > { %3939 = vrot.lane.b32.xlu0 %v3938_v55, %s4407_s21  ;;  %v3842_v0 = vunpack.i.h.bf16 %v3840_v50  ;;  %v3841_v12 = vunpack.i.l.bf16 %v3840_v50  ;;  %v2438_v50 = vpop.f32.mrf.mxu3 }
 0x50e   : > { %v3069_v19 = vsel %vm3065_vm2, %v3052_v51, %v3842_v0  ;;  %v3068_v43 = vsel %vm3065_vm2, %v3051_v4, %v3841_v12 }
 0x50f   : > { %v3083_v16 = vpack.c.bf16 %v3069_v19, %v3068_v43 }
 0x511   : > { %3151 = vmatmul.bf16.vlgmr.msra.gmra.mxu3 %v3083_v16 }
 0x514   : > { %v3850_v53 = vpop.permute.xlu0 %3849  ;;  %v3870_v49 = vpop.permute.xlu2 %3869 }
 0x515   : > { %v3845_v8 = vpop.permute.xlu1 %3844  ;;  %v3852_v27 = vunpack.i.h.bf16 %v3850_v53  ;;  %v3851_v45 = vunpack.i.l.bf16 %v3850_v53  ;;  %v3872_v7 = vunpack.i.h.bf16 %v3870_v49  ;;  %v3871_v1 = vunpack.i.l.bf16 %v3870_v49  ;;  %v2440_v16 = vpop.f32.mrf.mxu3 }
 0x516   : > { %v3847_v13 = vunpack.i.h.bf16 %v3845_v8  ;;  %v3846_v55 = vunpack.i.l.bf16 %v3845_v8 }
 0x518   : > { %v3037_v22 = vsel %vm1151_vm0, %v2425_v6, %v3847_v13  ;;  %v3036_v62 = vsel %vm1151_vm0, %v2423_v63, %v3846_v55 }
 0x519   : > { %v3054_v3 = vsel %vm3048_vm1, %v3037_v22, %v3852_v27  ;;  %v3053_v40 = vsel %vm3048_vm1, %v3036_v62, %v3851_v45 }
 0x51a   : > { %v3070_v28 = vsel %vm3065_vm2, %v3053_v40, %v3856_v38  ;;  %v3071_v57 = vsel %vm3065_vm2, %v3054_v3, %v3857_v10 }
 0x51b   : > { %v3084_v58 = vpack.c.bf16 %v3071_v57, %v3070_v28 }
 0x51d   : > { %v2443_v62 = vpop.f32.mrf.mxu3 }
 0x521   : > { %3156 = vmatmul.bf16.gmra.mxu3 %v3084_v58 }
 0x524   : > { %v3865_v36 = vpop.permute.xlu0 %3864  ;;  %v3885_v11 = vpop.permute.xlu2 %3884 }
 0x525   : > { %v3867_v5 = vunpack.i.h.bf16 %v3865_v36  ;;  %v3866_v18 = vunpack.i.l.bf16 %v3865_v36  ;;  %v3887_v61 = vunpack.i.h.bf16 %v3885_v11  ;;  %v3886_v20 = vunpack.i.l.bf16 %v3885_v11  ;;  %v2445_v28 = vpop.f32.mrf.mxu3 }
 0x52e   : > { %v3860_v54 = vpop.permute.xlu1 %3859 }
 0x52f   : > { %v3862_v21 = vunpack.i.h.bf16 %v3860_v54  ;;  %v3861_v17 = vunpack.i.l.bf16 %v3860_v54 }
 0x531   : > { %v3039_v24 = vsel %vm1151_vm0, %v2430_v25, %v3862_v21  ;;  %v3038_v33 = vsel %vm1151_vm0, %v2428_v34, %v3861_v17 }
 0x532   : > { %v3055_v2 = vsel %vm3048_vm1, %v3038_v33, %v3866_v18  ;;  %v3056_v29 = vsel %vm3048_vm1, %v3039_v24, %v3867_v5 }
 0x533   : > { %v3072_v42 = vsel %vm3065_vm2, %v3055_v2, %v3871_v1  ;;  %v3073_v47 = vsel %vm3065_vm2, %v3056_v29, %v3872_v7 }
 0x534   : > { %v3085_v9 = vpack.c.bf16 %v3073_v47, %v3072_v42  ;;  %v3880_v39 = vpop.permute.xlu0 %3879 }
 0x535   : > { %v3882_v46 = vunpack.i.h.bf16 %v3880_v39  ;;  %v3881_v59 = vunpack.i.l.bf16 %v3880_v39 }
 0x536   : > { %3161 = vmatmul.bf16.gmra.mxu3 %v3085_v9 }
 0x53b   : > { %v3900_v0 = vpop.permute.xlu2 %3899 }
 0x53c   : > { %v3902_v53 = vunpack.i.h.bf16 %v3900_v0  ;;  %v3901_v8 = vunpack.i.l.bf16 %v3900_v0 }
 0x53e   : > { %v3875_v32 = vpop.permute.xlu1 %3874  ;;  %v2448_v1 = vpop.f32.mrf.mxu3 }
 0x53f   : > { %v3877_v37 = vunpack.i.h.bf16 %v3875_v32  ;;  %v3876_v30 = vunpack.i.l.bf16 %v3875_v32 }
 0x541   : > { %v3040_v56 = vsel %vm1151_vm0, %v2433_v23, %v3876_v30  ;;  %v3041_v15 = vsel %vm1151_vm0, %v2435_v60, %v3877_v37 }
 0x542   : > { %v3057_v48 = vsel %vm3048_vm1, %v3040_v56, %v3881_v59  ;;  %v3058_v44 = vsel %vm3048_vm1, %v3041_v15, %v3882_v46 }
 0x543   : > { %v3074_v52 = vsel %vm3065_vm2, %v3057_v48, %v3886_v20  ;;  %v3075_v26 = vsel %vm3065_vm2, %v3058_v44, %v3887_v61 }
 0x544   : > { %v3086_v35 = vpack.c.bf16 %v3075_v26, %v3074_v52 }
 0x546   : > { %3166 = vmatmul.bf16.gmra.mxu3 %v3086_v35  ;;  %v2450_v42 = vpop.f32.mrf.mxu3 }
 0x54b   : > { %v3915_v38 = vpop.permute.xlu2 %3914 }
 0x54c   : > { %v3917_v25 = vunpack.i.h.bf16 %v3915_v38  ;;  %v3916_v36 = vunpack.i.l.bf16 %v3915_v38 }
 0x54e   : > { %v3890_v12 = vpop.permute.xlu1 %3889  ;;  %v3895_v63 = vpop.permute.xlu0 %3894 }
 0x54f   : > { %v3892_v4 = vunpack.i.h.bf16 %v3890_v12  ;;  %v3891_v51 = vunpack.i.l.bf16 %v3890_v12  ;;  %v3897_v19 = vunpack.i.h.bf16 %v3895_v63  ;;  %v3896_v43 = vunpack.i.l.bf16 %v3895_v63 }
 0x551   : > { %v3042_v27 = vsel %vm1151_vm0, %v2438_v50, %v3891_v51  ;;  %v3043_v45 = vsel %vm1151_vm0, %v2440_v16, %v3892_v4 }
 0x552   : > { %v3060_v13 = vsel %vm3048_vm1, %v3043_v45, %v3897_v19  ;;  %v3059_v55 = vsel %vm3048_vm1, %v3042_v27, %v3896_v43 }
 0x553   : > { %v3076_v6 = vsel %vm3065_vm2, %v3059_v55, %v3901_v8  ;;  %v3077_v14 = vsel %vm3065_vm2, %v3060_v13, %v3902_v53 }
 0x554   : > { %v3087_v22 = vpack.c.bf16 %v3077_v14, %v3076_v6 }
 0x556   : > { %3171 = vmatmul.bf16.gmra.mxu3 %v3087_v22 }
 0x55c   : > { %v3930_v33 = vpop.permute.xlu2 %3929 }
 0x55d   : > { %v3932_v60 = vunpack.i.h.bf16 %v3930_v33  ;;  %v3931_v39 = vunpack.i.l.bf16 %v3930_v33 }
 0x55e   : > { %v3905_v3 = vpop.permute.xlu1 %3904 }
 0x55f   : > { %v3907_v40 = vunpack.i.h.bf16 %v3905_v3  ;;  %v3906_v10 = vunpack.i.l.bf16 %v3905_v3 }
 0x561   : > { %v3044_v49 = vsel %vm1151_vm0, %v2443_v62, %v3906_v10  ;;  %v3045_v54 = vsel %vm1151_vm0, %v2445_v28, %v3907_v40 }
 0x564   : > { %v3945_v48 = vpop.permute.xlu2 %3944 }
 0x565   : > { %v3910_v57 = vpop.permute.xlu0 %3909  ;;  %v3947_v35 = vunpack.i.h.bf16 %v3945_v48  ;;  %v3946_v50 = vunpack.i.l.bf16 %v3945_v48 }
 0x566   : > { %v3912_v58 = vunpack.i.h.bf16 %v3910_v57  ;;  %v3911_v34 = vunpack.i.l.bf16 %v3910_v57 }
 0x568   : > { %v3062_v21 = vsel %vm3048_vm1, %v3045_v54, %v3912_v58  ;;  %v3061_v17 = vsel %vm3048_vm1, %v3044_v49, %v3911_v34 }
 0x569   : > { %v3078_v5 = vsel %vm3065_vm2, %v3061_v17, %v3916_v36  ;;  %v3079_v18 = vsel %vm3065_vm2, %v3062_v21, %v3917_v25 }
 0x56a   : > { %v3088_v7 = vpack.c.bf16 %v3079_v18, %v3078_v5 }
 0x56c   : > { %3176 = vmatmul.bf16.gmra.mxu3 %v3088_v7 }
 0x56e   : > { %v3920_v24 = vpop.permute.xlu1 %3919 }
 0x56f   : > { %v3922_v2 = vunpack.i.h.bf16 %v3920_v24  ;;  %v3921_v29 = vunpack.i.l.bf16 %v3920_v24 }
 0x571   : > { %v3046_v11 = vsel %vm1151_vm0, %v2448_v1, %v3921_v29  ;;  %v3047_v32 = vsel %vm1151_vm0, %v2450_v42, %v3922_v2 }
 0x576   : > { %v3925_v23 = vpop.permute.xlu0 %3924  ;;  %v3935_v37 = vpop.permute.xlu1 %3934 }
 0x577   : > { %v3927_v47 = vunpack.i.h.bf16 %v3925_v23  ;;  %v3926_v9 = vunpack.i.l.bf16 %v3925_v23  ;;  %v3937_v56 = vunpack.i.h.bf16 %v3935_v37  ;;  %v3936_v15 = vunpack.i.l.bf16 %v3935_v37 }
 0x579   : > { %v3064_v30 = vsel %vm3048_vm1, %v3047_v32, %v3927_v47  ;;  %v3063_v46 = vsel %vm3048_vm1, %v3046_v11, %v3926_v9  ;;  %v3033_v0 = vsel %vm1151_vm0, %v5954_v31, %v3937_v56  ;;  %v3032_v12 = vsel %vm1151_vm0, %v5950_v41, %v3936_v15 }
 0x57a   : > { %v3080_v59 = vsel %vm3065_vm2, %v3063_v46, %v3931_v39  ;;  %v3081_v61 = vsel %vm3065_vm2, %v3064_v30, %v3932_v60 }
 0x57b   : > { %v3089_v20 = vpack.c.bf16 %v3081_v61, %v3080_v59 }
 0x57d   : > { %3181 = vmatmul.bf16.gmra.mxu3 %v3089_v20 }
 0x57e   : > { %v3940_v44 = vpop.permute.xlu0 %3939 }
 0x57f   : > { %v3942_v52 = vunpack.i.h.bf16 %v3940_v44  ;;  %v3941_v26 = vunpack.i.l.bf16 %v3940_v44 }
 0x581   : > { %v3050_v63 = vsel %vm3048_vm1, %v3033_v0, %v3942_v52  ;;  %v3049_v4 = vsel %vm3048_vm1, %v3032_v12, %v3941_v26 }
 0x582   : > { %v3067_v51 = vsel %vm3065_vm2, %v3050_v63, %v3947_v35  ;;  %v3066_v19 = vsel %vm3065_vm2, %v3049_v4, %v3946_v50 }
 0x583   : > { %v3082_v43 = vpack.c.bf16 %v3067_v51, %v3066_v19 }
 0x585   : > { %3146 = vmatmul.bf16.vlgmr.msrb.gmra.mxu0 %v3082_v43 }
 0x594   : > { %v3152_v16 = vpop.f32.mrf.mxu3 }
 0x595   : > { %3189 = vst [vmem:[%s6023_s13 + $0x10] sm:$0xff] %v3152_v16 }
 0x59c   : > { %v3154_v41 = vpop.f32.mrf.mxu3 }
 0x59d   : > { %3190 = vst [vmem:[%s6023_s13 + $0x18] sm:$0xff] %v3154_v41 }
 0x5a4   : > { %v3157_v31 = vpop.f32.mrf.mxu3 }
 0x5a5   : > { %3191 = vst [vmem:[%s6023_s13 + $0x20] sm:$0xff] %v3157_v31 }
 0x5ac   : > { %v3159_v53 = vpop.f32.mrf.mxu3 }
 0x5ad   : > { %3192 = vst [vmem:[%s6023_s13 + $0x28] sm:$0xff] %v3159_v53 }
 0x5b9   : > { %v3162_v8 = vpop.f32.mrf.mxu3 }
 0x5ba   : > { %3193 = vst [vmem:[%s6023_s13 + $0x30] sm:$0xff] %v3162_v8 }
 0x5c1   : > { %v3164_v27 = vpop.f32.mrf.mxu3 }
 0x5c2   : > { %3194 = vst [vmem:[%s6023_s13 + $0x38] sm:$0xff] %v3164_v27 }
 0x5c9   : > { %v3167_v45 = vpop.f32.mrf.mxu3 }
 0x5ca   : > { %3195 = vst [vmem:[%s6023_s13 + $0x40] sm:$0xff] %v3167_v45 }
 0x5d1   : > { %v3169_v13 = vpop.f32.mrf.mxu3 }
 0x5d2   : > { %3196 = vst [vmem:[%s6023_s13 + $0x48] sm:$0xff] %v3169_v13 }
 0x5d9   : > { %v3172_v55 = vpop.f32.mrf.mxu3 }
 0x5da   : > { %3197 = vst [vmem:[%s6023_s13 + $0x50] sm:$0xff] %v3172_v55 }
 0x5e1   : > { %v3174_v6 = vpop.f32.mrf.mxu3 }
 0x5e2   : > { %3198 = vst [vmem:[%s6023_s13 + $0x58] sm:$0xff] %v3174_v6 }
 0x5ef   : > { %v3177_v14 = vpop.f32.mrf.mxu3 }
 0x5f0   : > { %3199 = vst [vmem:[%s6023_s13 + $0x60] sm:$0xff] %v3177_v14 }
 0x5f7   : > { %v3179_v22 = vpop.f32.mrf.mxu3 }
 0x5f8   : > { %3200 = vst [vmem:[%s6023_s13 + $0x68] sm:$0xff] %v3179_v22 }
 0x600   : > { %v3182_v62 = vpop.f32.mrf.mxu3 }
 0x601   : > { %3201 = vst [vmem:[%s6023_s13 + $0x70] sm:$0xff] %v3182_v62 }
 0x602   : > { %v3147_v3 = vpop.f32.mrf.mxu0 }
 0x603   : > { %3187 = vst [vmem:[%s6023_s13] sm:$0xff] %v3147_v3 }
 0x608   : > { %v3184_v40 = vpop.f32.mrf.mxu3 }
 0x609   : > { %3202 = vst [vmem:[%s6023_s13 + $0x78] sm:$0xff] %v3184_v40 }
 0x60a   : > { %v3149_v10 = vpop.f32.mrf.mxu0 }
 0x60b   : > { %3188 = vst [vmem:[%s6023_s13 + $0x8] sm:$0xff] %v3149_v10 }
 0x60c   : > { %4351 = shalt.err (!%p4348_p10)
}
 0x60d   : > { %s4410_s29 = smov 128   ;;  %s4411_s11 = smov 8  }
 0x60e   : > { %3756 = dma.vmem_to_hbm [thread:$0]  (%p4525_p3), %s3217_s8, 2048, %s3219_s7, %s3204_s9, %s4410_s29, %s4410_s29, %s4411_s11  }
 0x60f PF: > { %s3233_s12 = sand.u32 1, %s4386_s15   ;;  %p6301_p12 = scmp.ge.s32.totalorder %s4398_s18, 2 }
 0x610   : > { %s3234_s13 = scalar_lea.sflag [#allocation4], %s3233_s12 }
 0x611   : > { %p3773_p13 = pnand %p6301_p12, %p4472_p6 }
 0x613   : > { %p3774_p0 = pneg %p3773_p13 }
 0x615   : > { %4381 = dma.done.wait (%p3774_p0), %s3234_s13, 2048  }
 0x616   : > { %4383 = vsyncadd (%p3774_p0), %s3234_s13, 4294965248  ;;  %p19_p5 = scmp.ge.s32.totalorder %s4512_s25, 4   ;;  %s6302_s15 = smov %s4390_s16 }
 0x617   : > { %s6303_s16 = smov %s4394_s17  ;;  %s6304_s17 = smov %s4521_s30 }
 0x618   : > { %s6305_s18 = smov %s4512_s25  ;;  %21 = sbr.rel (!%p19_p5) target bundleno = 7 (0x7), region = 93 }
 0x61d   :  { %3240 = vsyncpa [#allocation3], 1 }
 0x61e   :  { %3242 = vsyncpa [#allocation3 + $0x1], 1 }
 0x61f   :  { %3243 = vsyncpa [#allocation6], 1 }
 0x620   :  { %3244 = vsyncpa [#allocation9], 1 }
 0x621   :  { %3245 = vsyncpa [#allocation4], 1 }
 0x622   :  { %3247 = vsyncpa [#allocation4 + $0x1], 1 }

</bundles_post_ra>
